<compile_context>
chip_gen: v7x
topology: tpu7x:2x2x1
jax: 0.10.0
libtpu: 0.0.40
codegen_flags: <defaults>
</compile_context>

<pallas_src>
import jax
import jax.numpy as jnp
from jax.experimental import pallas as pl
from jax.experimental.pallas import tpu as pltpu


def gru_attention_kernel(
    x_ref,                                   # (T, TB, D)        bf16
    wi0_ref, bi0_ref,                        # (D, 3Hp) bf16, (1, 3Hp) f32 (bh0 r/z folded in)
    wh0_ref, bh0n_ref,                       # (Hp, 3Hp) bf16, (1, Hp) f32 (n-gate hidden bias)
    w1f_ref, b1f_ref,                        # GRU layer 1 fused: (2Hp, 4Hp) bf16, (1, 4Hp) f32
    aw1_ref, ab1_ref, aw2_ref,               # attention: (Hp,Hp) bf16, (1,Hp) f32, (1,Hp) f32
    fw1_ref, fb1_ref, fw2_ref, fb2_ref,      # head: (Hp,F) bf16, (1,F) f32, (F,OL) bf16, (1,OL) f32
    out_ref,                                 # (TB, OL) f32
    gi0_ref,                                 # scratch (T*TB, 3Hp) f32
    hs_ref,                                  # scratch (T*TB, Hp) bf16
):
    T, TB, D = x_ref.shape
    Hp = wh0_ref.shape[0]
    f32 = jnp.float32
    bf16 = jnp.bfloat16

    wh0 = wh0_ref[...]                        # bf16, resident across the loop
    w1f = w1f_ref[...]                        # bf16

    # ---- hoisted, loop-invariant bias broadcasts (JAX does not CSE these) ----
    bh0n_b = jnp.broadcast_to(bh0n_ref[...], (TB, Hp))        # f32
    b1f_b = jnp.broadcast_to(b1f_ref[...], (TB, 4 * Hp))      # f32

    # ---- hoisted layer-0 input projection: one big matmul, scratch-backed ----
    x2 = x_ref[...].reshape(T * TB, D)                         # leading-dim merge
    gi0_ref[...] = (jnp.dot(x2, wi0_ref[...], preferred_element_type=f32)
                    + bi0_ref[...])                            # (T*TB, 3Hp) f32

    h0 = jnp.zeros((TB, Hp), f32)
    h1 = jnp.zeros((TB, Hp), f32)

    # Static unroll: T is small and fixed.
    # TODO(synk): switch to lax.fori_loop with dynamic hs/gi0 slices if T grows large.
    for t in range(T):
        # ---- layer 0: only the hidden projection remains in the loop ----
        gi0 = gi0_ref[t * TB:(t + 1) * TB, :]                  # (TB, 3Hp) f32, aligned slice
        gh0 = jnp.dot(h0.astype(bf16), wh0, preferred_element_type=f32)
        rz0 = jax.nn.sigmoid(gi0[:, :2 * Hp] + gh0[:, :2 * Hp])   # r/z hidden biases folded in gi0
        r0 = rz0[:, :Hp]
        z0 = rz0[:, Hp:]
        n0 = jnp.tanh(gi0[:, 2 * Hp:] + r0 * (gh0[:, 2 * Hp:] + bh0n_b))
        h0 = (1.0 - z0) * n0 + z0 * h0

        # ---- layer 1: single fused matmul [h0 | h1_prev] @ W -> [r|z|n_i|n_h] ----
        cat = jnp.concatenate([h0.astype(bf16), h1.astype(bf16)], axis=1)  # (TB, 2Hp) bf16
        g1 = jnp.dot(cat, w1f, preferred_element_type=f32) + b1f_b         # (TB, 4Hp) f32
        rz1 = jax.nn.sigmoid(g1[:, :2 * Hp])
        r1 = rz1[:, :Hp]
        z1 = rz1[:, Hp:]
        n1 = jnp.tanh(g1[:, 2 * Hp:3 * Hp] + r1 * g1[:, 3 * Hp:])
        h1 = (1.0 - z1) * n1 + z1 * h1

        hs_ref[t * TB:(t + 1) * TB, :] = h1.astype(bf16)       # top-layer state -> VMEM scratch

    # ---- attention (batched over all T steps, outside the recurrence) ----
    hs2 = hs_ref[...]                                          # (T*TB, Hp) bf16
    e = jnp.tanh(jnp.dot(hs2, aw1_ref[...], preferred_element_type=f32) + ab1_ref[...])
    e3 = e.reshape(T, TB, Hp)
    s3 = jnp.sum(e3 * aw2_ref[...].reshape(1, 1, Hp), axis=2, keepdims=True)  # (T, TB, 1)
    m = jnp.max(s3, axis=0, keepdims=True)
    p = jnp.exp(s3 - m)
    w3 = p / jnp.sum(p, axis=0, keepdims=True)                 # softmax over seq (f32)

    hs3 = hs2.astype(f32).reshape(T, TB, Hp)
    ctx = jnp.sum(hs3 * w3, axis=0)                            # (TB, Hp) weighted sum, f32

    # ---- FC head; output padded to a lane-dense (TB, OL) block ----
    hfc = jnp.maximum(
        jnp.dot(ctx.astype(bf16), fw1_ref[...], preferred_element_type=f32) + fb1_ref[...],
        0.0)
    out_ref[...] = (jnp.dot(hfc.astype(bf16), fw2_ref[...], preferred_element_type=f32)
                    + fb2_ref[...])


def gru_with_attention(x, params):
    """Wrapper: pads/transposes weights into lane-aligned (in,out) bf16 layouts, calls the kernel."""
    f32 = jnp.float32
    bf16 = jnp.bfloat16
    B, T, D = x.shape
    H = params["wh0"].shape[1]                    # torch wh0 is (3H, H)
    F = params["fw1"].shape[0]                    # fc hidden width (128 in the module)
    Hp = ((H + 127) // 128) * 128                 # lane-aligned hidden
    OL = 128                                      # lane-dense output width (col 0 is real)

    # ---- adaptive batch tile: fill the MXU rows; >=2 grid steps for big batches ----
    TB_TARGET = 256                               # v6e/v7x MXU depth; also fine on v5e
    Bp8 = ((B + 7) // 8) * 8
    TB = Bp8 if Bp8 <= TB_TARGET else TB_TARGET
    Bp = ((B + TB - 1) // TB) * TB
    nb = Bp // TB

    def t2(w):                                    # torch (out, in) -> (in, out)
        return jnp.asarray(w, f32).T

    def pad2(w, r, c):
        w = jnp.asarray(w, f32)
        return jnp.pad(w, ((0, r - w.shape[0]), (0, c - w.shape[1])))

    def pad_gate_cols(w, n_gates):                # (in, n_gates*H) -> (in, n_gates*Hp)
        return jnp.concatenate(
            [jnp.pad(w[:, g * H:(g + 1) * H], ((0, 0), (0, Hp - H))) for g in range(n_gates)],
            axis=1)

    # ---- GRU layer 0 (r/z hidden biases folded into the input bias; n-gate bias separate) ----
    wi0 = pad_gate_cols(t2(params["wi0"]), 3).astype(bf16)                    # (D, 3Hp)
    wh0 = jnp.pad(pad_gate_cols(t2(params["wh0"]), 3),
                  ((0, Hp - H), (0, 0))).astype(bf16)                         # (Hp, 3Hp)
    bi0_t = jnp.asarray(params["bi0"], f32)
    bh0_t = jnp.asarray(params["bh0"], f32)
    bi0 = jnp.concatenate([
        jnp.pad(bi0_t[0:H] + bh0_t[0:H], (0, Hp - H)),                        # r
        jnp.pad(bi0_t[H:2 * H] + bh0_t[H:2 * H], (0, Hp - H)),                # z
        jnp.pad(bi0_t[2 * H:3 * H], (0, Hp - H)),                             # n (input part only)
    ]).reshape(1, 3 * Hp)
    bh0n = jnp.pad(bh0_t[2 * H:3 * H], (0, Hp - H)).reshape(1, Hp)            # n (hidden part)

    # ---- GRU layer 1, fused:  [h0 | h1_prev] @ W_fused -> [r | z | n_i | n_h] ----
    wi1 = t2(params["wi1"])                                                   # (H, 3H)
    wh1 = t2(params["wh1"])                                                   # (H, 3H)
    bi1 = jnp.asarray(params["bi1"], f32)
    bh1 = jnp.asarray(params["bh1"], f32)
    w1f = jnp.zeros((2 * Hp, 4 * Hp), f32)
    w1f = w1f.at[0:H, 0:H].set(wi1[:, 0:H])                                   # r (input part)
    w1f = w1f.at[0:H, Hp:Hp + H].set(wi1[:, H:2 * H])                         # z (input part)
    w1f = w1f.at[0:H, 2 * Hp:2 * Hp + H].set(wi1[:, 2 * H:3 * H])             # n_i
    w1f = w1f.at[Hp:Hp + H, 0:H].set(wh1[:, 0:H])                             # r (hidden part)
    w1f = w1f.at[Hp:Hp + H, Hp:Hp + H].set(wh1[:, H:2 * H])                   # z (hidden part)
    w1f = w1f.at[Hp:Hp + H, 3 * Hp:3 * Hp + H].set(wh1[:, 2 * H:3 * H])       # n_h
    w1f = w1f.astype(bf16)
    b1f = jnp.zeros((1, 4 * Hp), f32)
    b1f = b1f.at[0, 0:H].set(bi1[0:H] + bh1[0:H])
    b1f = b1f.at[0, Hp:Hp + H].set(bi1[H:2 * H] + bh1[H:2 * H])
    b1f = b1f.at[0, 2 * Hp:2 * Hp + H].set(bi1[2 * H:3 * H])
    b1f = b1f.at[0, 3 * Hp:3 * Hp + H].set(bh1[2 * H:3 * H])

    # ---- attention ----
    aw1 = pad2(t2(params["aw1"]), Hp, Hp).astype(bf16)                        # (Hp, Hp)
    ab1 = jnp.pad(jnp.asarray(params["ab1"], f32), (0, Hp - H)).reshape(1, Hp)
    aw2 = jnp.pad(jnp.asarray(params["aw2"], f32).reshape(-1), (0, Hp - H)).reshape(1, Hp)

    # ---- fc head (output padded to OL lanes; column 0 is the real output) ----
    fw1 = pad2(t2(params["fw1"]), Hp, F).astype(bf16)                         # (Hp, F)
    fb1 = jnp.asarray(params["fb1"], f32).reshape(1, F)
    fw2 = pad2(t2(params["fw2"]), F, OL).astype(bf16)                         # (F, OL)
    fb2 = jnp.zeros((1, OL), f32).at[0, 0].set(jnp.asarray(params["fb2"], f32)[0])

    # ---- input: (B, T, D) -> (T, Bp, D) bf16, zero-padded batch ----
    x3 = jnp.transpose(jnp.asarray(x, f32), (1, 0, 2))
    x3 = jnp.pad(x3, ((0, 0), (0, Bp - B), (0, 0))).astype(bf16)

    weight_args = (wi0, bi0, wh0, bh0n, w1f, b1f, aw1, ab1, aw2, fw1, fb1, fw2, fb2)

    def full2(a):                                  # whole 2-D array as one block, every grid step
        return pl.BlockSpec(a.shape, lambda b: (0, 0))

    grid_spec = pltpu.PrefetchScalarGridSpec(
        num_scalar_prefetch=0,
        grid=(nb,),
        in_specs=[pl.BlockSpec((T, TB, D), lambda b: (0, b, 0))]
                 + [full2(a) for a in weight_args],
        out_specs=pl.BlockSpec((TB, OL), lambda b: (b, 0)),
        scratch_shapes=[pltpu.VMEM((T * TB, 3 * Hp), jnp.float32),   # gi0 (layer-0 projections)
                        pltpu.VMEM((T * TB, Hp), jnp.bfloat16)],     # hs  (top-layer states)
    )

    # ---- explicit VMEM budget (keeps larger TB/T within the v7x 64-MiB envelope) ----
    weight_bytes = sum(int(a.size) * a.dtype.itemsize for a in weight_args)
    vmem_bytes = (2 * T * TB * D * 2               # x block, double-buffered, bf16
                  + 2 * TB * OL * 4                # out block, double-buffered, f32
                  + T * TB * 3 * Hp * 4            # gi0 scratch (f32)
                  + T * TB * Hp * 2                # hs scratch (bf16)
                  + 2 * weight_bytes)              # weights (double-buffered by default)
    vmem_limit = min(64 << 20, max(32 << 20, int(1.5 * vmem_bytes)))

    out = pl.pallas_call(
        gru_attention_kernel,
        out_shape=jax.ShapeDtypeStruct((Bp, OL), jnp.float32),
        grid_spec=grid_spec,
        compiler_params=pltpu.CompilerParams(
            dimension_semantics=("parallel",),     # batch tiles split across v7x megacore
            vmem_limit_bytes=vmem_limit),
    )(x3, *weight_args)

    return out[:B, 0]                              # squeeze(1) -> (B,)


# ---------------------------------------------------------------------------
# Pure-JAX reference (mirrors the PyTorch module in eval mode) for validation.
# ---------------------------------------------------------------------------
def reference_forward(x, p):
    B, T, D = x.shape
    H = p["wh0"].shape[1]

    def cell(x_t, h, wi, wh, bi, bh):
        gi = x_t @ wi.T + bi
        gh = h @ wh.T + bh
        r = jax.nn.sigmoid(gi[:, :H] + gh[:, :H])
        z = jax.nn.sigmoid(gi[:, H:2 * H] + gh[:, H:2 * H])
        n = jnp.tanh(gi[:, 2 * H:] + r * gh[:, 2 * H:])
        return (1.0 - z) * n + z * h

    h0 = jnp.zeros((B, H))
    h1 = jnp.zeros((B, H))
    outs = []
    for t in range(T):
        h0 = cell(x[:, t, :], h0, p["wi0"], p["wh0"], p["bi0"], p["bh0"])
        h1 = cell(h0, h1, p["wi1"], p["wh1"], p["bi1"], p["bh1"])
        outs.append(h1)
    g = jnp.stack(outs, axis=1)                                     # (B, T, H)
    e = jnp.tanh(g @ p["aw1"].T + p["ab1"])
    scores = e @ p["aw2"].T                                         # (B, T, 1)
    w = jax.nn.softmax(scores, axis=1)
    ctx = jnp.sum(g * w, axis=1)                                    # (B, H)
    h = jnp.maximum(ctx @ p["fw1"].T + p["fb1"], 0.0)
    out = h @ p["fw2"].T + p["fb2"]                                 # (B, 1)
    return out[:, 0]


def init_params(key, input_dim, hidden_dim):
    """Deterministic init mimicking PyTorch defaults (uniform +/- 1/sqrt(fan))."""
    H, D = hidden_dim, input_dim
    keys = jax.random.split(key, 16)
    ki = iter(keys)

    def u(k, shape, fan):
        b = 1.0 / (fan ** 0.5)
        return jax.random.uniform(k, shape, jnp.float32, -b, b)

    return {
        # GRU layer 0
        "wi0": u(next(ki), (3 * H, D), H), "wh0": u(next(ki), (3 * H, H), H),
        "bi0": u(next(ki), (3 * H,), H),   "bh0": u(next(ki), (3 * H,), H),
        # GRU layer 1
        "wi1": u(next(ki), (3 * H, H), H), "wh1": u(next(ki), (3 * H, H), H),
        "bi1": u(next(ki), (3 * H,), H),   "bh1": u(next(ki), (3 * H,), H),
        # attention
        "aw1": u(next(ki), (H, H), H), "ab1": u(next(ki), (H,), H),
        "aw2": u(next(ki), (1, H), H),
        # fc head
        "fw1": u(next(ki), (128, H), H), "fb1": u(next(ki), (128,), H),
        "fw2": u(next(ki), (1, 128), 128), "fb2": u(next(ki), (1,), 128),
    }


if __name__ == "__main__":
    batch, seq, input_dim, hidden_dim = 4, 8, 8, 32

    key = jax.random.PRNGKey(0)
    kx, kp = jax.random.split(key)
    x = jax.random.normal(kx, (batch, seq, input_dim), jnp.float32)
    params = init_params(kp, input_dim, hidden_dim)

    out = gru_with_attention(x, params)
    out = jax.block_until_ready(out)

    ref = reference_forward(x, params)
    assert out.shape == (batch,), out.shape
    # bf16 MXU operands (f32 accumulation / gate math) -> slightly looser tolerance than pure f32.
    assert jnp.allclose(out, ref, rtol=2e-2, atol=2e-2), (out, ref)

    print("KERNEL_OK")
</pallas_src>

<mosaic_0001>
module attributes {stable_mosaic.version = 11 : i64} {
  func.func @gru_attention_kernel(%arg0: i32, %arg1: memref<8x8x8xbf16, #tpu.memory_space<vmem>>, %arg2: memref<8x384xbf16, #tpu.memory_space<vmem>>, %arg3: memref<1x384xf32, #tpu.memory_space<vmem>>, %arg4: memref<128x384xbf16, #tpu.memory_space<vmem>>, %arg5: memref<1x128xf32, #tpu.memory_space<vmem>>, %arg6: memref<256x512xbf16, #tpu.memory_space<vmem>>, %arg7: memref<1x512xf32, #tpu.memory_space<vmem>>, %arg8: memref<128x128xbf16, #tpu.memory_space<vmem>>, %arg9: memref<1x128xf32, #tpu.memory_space<vmem>>, %arg10: memref<1x128xf32, #tpu.memory_space<vmem>>, %arg11: memref<128x128xbf16, #tpu.memory_space<vmem>>, %arg12: memref<1x128xf32, #tpu.memory_space<vmem>>, %arg13: memref<128x128xbf16, #tpu.memory_space<vmem>>, %arg14: memref<1x128xf32, #tpu.memory_space<vmem>>, %arg15: memref<8x128xf32, #tpu.memory_space<vmem>>, %arg16: memref<64x384xf32, #tpu.memory_space<vmem>>, %arg17: memref<64x128xbf16, #tpu.memory_space<vmem>>) attributes {dimension_semantics = [#tpu.dimension_semantics<parallel>], iteration_bounds = array<i64: 1>, scalar_prefetch = 0 : i64, scratch_operands = 2 : i64, tpu.core_type = #tpu.core_type<tc>, window_params = [{transform_indices = @transform_0, window_bounds = array<i64: 8, 8, 8>}, {pipeline_mode = #tpu.pipeline_mode<synchronous>, transform_indices = @transform_1, window_bounds = array<i64: 8, 384>}, {pipeline_mode = #tpu.pipeline_mode<synchronous>, transform_indices = @transform_2, window_bounds = array<i64: 1, 384>}, {pipeline_mode = #tpu.pipeline_mode<synchronous>, transform_indices = @transform_3, window_bounds = array<i64: 128, 384>}, {pipeline_mode = #tpu.pipeline_mode<synchronous>, transform_indices = @transform_4, window_bounds = array<i64: 1, 128>}, {pipeline_mode = #tpu.pipeline_mode<synchronous>, transform_indices = @transform_5, window_bounds = array<i64: 256, 512>}, {pipeline_mode = #tpu.pipeline_mode<synchronous>, transform_indices = @transform_6, window_bounds = array<i64: 1, 512>}, {pipeline_mode = #tpu.pipeline_mode<synchronous>, transform_indices = @transform_7, window_bounds = array<i64: 128, 128>}, {pipeline_mode = #tpu.pipeline_mode<synchronous>, transform_indices = @transform_8, window_bounds = array<i64: 1, 128>}, {pipeline_mode = #tpu.pipeline_mode<synchronous>, transform_indices = @transform_9, window_bounds = array<i64: 1, 128>}, {pipeline_mode = #tpu.pipeline_mode<synchronous>, transform_indices = @transform_10, window_bounds = array<i64: 128, 128>}, {pipeline_mode = #tpu.pipeline_mode<synchronous>, transform_indices = @transform_11, window_bounds = array<i64: 1, 128>}, {pipeline_mode = #tpu.pipeline_mode<synchronous>, transform_indices = @transform_12, window_bounds = array<i64: 128, 128>}, {pipeline_mode = #tpu.pipeline_mode<synchronous>, transform_indices = @transform_13, window_bounds = array<i64: 1, 128>}, {transform_indices = @transform_14, window_bounds = array<i64: 8, 128>}]} {
    %c0 = arith.constant 0 : index
    %c0_0 = arith.constant 0 : index
    %0 = vector.load %arg4[%c0, %c0_0] : memref<128x384xbf16, #tpu.memory_space<vmem>>, vector<128x384xbf16>
    %c0_1 = arith.constant 0 : index
    %c0_2 = arith.constant 0 : index
    %1 = vector.load %arg6[%c0_1, %c0_2] : memref<256x512xbf16, #tpu.memory_space<vmem>>, vector<256x512xbf16>
    %c0_3 = arith.constant 0 : index
    %c0_4 = arith.constant 0 : index
    %2 = vector.load %arg5[%c0_3, %c0_4] : memref<1x128xf32, #tpu.memory_space<vmem>>, vector<1x128xf32>
    %3 = vector.shape_cast %2 : vector<1x128xf32> to vector<1x128xf32>
    %4 = vector.broadcast %3 : vector<1x128xf32> to vector<8x128xf32>
    %c0_5 = arith.constant 0 : index
    %c0_6 = arith.constant 0 : index
    %5 = vector.load %arg7[%c0_5, %c0_6] : memref<1x512xf32, #tpu.memory_space<vmem>>, vector<1x512xf32>
    %6 = vector.shape_cast %5 : vector<1x512xf32> to vector<1x512xf32>
    %7 = vector.broadcast %6 : vector<1x512xf32> to vector<8x512xf32>
    %c0_7 = arith.constant 0 : index
    %c0_8 = arith.constant 0 : index
    %c0_9 = arith.constant 0 : index
    %8 = vector.load %arg1[%c0_7, %c0_8, %c0_9] : memref<8x8x8xbf16, #tpu.memory_space<vmem>>, vector<8x8x8xbf16>
    %9 = vector.shape_cast %8 : vector<8x8x8xbf16> to vector<64x8xbf16>
    %c0_10 = arith.constant 0 : index
    %c0_11 = arith.constant 0 : index
    %10 = vector.load %arg2[%c0_10, %c0_11] : memref<8x384xbf16, #tpu.memory_space<vmem>>, vector<8x384xbf16>
    %cst = arith.constant dense<0.000000e+00> : vector<64x384xf32>
    %11 = tpu.matmul %9, %10, %cst {dimension_numbers = #tpu.dot_dimension_numbers<[1], [0], [0], [1], [0, 0, 1, 1], [], []>} : vector<64x8xbf16>, vector<8x384xbf16>, vector<64x384xf32> -> vector<64x384xf32>
    %c0_12 = arith.constant 0 : index
    %c0_13 = arith.constant 0 : index
    %12 = vector.load %arg3[%c0_12, %c0_13] : memref<1x384xf32, #tpu.memory_space<vmem>>, vector<1x384xf32>
    %13 = vector.broadcast %12 : vector<1x384xf32> to vector<64x384xf32>
    %14 = arith.addf %11, %13 : vector<64x384xf32>
    %c0_14 = arith.constant 0 : index
    %c0_15 = arith.constant 0 : index
    %15 = vector.load %arg16[%c0_14, %c0_15] : memref<64x384xf32, #tpu.memory_space<vmem>>, vector<64x384xf32>
    tpu.vector_store %arg16[%c0_14, %c0_15], %14 {strides = array<i32>} : memref<64x384xf32, #tpu.memory_space<vmem>>, vector<64x384xf32>,
    %cst_16 = arith.constant 0.000000e+00 : f32
    %16 = vector.broadcast %cst_16 : f32 to vector<8x128xf32>
    %cst_17 = arith.constant 0.000000e+00 : f32
    %17 = vector.broadcast %cst_17 : f32 to vector<8x128xf32>
    %c0_18 = arith.constant 0 : index
    %c0_19 = arith.constant 0 : index
    %18 = vector.load %arg16[%c0_18, %c0_19] : memref<64x384xf32, #tpu.memory_space<vmem>>, vector<8x384xf32>
    %19 = arith.truncf %16 : vector<8x128xf32> to vector<8x128xbf16>
    %cst_20 = arith.constant dense<0.000000e+00> : vector<8x384xf32>
    %20 = tpu.matmul %19, %0, %cst_20 {dimension_numbers = #tpu.dot_dimension_numbers<[1], [0], [0], [1], [0, 0, 1, 1], [], []>} : vector<8x128xbf16>, vector<128x384xbf16>, vector<8x384xf32> -> vector<8x384xf32>
    %21 = vector.extract_strided_slice %18 {offsets = [0, 0], sizes = [8, 256], strides = [1, 1]} : vector<8x384xf32> to vector<8x256xf32>
    %22 = vector.extract_strided_slice %20 {offsets = [0, 0], sizes = [8, 256], strides = [1, 1]} : vector<8x384xf32> to vector<8x256xf32>
    %23 = arith.addf %21, %22 : vector<8x256xf32>
    %24 = arith.negf %23 : vector<8x256xf32>
    %25 = math.exp %24 : vector<8x256xf32>
    %cst_21 = arith.constant 1.000000e+00 : f32
    %26 = vector.broadcast %cst_21 : f32 to vector<8x256xf32>
    %27 = arith.addf %26, %25 : vector<8x256xf32>
    %28 = arith.divf %26, %27 : vector<8x256xf32>
    %29 = vector.extract_strided_slice %28 {offsets = [0, 0], sizes = [8, 128], strides = [1, 1]} : vector<8x256xf32> to vector<8x128xf32>
    %30 = vector.extract_strided_slice %28 {offsets = [0, 128], sizes = [8, 128], strides = [1, 1]} : vector<8x256xf32> to vector<8x128xf32>
    %31 = vector.extract_strided_slice %18 {offsets = [0, 256], sizes = [8, 128], strides = [1, 1]} : vector<8x384xf32> to vector<8x128xf32>
    %32 = vector.extract_strided_slice %20 {offsets = [0, 256], sizes = [8, 128], strides = [1, 1]} : vector<8x384xf32> to vector<8x128xf32>
    %33 = arith.addf %32, %4 : vector<8x128xf32>
    %34 = arith.mulf %29, %33 : vector<8x128xf32>
    %35 = arith.addf %31, %34 : vector<8x128xf32>
    %36 = math.tanh %35 : vector<8x128xf32>
    %cst_22 = arith.constant 1.000000e+00 : f32
    %37 = vector.broadcast %cst_22 : f32 to vector<8x128xf32>
    %38 = arith.subf %37, %30 : vector<8x128xf32>
    %39 = arith.mulf %38, %36 : vector<8x128xf32>
    %40 = arith.mulf %30, %16 : vector<8x128xf32>
    %41 = arith.addf %39, %40 : vector<8x128xf32>
    %42 = arith.truncf %41 : vector<8x128xf32> to vector<8x128xbf16>
    %43 = arith.truncf %17 : vector<8x128xf32> to vector<8x128xbf16>
    %44 = tpu.concatenate %42, %43 in 1 : vector<8x128xbf16>, vector<8x128xbf16> -> vector<8x256xbf16>
    %cst_23 = arith.constant dense<0.000000e+00> : vector<8x512xf32>
    %45 = tpu.matmul %44, %1, %cst_23 {dimension_numbers = #tpu.dot_dimension_numbers<[1], [0], [0], [1], [0, 0, 1, 1], [], []>} : vector<8x256xbf16>, vector<256x512xbf16>, vector<8x512xf32> -> vector<8x512xf32>
    %46 = arith.addf %45, %7 : vector<8x512xf32>
    %47 = vector.extract_strided_slice %46 {offsets = [0, 0], sizes = [8, 256], strides = [1, 1]} : vector<8x512xf32> to vector<8x256xf32>
    %48 = arith.negf %47 : vector<8x256xf32>
    %49 = math.exp %48 : vector<8x256xf32>
    %cst_24 = arith.constant 1.000000e+00 : f32
    %50 = vector.broadcast %cst_24 : f32 to vector<8x256xf32>
    %51 = arith.addf %50, %49 : vector<8x256xf32>
    %52 = arith.divf %50, %51 : vector<8x256xf32>
    %53 = vector.extract_strided_slice %52 {offsets = [0, 0], sizes = [8, 128], strides = [1, 1]} : vector<8x256xf32> to vector<8x128xf32>
    %54 = vector.extract_strided_slice %52 {offsets = [0, 128], sizes = [8, 128], strides = [1, 1]} : vector<8x256xf32> to vector<8x128xf32>
    %55 = vector.extract_strided_slice %46 {offsets = [0, 256], sizes = [8, 128], strides = [1, 1]} : vector<8x512xf32> to vector<8x128xf32>
    %56 = vector.extract_strided_slice %46 {offsets = [0, 384], sizes = [8, 128], strides = [1, 1]} : vector<8x512xf32> to vector<8x128xf32>
    %57 = arith.mulf %53, %56 : vector<8x128xf32>
    %58 = arith.addf %55, %57 : vector<8x128xf32>
    %59 = math.tanh %58 : vector<8x128xf32>
    %cst_25 = arith.constant 1.000000e+00 : f32
    %60 = vector.broadcast %cst_25 : f32 to vector<8x128xf32>
    %61 = arith.subf %60, %54 : vector<8x128xf32>
    %62 = arith.mulf %61, %59 : vector<8x128xf32>
    %63 = arith.mulf %54, %17 : vector<8x128xf32>
    %64 = arith.addf %62, %63 : vector<8x128xf32>
    %65 = arith.truncf %64 : vector<8x128xf32> to vector<8x128xbf16>
    %c0_26 = arith.constant 0 : index
    %c0_27 = arith.constant 0 : index
    %66 = vector.load %arg17[%c0_26, %c0_27] : memref<64x128xbf16, #tpu.memory_space<vmem>>, vector<8x128xbf16>
    tpu.vector_store %arg17[%c0_26, %c0_27], %65 {strides = array<i32>} : memref<64x128xbf16, #tpu.memory_space<vmem>>, vector<8x128xbf16>,
    %c8 = arith.constant 8 : index
    %c0_28 = arith.constant 0 : index
    %67 = vector.load %arg16[%c8, %c0_28] : memref<64x384xf32, #tpu.memory_space<vmem>>, vector<8x384xf32>
    %68 = arith.truncf %41 : vector<8x128xf32> to vector<8x128xbf16>
    %cst_29 = arith.constant dense<0.000000e+00> : vector<8x384xf32>
    %69 = tpu.matmul %68, %0, %cst_29 {dimension_numbers = #tpu.dot_dimension_numbers<[1], [0], [0], [1], [0, 0, 1, 1], [], []>} : vector<8x128xbf16>, vector<128x384xbf16>, vector<8x384xf32> -> vector<8x384xf32>
    %70 = vector.extract_strided_slice %67 {offsets = [0, 0], sizes = [8, 256], strides = [1, 1]} : vector<8x384xf32> to vector<8x256xf32>
    %71 = vector.extract_strided_slice %69 {offsets = [0, 0], sizes = [8, 256], strides = [1, 1]} : vector<8x384xf32> to vector<8x256xf32>
    %72 = arith.addf %70, %71 : vector<8x256xf32>
    %73 = arith.negf %72 : vector<8x256xf32>
    %74 = math.exp %73 : vector<8x256xf32>
    %cst_30 = arith.constant 1.000000e+00 : f32
    %75 = vector.broadcast %cst_30 : f32 to vector<8x256xf32>
    %76 = arith.addf %75, %74 : vector<8x256xf32>
    %77 = arith.divf %75, %76 : vector<8x256xf32>
    %78 = vector.extract_strided_slice %77 {offsets = [0, 0], sizes = [8, 128], strides = [1, 1]} : vector<8x256xf32> to vector<8x128xf32>
    %79 = vector.extract_strided_slice %77 {offsets = [0, 128], sizes = [8, 128], strides = [1, 1]} : vector<8x256xf32> to vector<8x128xf32>
    %80 = vector.extract_strided_slice %67 {offsets = [0, 256], sizes = [8, 128], strides = [1, 1]} : vector<8x384xf32> to vector<8x128xf32>
    %81 = vector.extract_strided_slice %69 {offsets = [0, 256], sizes = [8, 128], strides = [1, 1]} : vector<8x384xf32> to vector<8x128xf32>
    %82 = arith.addf %81, %4 : vector<8x128xf32>
    %83 = arith.mulf %78, %82 : vector<8x128xf32>
    %84 = arith.addf %80, %83 : vector<8x128xf32>
    %85 = math.tanh %84 : vector<8x128xf32>
    %cst_31 = arith.constant 1.000000e+00 : f32
    %86 = vector.broadcast %cst_31 : f32 to vector<8x128xf32>
    %87 = arith.subf %86, %79 : vector<8x128xf32>
    %88 = arith.mulf %87, %85 : vector<8x128xf32>
    %89 = arith.mulf %79, %41 : vector<8x128xf32>
    %90 = arith.addf %88, %89 : vector<8x128xf32>
    %91 = arith.truncf %90 : vector<8x128xf32> to vector<8x128xbf16>
    %92 = arith.truncf %64 : vector<8x128xf32> to vector<8x128xbf16>
    %93 = tpu.concatenate %91, %92 in 1 : vector<8x128xbf16>, vector<8x128xbf16> -> vector<8x256xbf16>
    %cst_32 = arith.constant dense<0.000000e+00> : vector<8x512xf32>
    %94 = tpu.matmul %93, %1, %cst_32 {dimension_numbers = #tpu.dot_dimension_numbers<[1], [0], [0], [1], [0, 0, 1, 1], [], []>} : vector<8x256xbf16>, vector<256x512xbf16>, vector<8x512xf32> -> vector<8x512xf32>
    %95 = arith.addf %94, %7 : vector<8x512xf32>
    %96 = vector.extract_strided_slice %95 {offsets = [0, 0], sizes = [8, 256], strides = [1, 1]} : vector<8x512xf32> to vector<8x256xf32>
    %97 = arith.negf %96 : vector<8x256xf32>
    %98 = math.exp %97 : vector<8x256xf32>
    %cst_33 = arith.constant 1.000000e+00 : f32
    %99 = vector.broadcast %cst_33 : f32 to vector<8x256xf32>
    %100 = arith.addf %99, %98 : vector<8x256xf32>
    %101 = arith.divf %99, %100 : vector<8x256xf32>
    %102 = vector.extract_strided_slice %101 {offsets = [0, 0], sizes = [8, 128], strides = [1, 1]} : vector<8x256xf32> to vector<8x128xf32>
    %103 = vector.extract_strided_slice %101 {offsets = [0, 128], sizes = [8, 128], strides = [1, 1]} : vector<8x256xf32> to vector<8x128xf32>
    %104 = vector.extract_strided_slice %95 {offsets = [0, 256], sizes = [8, 128], strides = [1, 1]} : vector<8x512xf32> to vector<8x128xf32>
    %105 = vector.extract_strided_slice %95 {offsets = [0, 384], sizes = [8, 128], strides = [1, 1]} : vector<8x512xf32> to vector<8x128xf32>
    %106 = arith.mulf %102, %105 : vector<8x128xf32>
    %107 = arith.addf %104, %106 : vector<8x128xf32>
    %108 = math.tanh %107 : vector<8x128xf32>
    %cst_34 = arith.constant 1.000000e+00 : f32
    %109 = vector.broadcast %cst_34 : f32 to vector<8x128xf32>
    %110 = arith.subf %109, %103 : vector<8x128xf32>
    %111 = arith.mulf %110, %108 : vector<8x128xf32>
    %112 = arith.mulf %103, %64 : vector<8x128xf32>
    %113 = arith.addf %111, %112 : vector<8x128xf32>
    %114 = arith.truncf %113 : vector<8x128xf32> to vector<8x128xbf16>
    %c8_35 = arith.constant 8 : index
    %c0_36 = arith.constant 0 : index
    %115 = vector.load %arg17[%c8_35, %c0_36] : memref<64x128xbf16, #tpu.memory_space<vmem>>, vector<8x128xbf16>
    tpu.vector_store %arg17[%c8_35, %c0_36], %114 {strides = array<i32>} : memref<64x128xbf16, #tpu.memory_space<vmem>>, vector<8x128xbf16>,
    %c16 = arith.constant 16 : index
    %c0_37 = arith.constant 0 : index
    %116 = vector.load %arg16[%c16, %c0_37] : memref<64x384xf32, #tpu.memory_space<vmem>>, vector<8x384xf32>
    %117 = arith.truncf %90 : vector<8x128xf32> to vector<8x128xbf16>
    %cst_38 = arith.constant dense<0.000000e+00> : vector<8x384xf32>
    %118 = tpu.matmul %117, %0, %cst_38 {dimension_numbers = #tpu.dot_dimension_numbers<[1], [0], [0], [1], [0, 0, 1, 1], [], []>} : vector<8x128xbf16>, vector<128x384xbf16>, vector<8x384xf32> -> vector<8x384xf32>
    %119 = vector.extract_strided_slice %116 {offsets = [0, 0], sizes = [8, 256], strides = [1, 1]} : vector<8x384xf32> to vector<8x256xf32>
    %120 = vector.extract_strided_slice %118 {offsets = [0, 0], sizes = [8, 256], strides = [1, 1]} : vector<8x384xf32> to vector<8x256xf32>
    %121 = arith.addf %119, %120 : vector<8x256xf32>
    %122 = arith.negf %121 : vector<8x256xf32>
    %123 = math.exp %122 : vector<8x256xf32>
    %cst_39 = arith.constant 1.000000e+00 : f32
    %124 = vector.broadcast %cst_39 : f32 to vector<8x256xf32>
    %125 = arith.addf %124, %123 : vector<8x256xf32>
    %126 = arith.divf %124, %125 : vector<8x256xf32>
    %127 = vector.extract_strided_slice %126 {offsets = [0, 0], sizes = [8, 128], strides = [1, 1]} : vector<8x256xf32> to vector<8x128xf32>
    %128 = vector.extract_strided_slice %126 {offsets = [0, 128], sizes = [8, 128], strides = [1, 1]} : vector<8x256xf32> to vector<8x128xf32>
    %129 = vector.extract_strided_slice %116 {offsets = [0, 256], sizes = [8, 128], strides = [1, 1]} : vector<8x384xf32> to vector<8x128xf32>
    %130 = vector.extract_strided_slice %118 {offsets = [0, 256], sizes = [8, 128], strides = [1, 1]} : vector<8x384xf32> to vector<8x128xf32>
    %131 = arith.addf %130, %4 : vector<8x128xf32>
    %132 = arith.mulf %127, %131 : vector<8x128xf32>
    %133 = arith.addf %129, %132 : vector<8x128xf32>
    %134 = math.tanh %133 : vector<8x128xf32>
    %cst_40 = arith.constant 1.000000e+00 : f32
    %135 = vector.broadcast %cst_40 : f32 to vector<8x128xf32>
    %136 = arith.subf %135, %128 : vector<8x128xf32>
    %137 = arith.mulf %136, %134 : vector<8x128xf32>
    %138 = arith.mulf %128, %90 : vector<8x128xf32>
    %139 = arith.addf %137, %138 : vector<8x128xf32>
    %140 = arith.truncf %139 : vector<8x128xf32> to vector<8x128xbf16>
    %141 = arith.truncf %113 : vector<8x128xf32> to vector<8x128xbf16>
    %142 = tpu.concatenate %140, %141 in 1 : vector<8x128xbf16>, vector<8x128xbf16> -> vector<8x256xbf16>
    %cst_41 = arith.constant dense<0.000000e+00> : vector<8x512xf32>
    %143 = tpu.matmul %142, %1, %cst_41 {dimension_numbers = #tpu.dot_dimension_numbers<[1], [0], [0], [1], [0, 0, 1, 1], [], []>} : vector<8x256xbf16>, vector<256x512xbf16>, vector<8x512xf32> -> vector<8x512xf32>
    %144 = arith.addf %143, %7 : vector<8x512xf32>
    %145 = vector.extract_strided_slice %144 {offsets = [0, 0], sizes = [8, 256], strides = [1, 1]} : vector<8x512xf32> to vector<8x256xf32>
    %146 = arith.negf %145 : vector<8x256xf32>
    %147 = math.exp %146 : vector<8x256xf32>
    %cst_42 = arith.constant 1.000000e+00 : f32
    %148 = vector.broadcast %cst_42 : f32 to vector<8x256xf32>
    %149 = arith.addf %148, %147 : vector<8x256xf32>
    %150 = arith.divf %148, %149 : vector<8x256xf32>
    %151 = vector.extract_strided_slice %150 {offsets = [0, 0], sizes = [8, 128], strides = [1, 1]} : vector<8x256xf32> to vector<8x128xf32>
    %152 = vector.extract_strided_slice %150 {offsets = [0, 128], sizes = [8, 128], strides = [1, 1]} : vector<8x256xf32> to vector<8x128xf32>
    %153 = vector.extract_strided_slice %144 {offsets = [0, 256], sizes = [8, 128], strides = [1, 1]} : vector<8x512xf32> to vector<8x128xf32>
    %154 = vector.extract_strided_slice %144 {offsets = [0, 384], sizes = [8, 128], strides = [1, 1]} : vector<8x512xf32> to vector<8x128xf32>
    %155 = arith.mulf %151, %154 : vector<8x128xf32>
    %156 = arith.addf %153, %155 : vector<8x128xf32>
    %157 = math.tanh %156 : vector<8x128xf32>
    %cst_43 = arith.constant 1.000000e+00 : f32
    %158 = vector.broadcast %cst_43 : f32 to vector<8x128xf32>
    %159 = arith.subf %158, %152 : vector<8x128xf32>
    %160 = arith.mulf %159, %157 : vector<8x128xf32>
    %161 = arith.mulf %152, %113 : vector<8x128xf32>
    %162 = arith.addf %160, %161 : vector<8x128xf32>
    %163 = arith.truncf %162 : vector<8x128xf32> to vector<8x128xbf16>
    %c16_44 = arith.constant 16 : index
    %c0_45 = arith.constant 0 : index
    %164 = vector.load %arg17[%c16_44, %c0_45] : memref<64x128xbf16, #tpu.memory_space<vmem>>, vector<8x128xbf16>
    tpu.vector_store %arg17[%c16_44, %c0_45], %163 {strides = array<i32>} : memref<64x128xbf16, #tpu.memory_space<vmem>>, vector<8x128xbf16>,
    %c24 = arith.constant 24 : index
    %c0_46 = arith.constant 0 : index
    %165 = vector.load %arg16[%c24, %c0_46] : memref<64x384xf32, #tpu.memory_space<vmem>>, vector<8x384xf32>
    %166 = arith.truncf %139 : vector<8x128xf32> to vector<8x128xbf16>
    %cst_47 = arith.constant dense<0.000000e+00> : vector<8x384xf32>
    %167 = tpu.matmul %166, %0, %cst_47 {dimension_numbers = #tpu.dot_dimension_numbers<[1], [0], [0], [1], [0, 0, 1, 1], [], []>} : vector<8x128xbf16>, vector<128x384xbf16>, vector<8x384xf32> -> vector<8x384xf32>
    %168 = vector.extract_strided_slice %165 {offsets = [0, 0], sizes = [8, 256], strides = [1, 1]} : vector<8x384xf32> to vector<8x256xf32>
    %169 = vector.extract_strided_slice %167 {offsets = [0, 0], sizes = [8, 256], strides = [1, 1]} : vector<8x384xf32> to vector<8x256xf32>
    %170 = arith.addf %168, %169 : vector<8x256xf32>
    %171 = arith.negf %170 : vector<8x256xf32>
    %172 = math.exp %171 : vector<8x256xf32>
    %cst_48 = arith.constant 1.000000e+00 : f32
    %173 = vector.broadcast %cst_48 : f32 to vector<8x256xf32>
    %174 = arith.addf %173, %172 : vector<8x256xf32>
    %175 = arith.divf %173, %174 : vector<8x256xf32>
    %176 = vector.extract_strided_slice %175 {offsets = [0, 0], sizes = [8, 128], strides = [1, 1]} : vector<8x256xf32> to vector<8x128xf32>
    %177 = vector.extract_strided_slice %175 {offsets = [0, 128], sizes = [8, 128], strides = [1, 1]} : vector<8x256xf32> to vector<8x128xf32>
    %178 = vector.extract_strided_slice %165 {offsets = [0, 256], sizes = [8, 128], strides = [1, 1]} : vector<8x384xf32> to vector<8x128xf32>
    %179 = vector.extract_strided_slice %167 {offsets = [0, 256], sizes = [8, 128], strides = [1, 1]} : vector<8x384xf32> to vector<8x128xf32>
    %180 = arith.addf %179, %4 : vector<8x128xf32>
    %181 = arith.mulf %176, %180 : vector<8x128xf32>
    %182 = arith.addf %178, %181 : vector<8x128xf32>
    %183 = math.tanh %182 : vector<8x128xf32>
    %cst_49 = arith.constant 1.000000e+00 : f32
    %184 = vector.broadcast %cst_49 : f32 to vector<8x128xf32>
    %185 = arith.subf %184, %177 : vector<8x128xf32>
    %186 = arith.mulf %185, %183 : vector<8x128xf32>
    %187 = arith.mulf %177, %139 : vector<8x128xf32>
    %188 = arith.addf %186, %187 : vector<8x128xf32>
    %189 = arith.truncf %188 : vector<8x128xf32> to vector<8x128xbf16>
    %190 = arith.truncf %162 : vector<8x128xf32> to vector<8x128xbf16>
    %191 = tpu.concatenate %189, %190 in 1 : vector<8x128xbf16>, vector<8x128xbf16> -> vector<8x256xbf16>
    %cst_50 = arith.constant dense<0.000000e+00> : vector<8x512xf32>
    %192 = tpu.matmul %191, %1, %cst_50 {dimension_numbers = #tpu.dot_dimension_numbers<[1], [0], [0], [1], [0, 0, 1, 1], [], []>} : vector<8x256xbf16>, vector<256x512xbf16>, vector<8x512xf32> -> vector<8x512xf32>
    %193 = arith.addf %192, %7 : vector<8x512xf32>
    %194 = vector.extract_strided_slice %193 {offsets = [0, 0], sizes = [8, 256], strides = [1, 1]} : vector<8x512xf32> to vector<8x256xf32>
    %195 = arith.negf %194 : vector<8x256xf32>
    %196 = math.exp %195 : vector<8x256xf32>
    %cst_51 = arith.constant 1.000000e+00 : f32
    %197 = vector.broadcast %cst_51 : f32 to vector<8x256xf32>
    %198 = arith.addf %197, %196 : vector<8x256xf32>
    %199 = arith.divf %197, %198 : vector<8x256xf32>
    %200 = vector.extract_strided_slice %199 {offsets = [0, 0], sizes = [8, 128], strides = [1, 1]} : vector<8x256xf32> to vector<8x128xf32>
    %201 = vector.extract_strided_slice %199 {offsets = [0, 128], sizes = [8, 128], strides = [1, 1]} : vector<8x256xf32> to vector<8x128xf32>
    %202 = vector.extract_strided_slice %193 {offsets = [0, 256], sizes = [8, 128], strides = [1, 1]} : vector<8x512xf32> to vector<8x128xf32>
    %203 = vector.extract_strided_slice %193 {offsets = [0, 384], sizes = [8, 128], strides = [1, 1]} : vector<8x512xf32> to vector<8x128xf32>
    %204 = arith.mulf %200, %203 : vector<8x128xf32>
    %205 = arith.addf %202, %204 : vector<8x128xf32>
    %206 = math.tanh %205 : vector<8x128xf32>
    %cst_52 = arith.constant 1.000000e+00 : f32
    %207 = vector.broadcast %cst_52 : f32 to vector<8x128xf32>
    %208 = arith.subf %207, %201 : vector<8x128xf32>
    %209 = arith.mulf %208, %206 : vector<8x128xf32>
    %210 = arith.mulf %201, %162 : vector<8x128xf32>
    %211 = arith.addf %209, %210 : vector<8x128xf32>
    %212 = arith.truncf %211 : vector<8x128xf32> to vector<8x128xbf16>
    %c24_53 = arith.constant 24 : index
    %c0_54 = arith.constant 0 : index
    %213 = vector.load %arg17[%c24_53, %c0_54] : memref<64x128xbf16, #tpu.memory_space<vmem>>, vector<8x128xbf16>
    tpu.vector_store %arg17[%c24_53, %c0_54], %212 {strides = array<i32>} : memref<64x128xbf16, #tpu.memory_space<vmem>>, vector<8x128xbf16>,
    %c32 = arith.constant 32 : index
    %c0_55 = arith.constant 0 : index
    %214 = vector.load %arg16[%c32, %c0_55] : memref<64x384xf32, #tpu.memory_space<vmem>>, vector<8x384xf32>
    %215 = arith.truncf %188 : vector<8x128xf32> to vector<8x128xbf16>
    %cst_56 = arith.constant dense<0.000000e+00> : vector<8x384xf32>
    %216 = tpu.matmul %215, %0, %cst_56 {dimension_numbers = #tpu.dot_dimension_numbers<[1], [0], [0], [1], [0, 0, 1, 1], [], []>} : vector<8x128xbf16>, vector<128x384xbf16>, vector<8x384xf32> -> vector<8x384xf32>
    %217 = vector.extract_strided_slice %214 {offsets = [0, 0], sizes = [8, 256], strides = [1, 1]} : vector<8x384xf32> to vector<8x256xf32>
    %218 = vector.extract_strided_slice %216 {offsets = [0, 0], sizes = [8, 256], strides = [1, 1]} : vector<8x384xf32> to vector<8x256xf32>
    %219 = arith.addf %217, %218 : vector<8x256xf32>
    %220 = arith.negf %219 : vector<8x256xf32>
    %221 = math.exp %220 : vector<8x256xf32>
    %cst_57 = arith.constant 1.000000e+00 : f32
    %222 = vector.broadcast %cst_57 : f32 to vector<8x256xf32>
    %223 = arith.addf %222, %221 : vector<8x256xf32>
    %224 = arith.divf %222, %223 : vector<8x256xf32>
    %225 = vector.extract_strided_slice %224 {offsets = [0, 0], sizes = [8, 128], strides = [1, 1]} : vector<8x256xf32> to vector<8x128xf32>
    %226 = vector.extract_strided_slice %224 {offsets = [0, 128], sizes = [8, 128], strides = [1, 1]} : vector<8x256xf32> to vector<8x128xf32>
    %227 = vector.extract_strided_slice %214 {offsets = [0, 256], sizes = [8, 128], strides = [1, 1]} : vector<8x384xf32> to vector<8x128xf32>
    %228 = vector.extract_strided_slice %216 {offsets = [0, 256], sizes = [8, 128], strides = [1, 1]} : vector<8x384xf32> to vector<8x128xf32>
    %229 = arith.addf %228, %4 : vector<8x128xf32>
    %230 = arith.mulf %225, %229 : vector<8x128xf32>
    %231 = arith.addf %227, %230 : vector<8x128xf32>
    %232 = math.tanh %231 : vector<8x128xf32>
    %cst_58 = arith.constant 1.000000e+00 : f32
    %233 = vector.broadcast %cst_58 : f32 to vector<8x128xf32>
    %234 = arith.subf %233, %226 : vector<8x128xf32>
    %235 = arith.mulf %234, %232 : vector<8x128xf32>
    %236 = arith.mulf %226, %188 : vector<8x128xf32>
    %237 = arith.addf %235, %236 : vector<8x128xf32>
    %238 = arith.truncf %237 : vector<8x128xf32> to vector<8x128xbf16>
    %239 = arith.truncf %211 : vector<8x128xf32> to vector<8x128xbf16>
    %240 = tpu.concatenate %238, %239 in 1 : vector<8x128xbf16>, vector<8x128xbf16> -> vector<8x256xbf16>
    %cst_59 = arith.constant dense<0.000000e+00> : vector<8x512xf32>
    %241 = tpu.matmul %240, %1, %cst_59 {dimension_numbers = #tpu.dot_dimension_numbers<[1], [0], [0], [1], [0, 0, 1, 1], [], []>} : vector<8x256xbf16>, vector<256x512xbf16>, vector<8x512xf32> -> vector<8x512xf32>
    %242 = arith.addf %241, %7 : vector<8x512xf32>
    %243 = vector.extract_strided_slice %242 {offsets = [0, 0], sizes = [8, 256], strides = [1, 1]} : vector<8x512xf32> to vector<8x256xf32>
    %244 = arith.negf %243 : vector<8x256xf32>
    %245 = math.exp %244 : vector<8x256xf32>
    %cst_60 = arith.constant 1.000000e+00 : f32
    %246 = vector.broadcast %cst_60 : f32 to vector<8x256xf32>
    %247 = arith.addf %246, %245 : vector<8x256xf32>
    %248 = arith.divf %246, %247 : vector<8x256xf32>
    %249 = vector.extract_strided_slice %248 {offsets = [0, 0], sizes = [8, 128], strides = [1, 1]} : vector<8x256xf32> to vector<8x128xf32>
    %250 = vector.extract_strided_slice %248 {offsets = [0, 128], sizes = [8, 128], strides = [1, 1]} : vector<8x256xf32> to vector<8x128xf32>
    %251 = vector.extract_strided_slice %242 {offsets = [0, 256], sizes = [8, 128], strides = [1, 1]} : vector<8x512xf32> to vector<8x128xf32>
    %252 = vector.extract_strided_slice %242 {offsets = [0, 384], sizes = [8, 128], strides = [1, 1]} : vector<8x512xf32> to vector<8x128xf32>
    %253 = arith.mulf %249, %252 : vector<8x128xf32>
    %254 = arith.addf %251, %253 : vector<8x128xf32>
    %255 = math.tanh %254 : vector<8x128xf32>
    %cst_61 = arith.constant 1.000000e+00 : f32
    %256 = vector.broadcast %cst_61 : f32 to vector<8x128xf32>
    %257 = arith.subf %256, %250 : vector<8x128xf32>
    %258 = arith.mulf %257, %255 : vector<8x128xf32>
    %259 = arith.mulf %250, %211 : vector<8x128xf32>
    %260 = arith.addf %258, %259 : vector<8x128xf32>
    %261 = arith.truncf %260 : vector<8x128xf32> to vector<8x128xbf16>
    %c32_62 = arith.constant 32 : index
    %c0_63 = arith.constant 0 : index
    %262 = vector.load %arg17[%c32_62, %c0_63] : memref<64x128xbf16, #tpu.memory_space<vmem>>, vector<8x128xbf16>
    tpu.vector_store %arg17[%c32_62, %c0_63], %261 {strides = array<i32>} : memref<64x128xbf16, #tpu.memory_space<vmem>>, vector<8x128xbf16>,
    %c40 = arith.constant 40 : index
    %c0_64 = arith.constant 0 : index
    %263 = vector.load %arg16[%c40, %c0_64] : memref<64x384xf32, #tpu.memory_space<vmem>>, vector<8x384xf32>
    %264 = arith.truncf %237 : vector<8x128xf32> to vector<8x128xbf16>
    %cst_65 = arith.constant dense<0.000000e+00> : vector<8x384xf32>
    %265 = tpu.matmul %264, %0, %cst_65 {dimension_numbers = #tpu.dot_dimension_numbers<[1], [0], [0], [1], [0, 0, 1, 1], [], []>} : vector<8x128xbf16>, vector<128x384xbf16>, vector<8x384xf32> -> vector<8x384xf32>
    %266 = vector.extract_strided_slice %263 {offsets = [0, 0], sizes = [8, 256], strides = [1, 1]} : vector<8x384xf32> to vector<8x256xf32>
    %267 = vector.extract_strided_slice %265 {offsets = [0, 0], sizes = [8, 256], strides = [1, 1]} : vector<8x384xf32> to vector<8x256xf32>
    %268 = arith.addf %266, %267 : vector<8x256xf32>
    %269 = arith.negf %268 : vector<8x256xf32>
    %270 = math.exp %269 : vector<8x256xf32>
    %cst_66 = arith.constant 1.000000e+00 : f32
    %271 = vector.broadcast %cst_66 : f32 to vector<8x256xf32>
    %272 = arith.addf %271, %270 : vector<8x256xf32>
    %273 = arith.divf %271, %272 : vector<8x256xf32>
    %274 = vector.extract_strided_slice %273 {offsets = [0, 0], sizes = [8, 128], strides = [1, 1]} : vector<8x256xf32> to vector<8x128xf32>
    %275 = vector.extract_strided_slice %273 {offsets = [0, 128], sizes = [8, 128], strides = [1, 1]} : vector<8x256xf32> to vector<8x128xf32>
    %276 = vector.extract_strided_slice %263 {offsets = [0, 256], sizes = [8, 128], strides = [1, 1]} : vector<8x384xf32> to vector<8x128xf32>
    %277 = vector.extract_strided_slice %265 {offsets = [0, 256], sizes = [8, 128], strides = [1, 1]} : vector<8x384xf32> to vector<8x128xf32>
    %278 = arith.addf %277, %4 : vector<8x128xf32>
    %279 = arith.mulf %274, %278 : vector<8x128xf32>
    %280 = arith.addf %276, %279 : vector<8x128xf32>
    %281 = math.tanh %280 : vector<8x128xf32>
    %cst_67 = arith.constant 1.000000e+00 : f32
    %282 = vector.broadcast %cst_67 : f32 to vector<8x128xf32>
    %283 = arith.subf %282, %275 : vector<8x128xf32>
    %284 = arith.mulf %283, %281 : vector<8x128xf32>
    %285 = arith.mulf %275, %237 : vector<8x128xf32>
    %286 = arith.addf %284, %285 : vector<8x128xf32>
    %287 = arith.truncf %286 : vector<8x128xf32> to vector<8x128xbf16>
    %288 = arith.truncf %260 : vector<8x128xf32> to vector<8x128xbf16>
    %289 = tpu.concatenate %287, %288 in 1 : vector<8x128xbf16>, vector<8x128xbf16> -> vector<8x256xbf16>
    %cst_68 = arith.constant dense<0.000000e+00> : vector<8x512xf32>
    %290 = tpu.matmul %289, %1, %cst_68 {dimension_numbers = #tpu.dot_dimension_numbers<[1], [0], [0], [1], [0, 0, 1, 1], [], []>} : vector<8x256xbf16>, vector<256x512xbf16>, vector<8x512xf32> -> vector<8x512xf32>
    %291 = arith.addf %290, %7 : vector<8x512xf32>
    %292 = vector.extract_strided_slice %291 {offsets = [0, 0], sizes = [8, 256], strides = [1, 1]} : vector<8x512xf32> to vector<8x256xf32>
    %293 = arith.negf %292 : vector<8x256xf32>
    %294 = math.exp %293 : vector<8x256xf32>
    %cst_69 = arith.constant 1.000000e+00 : f32
    %295 = vector.broadcast %cst_69 : f32 to vector<8x256xf32>
    %296 = arith.addf %295, %294 : vector<8x256xf32>
    %297 = arith.divf %295, %296 : vector<8x256xf32>
    %298 = vector.extract_strided_slice %297 {offsets = [0, 0], sizes = [8, 128], strides = [1, 1]} : vector<8x256xf32> to vector<8x128xf32>
    %299 = vector.extract_strided_slice %297 {offsets = [0, 128], sizes = [8, 128], strides = [1, 1]} : vector<8x256xf32> to vector<8x128xf32>
    %300 = vector.extract_strided_slice %291 {offsets = [0, 256], sizes = [8, 128], strides = [1, 1]} : vector<8x512xf32> to vector<8x128xf32>
    %301 = vector.extract_strided_slice %291 {offsets = [0, 384], sizes = [8, 128], strides = [1, 1]} : vector<8x512xf32> to vector<8x128xf32>
    %302 = arith.mulf %298, %301 : vector<8x128xf32>
    %303 = arith.addf %300, %302 : vector<8x128xf32>
    %304 = math.tanh %303 : vector<8x128xf32>
    %cst_70 = arith.constant 1.000000e+00 : f32
    %305 = vector.broadcast %cst_70 : f32 to vector<8x128xf32>
    %306 = arith.subf %305, %299 : vector<8x128xf32>
    %307 = arith.mulf %306, %304 : vector<8x128xf32>
    %308 = arith.mulf %299, %260 : vector<8x128xf32>
    %309 = arith.addf %307, %308 : vector<8x128xf32>
    %310 = arith.truncf %309 : vector<8x128xf32> to vector<8x128xbf16>
    %c40_71 = arith.constant 40 : index
    %c0_72 = arith.constant 0 : index
    %311 = vector.load %arg17[%c40_71, %c0_72] : memref<64x128xbf16, #tpu.memory_space<vmem>>, vector<8x128xbf16>
    tpu.vector_store %arg17[%c40_71, %c0_72], %310 {strides = array<i32>} : memref<64x128xbf16, #tpu.memory_space<vmem>>, vector<8x128xbf16>,
    %c48 = arith.constant 48 : index
    %c0_73 = arith.constant 0 : index
    %312 = vector.load %arg16[%c48, %c0_73] : memref<64x384xf32, #tpu.memory_space<vmem>>, vector<8x384xf32>
    %313 = arith.truncf %286 : vector<8x128xf32> to vector<8x128xbf16>
    %cst_74 = arith.constant dense<0.000000e+00> : vector<8x384xf32>
    %314 = tpu.matmul %313, %0, %cst_74 {dimension_numbers = #tpu.dot_dimension_numbers<[1], [0], [0], [1], [0, 0, 1, 1], [], []>} : vector<8x128xbf16>, vector<128x384xbf16>, vector<8x384xf32> -> vector<8x384xf32>
    %315 = vector.extract_strided_slice %312 {offsets = [0, 0], sizes = [8, 256], strides = [1, 1]} : vector<8x384xf32> to vector<8x256xf32>
    %316 = vector.extract_strided_slice %314 {offsets = [0, 0], sizes = [8, 256], strides = [1, 1]} : vector<8x384xf32> to vector<8x256xf32>
    %317 = arith.addf %315, %316 : vector<8x256xf32>
    %318 = arith.negf %317 : vector<8x256xf32>
    %319 = math.exp %318 : vector<8x256xf32>
    %cst_75 = arith.constant 1.000000e+00 : f32
    %320 = vector.broadcast %cst_75 : f32 to vector<8x256xf32>
    %321 = arith.addf %320, %319 : vector<8x256xf32>
    %322 = arith.divf %320, %321 : vector<8x256xf32>
    %323 = vector.extract_strided_slice %322 {offsets = [0, 0], sizes = [8, 128], strides = [1, 1]} : vector<8x256xf32> to vector<8x128xf32>
    %324 = vector.extract_strided_slice %322 {offsets = [0, 128], sizes = [8, 128], strides = [1, 1]} : vector<8x256xf32> to vector<8x128xf32>
    %325 = vector.extract_strided_slice %312 {offsets = [0, 256], sizes = [8, 128], strides = [1, 1]} : vector<8x384xf32> to vector<8x128xf32>
    %326 = vector.extract_strided_slice %314 {offsets = [0, 256], sizes = [8, 128], strides = [1, 1]} : vector<8x384xf32> to vector<8x128xf32>
    %327 = arith.addf %326, %4 : vector<8x128xf32>
    %328 = arith.mulf %323, %327 : vector<8x128xf32>
    %329 = arith.addf %325, %328 : vector<8x128xf32>
    %330 = math.tanh %329 : vector<8x128xf32>
    %cst_76 = arith.constant 1.000000e+00 : f32
    %331 = vector.broadcast %cst_76 : f32 to vector<8x128xf32>
    %332 = arith.subf %331, %324 : vector<8x128xf32>
    %333 = arith.mulf %332, %330 : vector<8x128xf32>
    %334 = arith.mulf %324, %286 : vector<8x128xf32>
    %335 = arith.addf %333, %334 : vector<8x128xf32>
    %336 = arith.truncf %335 : vector<8x128xf32> to vector<8x128xbf16>
    %337 = arith.truncf %309 : vector<8x128xf32> to vector<8x128xbf16>
    %338 = tpu.concatenate %336, %337 in 1 : vector<8x128xbf16>, vector<8x128xbf16> -> vector<8x256xbf16>
    %cst_77 = arith.constant dense<0.000000e+00> : vector<8x512xf32>
    %339 = tpu.matmul %338, %1, %cst_77 {dimension_numbers = #tpu.dot_dimension_numbers<[1], [0], [0], [1], [0, 0, 1, 1], [], []>} : vector<8x256xbf16>, vector<256x512xbf16>, vector<8x512xf32> -> vector<8x512xf32>
    %340 = arith.addf %339, %7 : vector<8x512xf32>
    %341 = vector.extract_strided_slice %340 {offsets = [0, 0], sizes = [8, 256], strides = [1, 1]} : vector<8x512xf32> to vector<8x256xf32>
    %342 = arith.negf %341 : vector<8x256xf32>
    %343 = math.exp %342 : vector<8x256xf32>
    %cst_78 = arith.constant 1.000000e+00 : f32
    %344 = vector.broadcast %cst_78 : f32 to vector<8x256xf32>
    %345 = arith.addf %344, %343 : vector<8x256xf32>
    %346 = arith.divf %344, %345 : vector<8x256xf32>
    %347 = vector.extract_strided_slice %346 {offsets = [0, 0], sizes = [8, 128], strides = [1, 1]} : vector<8x256xf32> to vector<8x128xf32>
    %348 = vector.extract_strided_slice %346 {offsets = [0, 128], sizes = [8, 128], strides = [1, 1]} : vector<8x256xf32> to vector<8x128xf32>
    %349 = vector.extract_strided_slice %340 {offsets = [0, 256], sizes = [8, 128], strides = [1, 1]} : vector<8x512xf32> to vector<8x128xf32>
    %350 = vector.extract_strided_slice %340 {offsets = [0, 384], sizes = [8, 128], strides = [1, 1]} : vector<8x512xf32> to vector<8x128xf32>
    %351 = arith.mulf %347, %350 : vector<8x128xf32>
    %352 = arith.addf %349, %351 : vector<8x128xf32>
    %353 = math.tanh %352 : vector<8x128xf32>
    %cst_79 = arith.constant 1.000000e+00 : f32
    %354 = vector.broadcast %cst_79 : f32 to vector<8x128xf32>
    %355 = arith.subf %354, %348 : vector<8x128xf32>
    %356 = arith.mulf %355, %353 : vector<8x128xf32>
    %357 = arith.mulf %348, %309 : vector<8x128xf32>
    %358 = arith.addf %356, %357 : vector<8x128xf32>
    %359 = arith.truncf %358 : vector<8x128xf32> to vector<8x128xbf16>
    %c48_80 = arith.constant 48 : index
    %c0_81 = arith.constant 0 : index
    %360 = vector.load %arg17[%c48_80, %c0_81] : memref<64x128xbf16, #tpu.memory_space<vmem>>, vector<8x128xbf16>
    tpu.vector_store %arg17[%c48_80, %c0_81], %359 {strides = array<i32>} : memref<64x128xbf16, #tpu.memory_space<vmem>>, vector<8x128xbf16>,
    %c56 = arith.constant 56 : index
    %c0_82 = arith.constant 0 : index
    %361 = vector.load %arg16[%c56, %c0_82] : memref<64x384xf32, #tpu.memory_space<vmem>>, vector<8x384xf32>
    %362 = arith.truncf %335 : vector<8x128xf32> to vector<8x128xbf16>
    %cst_83 = arith.constant dense<0.000000e+00> : vector<8x384xf32>
    %363 = tpu.matmul %362, %0, %cst_83 {dimension_numbers = #tpu.dot_dimension_numbers<[1], [0], [0], [1], [0, 0, 1, 1], [], []>} : vector<8x128xbf16>, vector<128x384xbf16>, vector<8x384xf32> -> vector<8x384xf32>
    %364 = vector.extract_strided_slice %361 {offsets = [0, 0], sizes = [8, 256], strides = [1, 1]} : vector<8x384xf32> to vector<8x256xf32>
    %365 = vector.extract_strided_slice %363 {offsets = [0, 0], sizes = [8, 256], strides = [1, 1]} : vector<8x384xf32> to vector<8x256xf32>
    %366 = arith.addf %364, %365 : vector<8x256xf32>
    %367 = arith.negf %366 : vector<8x256xf32>
    %368 = math.exp %367 : vector<8x256xf32>
    %cst_84 = arith.constant 1.000000e+00 : f32
    %369 = vector.broadcast %cst_84 : f32 to vector<8x256xf32>
    %370 = arith.addf %369, %368 : vector<8x256xf32>
    %371 = arith.divf %369, %370 : vector<8x256xf32>
    %372 = vector.extract_strided_slice %371 {offsets = [0, 0], sizes = [8, 128], strides = [1, 1]} : vector<8x256xf32> to vector<8x128xf32>
    %373 = vector.extract_strided_slice %371 {offsets = [0, 128], sizes = [8, 128], strides = [1, 1]} : vector<8x256xf32> to vector<8x128xf32>
    %374 = vector.extract_strided_slice %361 {offsets = [0, 256], sizes = [8, 128], strides = [1, 1]} : vector<8x384xf32> to vector<8x128xf32>
    %375 = vector.extract_strided_slice %363 {offsets = [0, 256], sizes = [8, 128], strides = [1, 1]} : vector<8x384xf32> to vector<8x128xf32>
    %376 = arith.addf %375, %4 : vector<8x128xf32>
    %377 = arith.mulf %372, %376 : vector<8x128xf32>
    %378 = arith.addf %374, %377 : vector<8x128xf32>
    %379 = math.tanh %378 : vector<8x128xf32>
    %cst_85 = arith.constant 1.000000e+00 : f32
    %380 = vector.broadcast %cst_85 : f32 to vector<8x128xf32>
    %381 = arith.subf %380, %373 : vector<8x128xf32>
    %382 = arith.mulf %381, %379 : vector<8x128xf32>
    %383 = arith.mulf %373, %335 : vector<8x128xf32>
    %384 = arith.addf %382, %383 : vector<8x128xf32>
    %385 = arith.truncf %384 : vector<8x128xf32> to vector<8x128xbf16>
    %386 = arith.truncf %358 : vector<8x128xf32> to vector<8x128xbf16>
    %387 = tpu.concatenate %385, %386 in 1 : vector<8x128xbf16>, vector<8x128xbf16> -> vector<8x256xbf16>
    %cst_86 = arith.constant dense<0.000000e+00> : vector<8x512xf32>
    %388 = tpu.matmul %387, %1, %cst_86 {dimension_numbers = #tpu.dot_dimension_numbers<[1], [0], [0], [1], [0, 0, 1, 1], [], []>} : vector<8x256xbf16>, vector<256x512xbf16>, vector<8x512xf32> -> vector<8x512xf32>
    %389 = arith.addf %388, %7 : vector<8x512xf32>
    %390 = vector.extract_strided_slice %389 {offsets = [0, 0], sizes = [8, 256], strides = [1, 1]} : vector<8x512xf32> to vector<8x256xf32>
    %391 = arith.negf %390 : vector<8x256xf32>
    %392 = math.exp %391 : vector<8x256xf32>
    %cst_87 = arith.constant 1.000000e+00 : f32
    %393 = vector.broadcast %cst_87 : f32 to vector<8x256xf32>
    %394 = arith.addf %393, %392 : vector<8x256xf32>
    %395 = arith.divf %393, %394 : vector<8x256xf32>
    %396 = vector.extract_strided_slice %395 {offsets = [0, 0], sizes = [8, 128], strides = [1, 1]} : vector<8x256xf32> to vector<8x128xf32>
    %397 = vector.extract_strided_slice %395 {offsets = [0, 128], sizes = [8, 128], strides = [1, 1]} : vector<8x256xf32> to vector<8x128xf32>
    %398 = vector.extract_strided_slice %389 {offsets = [0, 256], sizes = [8, 128], strides = [1, 1]} : vector<8x512xf32> to vector<8x128xf32>
    %399 = vector.extract_strided_slice %389 {offsets = [0, 384], sizes = [8, 128], strides = [1, 1]} : vector<8x512xf32> to vector<8x128xf32>
    %400 = arith.mulf %396, %399 : vector<8x128xf32>
    %401 = arith.addf %398, %400 : vector<8x128xf32>
    %402 = math.tanh %401 : vector<8x128xf32>
    %cst_88 = arith.constant 1.000000e+00 : f32
    %403 = vector.broadcast %cst_88 : f32 to vector<8x128xf32>
    %404 = arith.subf %403, %397 : vector<8x128xf32>
    %405 = arith.mulf %404, %402 : vector<8x128xf32>
    %406 = arith.mulf %397, %358 : vector<8x128xf32>
    %407 = arith.addf %405, %406 : vector<8x128xf32>
    %408 = arith.truncf %407 : vector<8x128xf32> to vector<8x128xbf16>
    %c56_89 = arith.constant 56 : index
    %c0_90 = arith.constant 0 : index
    %409 = vector.load %arg17[%c56_89, %c0_90] : memref<64x128xbf16, #tpu.memory_space<vmem>>, vector<8x128xbf16>
    tpu.vector_store %arg17[%c56_89, %c0_90], %408 {strides = array<i32>} : memref<64x128xbf16, #tpu.memory_space<vmem>>, vector<8x128xbf16>,
    %c0_91 = arith.constant 0 : index
    %c0_92 = arith.constant 0 : index
    %410 = vector.load %arg17[%c0_91, %c0_92] : memref<64x128xbf16, #tpu.memory_space<vmem>>, vector<64x128xbf16>
    %c0_93 = arith.constant 0 : index
    %c0_94 = arith.constant 0 : index
    %411 = vector.load %arg8[%c0_93, %c0_94] : memref<128x128xbf16, #tpu.memory_space<vmem>>, vector<128x128xbf16>
    %cst_95 = arith.constant dense<0.000000e+00> : vector<64x128xf32>
    %412 = tpu.matmul %410, %411, %cst_95 {dimension_numbers = #tpu.dot_dimension_numbers<[1], [0], [0], [1], [0, 0, 1, 1], [], []>} : vector<64x128xbf16>, vector<128x128xbf16>, vector<64x128xf32> -> vector<64x128xf32>
    %c0_96 = arith.constant 0 : index
    %c0_97 = arith.constant 0 : index
    %413 = vector.load %arg9[%c0_96, %c0_97] : memref<1x128xf32, #tpu.memory_space<vmem>>, vector<1x128xf32>
    %414 = vector.broadcast %413 : vector<1x128xf32> to vector<64x128xf32>
    %415 = arith.addf %412, %414 : vector<64x128xf32>
    %416 = math.tanh %415 : vector<64x128xf32>
    %417 = vector.shape_cast %416 : vector<64x128xf32> to vector<8x8x128xf32>
    %c0_98 = arith.constant 0 : index
    %c0_99 = arith.constant 0 : index
    %418 = vector.load %arg10[%c0_98, %c0_99] : memref<1x128xf32, #tpu.memory_space<vmem>>, vector<1x128xf32>
    %419 = vector.shape_cast %418 : vector<1x128xf32> to vector<1x1x128xf32>
    %420 = vector.broadcast %419 : vector<1x1x128xf32> to vector<8x8x128xf32>
    %421 = arith.mulf %417, %420 : vector<8x8x128xf32>
    %cst_100 = arith.constant dense<0.000000e+00> : vector<8x8xf32>
    %422 = vector.multi_reduction <add>, %421, %cst_100 [2] : vector<8x8x128xf32> to vector<8x8xf32>
    %423 = vector.shape_cast %422 : vector<8x8xf32> to vector<8x8x1xf32>
    %cst_101 = arith.constant dense<0xFF800000> : vector<8x1xf32>
    %424 = vector.multi_reduction <maximumf>, %423, %cst_101 [0] : vector<8x8x1xf32> to vector<8x1xf32>
    %425 = vector.shape_cast %424 : vector<8x1xf32> to vector<1x8x1xf32>
    %426 = vector.broadcast %425 : vector<1x8x1xf32> to vector<8x8x1xf32>
    %427 = arith.subf %423, %426 : vector<8x8x1xf32>
    %428 = math.exp %427 : vector<8x8x1xf32>
    %cst_102 = arith.constant dense<0.000000e+00> : vector<8x1xf32>
    %429 = vector.multi_reduction <add>, %428, %cst_102 [0] : vector<8x8x1xf32> to vector<8x1xf32>
    %430 = vector.shape_cast %429 : vector<8x1xf32> to vector<1x8x1xf32>
    %431 = vector.broadcast %430 : vector<1x8x1xf32> to vector<8x8x1xf32>
    %432 = arith.divf %428, %431 : vector<8x8x1xf32>
    %433 = arith.extf %410 : vector<64x128xbf16> to vector<64x128xf32>
    %434 = vector.shape_cast %433 : vector<64x128xf32> to vector<8x8x128xf32>
    %435 = vector.broadcast %432 : vector<8x8x1xf32> to vector<8x8x128xf32>
    %436 = arith.mulf %434, %435 : vector<8x8x128xf32>
    %cst_103 = arith.constant dense<0.000000e+00> : vector<8x128xf32>
    %437 = vector.multi_reduction <add>, %436, %cst_103 [0] : vector<8x8x128xf32> to vector<8x128xf32>
    %438 = arith.truncf %437 : vector<8x128xf32> to vector<8x128xbf16>
    %c0_104 = arith.constant 0 : index
    %c0_105 = arith.constant 0 : index
    %439 = vector.load %arg11[%c0_104, %c0_105] : memref<128x128xbf16, #tpu.memory_space<vmem>>, vector<128x128xbf16>
    %cst_106 = arith.constant dense<0.000000e+00> : vector<8x128xf32>
    %440 = tpu.matmul %438, %439, %cst_106 {dimension_numbers = #tpu.dot_dimension_numbers<[1], [0], [0], [1], [0, 0, 1, 1], [], []>} : vector<8x128xbf16>, vector<128x128xbf16>, vector<8x128xf32> -> vector<8x128xf32>
    %c0_107 = arith.constant 0 : index
    %c0_108 = arith.constant 0 : index
    %441 = vector.load %arg12[%c0_107, %c0_108] : memref<1x128xf32, #tpu.memory_space<vmem>>, vector<1x128xf32>
    %442 = vector.broadcast %441 : vector<1x128xf32> to vector<8x128xf32>
    %443 = arith.addf %440, %442 : vector<8x128xf32>
    %cst_109 = arith.constant 0.000000e+00 : f32
    %444 = vector.broadcast %cst_109 : f32 to vector<8x128xf32>
    %445 = arith.maximumf %443, %444 : vector<8x128xf32>
    %446 = arith.truncf %445 : vector<8x128xf32> to vector<8x128xbf16>
    %c0_110 = arith.constant 0 : index
    %c0_111 = arith.constant 0 : index
    %447 = vector.load %arg13[%c0_110, %c0_111] : memref<128x128xbf16, #tpu.memory_space<vmem>>, vector<128x128xbf16>
    %cst_112 = arith.constant dense<0.000000e+00> : vector<8x128xf32>
    %448 = tpu.matmul %446, %447, %cst_112 {dimension_numbers = #tpu.dot_dimension_numbers<[1], [0], [0], [1], [0, 0, 1, 1], [], []>} : vector<8x128xbf16>, vector<128x128xbf16>, vector<8x128xf32> -> vector<8x128xf32>
    %c0_113 = arith.constant 0 : index
    %c0_114 = arith.constant 0 : index
    %449 = vector.load %arg14[%c0_113, %c0_114] : memref<1x128xf32, #tpu.memory_space<vmem>>, vector<1x128xf32>
    %450 = vector.broadcast %449 : vector<1x128xf32> to vector<8x128xf32>
    %451 = arith.addf %448, %450 : vector<8x128xf32>
    %c0_115 = arith.constant 0 : index
    %c0_116 = arith.constant 0 : index
    %452 = vector.load %arg15[%c0_115, %c0_116] : memref<8x128xf32, #tpu.memory_space<vmem>>, vector<8x128xf32>
    tpu.vector_store %arg15[%c0_115, %c0_116], %451 {strides = array<i32>} : memref<8x128xf32, #tpu.memory_space<vmem>>, vector<8x128xf32>,
    return
  }
  func.func @transform_0(%arg0: i32) -> (i32, i32, i32) {
    %c0_i32 = arith.constant 0 : i32
    %c0_i32_0 = arith.constant 0 : i32
    %c0_i32_1 = arith.constant 0 : i32
    return %c0_i32, %arg0, %c0_i32_0 : i32, i32, i32
  }
  func.func @transform_1(%arg0: i32) -> (i32, i32) {
    %c0_i32 = arith.constant 0 : i32
    %c0_i32_0 = arith.constant 0 : i32
    %c0_i32_1 = arith.constant 0 : i32
    return %c0_i32, %c0_i32_0 : i32, i32
  }
  func.func @transform_2(%arg0: i32) -> (i32, i32) {
    %c0_i32 = arith.constant 0 : i32
    %c0_i32_0 = arith.constant 0 : i32
    %c0_i32_1 = arith.constant 0 : i32
    return %c0_i32, %c0_i32_0 : i32, i32
  }
  func.func @transform_3(%arg0: i32) -> (i32, i32) {
    %c0_i32 = arith.constant 0 : i32
    %c0_i32_0 = arith.constant 0 : i32
    %c0_i32_1 = arith.constant 0 : i32
    return %c0_i32, %c0_i32_0 : i32, i32
  }
  func.func @transform_4(%arg0: i32) -> (i32, i32) {
    %c0_i32 = arith.constant 0 : i32
    %c0_i32_0 = arith.constant 0 : i32
    %c0_i32_1 = arith.constant 0 : i32
    return %c0_i32, %c0_i32_0 : i32, i32
  }
  func.func @transform_5(%arg0: i32) -> (i32, i32) {
    %c0_i32 = arith.constant 0 : i32
    %c0_i32_0 = arith.constant 0 : i32
    %c0_i32_1 = arith.constant 0 : i32
    return %c0_i32, %c0_i32_0 : i32, i32
  }
  func.func @transform_6(%arg0: i32) -> (i32, i32) {
    %c0_i32 = arith.constant 0 : i32
    %c0_i32_0 = arith.constant 0 : i32
    %c0_i32_1 = arith.constant 0 : i32
    return %c0_i32, %c0_i32_0 : i32, i32
  }
  func.func @transform_7(%arg0: i32) -> (i32, i32) {
    %c0_i32 = arith.constant 0 : i32
    %c0_i32_0 = arith.constant 0 : i32
    %c0_i32_1 = arith.constant 0 : i32
    return %c0_i32, %c0_i32_0 : i32, i32
  }
  func.func @transform_8(%arg0: i32) -> (i32, i32) {
    %c0_i32 = arith.constant 0 : i32
    %c0_i32_0 = arith.constant 0 : i32
    %c0_i32_1 = arith.constant 0 : i32
    return %c0_i32, %c0_i32_0 : i32, i32
  }
  func.func @transform_9(%arg0: i32) -> (i32, i32) {
    %c0_i32 = arith.constant 0 : i32
    %c0_i32_0 = arith.constant 0 : i32
    %c0_i32_1 = arith.constant 0 : i32
    return %c0_i32, %c0_i32_0 : i32, i32
  }
  func.func @transform_10(%arg0: i32) -> (i32, i32) {
    %c0_i32 = arith.constant 0 : i32
    %c0_i32_0 = arith.constant 0 : i32
    %c0_i32_1 = arith.constant 0 : i32
    return %c0_i32, %c0_i32_0 : i32, i32
  }
  func.func @transform_11(%arg0: i32) -> (i32, i32) {
    %c0_i32 = arith.constant 0 : i32
    %c0_i32_0 = arith.constant 0 : i32
    %c0_i32_1 = arith.constant 0 : i32
    return %c0_i32, %c0_i32_0 : i32, i32
  }
  func.func @transform_12(%arg0: i32) -> (i32, i32) {
    %c0_i32 = arith.constant 0 : i32
    %c0_i32_0 = arith.constant 0 : i32
    %c0_i32_1 = arith.constant 0 : i32
    return %c0_i32, %c0_i32_0 : i32, i32
  }
  func.func @transform_13(%arg0: i32) -> (i32, i32) {
    %c0_i32 = arith.constant 0 : i32
    %c0_i32_0 = arith.constant 0 : i32
    %c0_i32_1 = arith.constant 0 : i32
    return %c0_i32, %c0_i32_0 : i32, i32
  }
  func.func @transform_14(%arg0: i32) -> (i32, i32) {
    %c0_i32 = arith.constant 0 : i32
    %c0_i32_0 = arith.constant 0 : i32
    return %arg0, %c0_i32 : i32, i32
  }
}

</mosaic_0001>

<bundles_post_ra>
// kernel: tpu_custom_call.1
= control target key start
LH: loop header
LB: loop body
LE: loop exit
PB: predicated region body
PF: predicated region fallthrough
CT: control target
= control target key end

     0   :  { %19 = vsyncpa [#allocation5], 0  ;;  %s6026_s0 = inlined_call_operand.hbm [shape: bf16[8,8,8], index: 0, kind: input, shape index: {}]   ;;  %s6027_s1 = inlined_call_operand.hbm [shape: bf16[8,384], index: 1, kind: input, shape index: {}]   ;;  %s6028_s2 = inlined_call_operand.vmem [shape: f32[1,384], index: 2, kind: input, shape index: {}]   ;;  %s6029_s3 = inlined_call_operand.hbm [shape: bf16[128,384], index: 3, kind: input, shape index: {}]   ;;  %s6030_s4 = inlined_call_operand.vmem [shape: f32[1,128], index: 4, kind: input, shape index: {}]   ;;  %s6031_s5 = inlined_call_operand.hbm [shape: bf16[256,512], index: 5, kind: input, shape index: {}]   ;;  %s6032_s6 = inlined_call_operand.vmem [shape: f32[1,512], index: 6, kind: input, shape index: {}]   ;;  %s6033_s7 = inlined_call_operand.hbm [shape: bf16[128,128], index: 7, kind: input, shape index: {}]   ;;  %s6034_s8 = inlined_call_operand.vmem [shape: f32[1,128], index: 8, kind: input, shape index: {}]   ;;  %s6035_s9 = inlined_call_operand.vmem [shape: f32[1,128], index: 9, kind: input, shape index: {}]   ;;  %s6036_s10 = inlined_call_operand.hbm [shape: bf16[128,128], index: 10, kind: input, shape index: {}]   ;;  %s6037_s11 = inlined_call_operand.vmem [shape: f32[1,128], index: 11, kind: input, shape index: {}]   ;;  %s6038_s12 = inlined_call_operand.hbm [shape: bf16[128,128], index: 12, kind: input, shape index: {}]   ;;  %s6039_s13 = inlined_call_operand.vmem [shape: f32[1,128], index: 13, kind: input, shape index: {}]   ;;  %s6040_s14 = inlined_call_operand.hbm [shape: f32[8,128], index: 14, kind: output, shape index: {}]  }
   0x1   :  { %20 = vsyncpa [#allocation8], 0 }
   0x2   :  { %21 = vsyncpa [#allocation11], 0 }
   0x3   :  { %22 = vsyncpa [#allocation14], 0 }
   0x4   :  { %23 = vsyncpa [#allocation6], 0  ;;  %s4381_s29 = smov [#allocation7]   ;;  %s4382_s15 = smov [#allocation10]  }
   0x5   :  { %s42_s30 = sshll.u32 %s4381_s29, 4  ;;  %s67_s16 = sshll.u32 %s4382_s15, 4  ;;  %s43_s30 = int_to_ptr.vmem [resolvable:$true] %s42_s30  ;;  %s4473_s16 = int_to_ptr.vmem [resolvable:$true] %s67_s16 }
   0x6   :  { %s4195_s19 = scalar_lea.hbm %s6027_s1, 192 }
   0x7   :  { %p4196_p0 = scmp.ne.s32.totalorder %s6027_s1, %s4195_s19  ;;  %p4199_p1 = scmp.lt.u32.totalorder %s4195_s19, %s6027_s1 }
   0x9   :  { %p4201_p2 = pnand %p4199_p1, %p4196_p0 }
   0xb   :  { %4204 = shalt.err (!%p4201_p2)
}
   0xc   :  { %s4205_s24 = scalar_lea.vmem %s43_s30, 192  ;;  %p4210_p4 = scmp.lt.s32.totalorder %s43_s30, %s43_s30 }
   0xd   :  { %p4206_p3 = scmp.ne.s32.totalorder %s43_s30, %s4205_s24  ;;  %p4211_p5 = scmp.lt.s32.totalorder %s4205_s24, %s4205_s24 }
   0xf   :  { %p4212_p6 = por %p4211_p5, %p4210_p4 }
  0x11   :  { %p4213_p7 = pnand %p4212_p6, %p4206_p3 }
  0x13   :  { %4216 = shalt.err (!%p4213_p7)
}
  0x14   :  { %45 = dma.hbm_to_vmem [thread:$0]  %s6027_s1, 192, %s43_s30, [#allocation8]  }
  0x15   :  { %s4217_s29 = scalar_lea.hbm %s6031_s5, 8192 }
  0x16   :  { %p4218_p8 = scmp.ne.s32.totalorder %s6031_s5, %s4217_s29  ;;  %p4221_p9 = scmp.lt.u32.totalorder %s4217_s29, %s6031_s5 }
  0x18   :  { %p4223_p10 = pnand %p4221_p9, %p4218_p8 }
  0x1a   :  { %4226 = shalt.err (!%p4223_p10)
}
  0x1b   :  { %s4227_s20 = scalar_lea.vmem %s4473_s16, 8192  ;;  %p4232_p12 = scmp.lt.s32.totalorder %s4473_s16, %s4473_s16 }
  0x1c   :  { %p4228_p11 = scmp.ne.s32.totalorder %s4473_s16, %s4227_s20  ;;  %p4233_p13 = scmp.lt.s32.totalorder %s4227_s20, %s4227_s20 }
  0x1e   :  { %p4234_p0 = por %p4233_p13, %p4232_p12 }
  0x20   :  { %p4235_p1 = pnand %p4234_p0, %p4228_p11 }
  0x22   :  { %4238 = shalt.err (!%p4235_p1)
}
  0x23   :  { %s4383_s1 = smov 256   ;;  %s4384_s30 = smov 16  }
  0x24   :  { %73 = dma.hbm_to_vmem [thread:$0]  %s6031_s5, 8192, %s4473_s16, [#allocation11], %s4383_s1, %s4383_s1, %s4384_s30  }
  0x25   :  { %s4385_s23 = smov [#allocation13]   ;;  %s4386_s25 = smov [#allocation4]  }
  0x26   :  { %s97_s24 = sshll.u32 %s4385_s23, 4  ;;  %s29_s26 = sshll.u32 %s4386_s25, 4  ;;  %s98_s24 = int_to_ptr.vmem [resolvable:$true] %s97_s24  ;;  %s4504_s26 = int_to_ptr.vmem [resolvable:$true] %s29_s26 }
  0x27   :  { %s4239_s29 = scalar_lea.hbm %s6036_s10, 1024 }
  0x28   :  { %p4240_p2 = scmp.ne.s32.totalorder %s6036_s10, %s4239_s29  ;;  %p4243_p3 = scmp.lt.u32.totalorder %s4239_s29, %s6036_s10 }
  0x2a   :  { %p4245_p4 = pnand %p4243_p3, %p4240_p2 }
  0x2c   :  { %4248 = shalt.err (!%p4245_p4)
}
  0x2d   :  { %s4249_s5 = scalar_lea.vmem %s98_s24, 1024  ;;  %p4254_p6 = scmp.lt.s32.totalorder %s98_s24, %s98_s24 }
  0x2e   :  { %p4250_p5 = scmp.ne.s32.totalorder %s98_s24, %s4249_s5  ;;  %p4255_p7 = scmp.lt.s32.totalorder %s4249_s5, %s4249_s5 }
  0x30   :  { %p4256_p8 = por %p4255_p7, %p4254_p6 }
  0x32   :  { %p4257_p9 = pnand %p4256_p8, %p4250_p5 }
  0x34   :  { %4260 = shalt.err (!%p4257_p9)
}
  0x35   :  { %s4387_s16 = smov 64   ;;  %s4388_s20 = smov 4  }
  0x36   :  { %103 = dma.hbm_to_vmem [thread:$0]  %s6036_s10, 1024, %s98_s24, [#allocation14], %s4387_s16, %s4387_s16, %s4388_s20  }
  0x37   :  { %s4261_s23 = scalar_lea.hbm %s6026_s0, 512 }
  0x38   :  { %p4262_p10 = scmp.ne.s32.totalorder %s6026_s0, %s4261_s23  ;;  %p4265_p11 = scmp.lt.u32.totalorder %s4261_s23, %s6026_s0 }
  0x3a   :  { %p4267_p12 = pnand %p4265_p11, %p4262_p10 }
  0x3c   :  { %4270 = shalt.err (!%p4267_p12)
}
  0x3d   :  { %s4271_s15 = scalar_lea.vmem %s4504_s26, 512  ;;  %p4276_p0 = scmp.lt.s32.totalorder %s4504_s26, %s4504_s26 }
  0x3e   :  { %p4272_p13 = scmp.ne.s32.totalorder %s4504_s26, %s4271_s15  ;;  %p4277_p1 = scmp.lt.s32.totalorder %s4271_s15, %s4271_s15 }
  0x40   :  { %p4278_p2 = por %p4277_p1, %p4276_p0 }
  0x42   :  { %p4279_p3 = pnand %p4278_p2, %p4272_p13 }
  0x44   :  { %4282 = shalt.err (!%p4279_p3)
}
  0x45   :  { %35 = dma.hbm_to_vmem [thread:$0]  %s6026_s0, 512, %s4504_s26, [#allocation5], %s4387_s16, %s4387_s16, %s4388_s20  }
  0x46   :  { %s4389_s17 = smov [#allocation9]   ;;  %s4283_s1 = scalar_lea.hbm %s6029_s3, 3072 }
  0x47   :  { %s53_s18 = sshll.u32 %s4389_s17, 4  ;;  %p4284_p4 = scmp.ne.s32.totalorder %s6029_s3, %s4283_s1  ;;  %s54_s18 = int_to_ptr.vmem [resolvable:$true] %s53_s18 }
  0x48   :  { %p4287_p5 = scmp.lt.u32.totalorder %s4283_s1, %s6029_s3 }
  0x4a   :  { %p4289_p6 = pnand %p4287_p5, %p4284_p4 }
  0x4c   :  { %4292 = shalt.err (!%p4289_p6)
}
  0x4d   :  { %s4293_s25 = scalar_lea.vmem %s54_s18, 3072  ;;  %p4298_p8 = scmp.lt.s32.totalorder %s54_s18, %s54_s18 }
  0x4e   :  { %p4294_p7 = scmp.ne.s32.totalorder %s54_s18, %s4293_s25  ;;  %p4299_p9 = scmp.lt.s32.totalorder %s4293_s25, %s4293_s25 }
  0x50   :  { %p4300_p10 = por %p4299_p9, %p4298_p8 }
  0x52   :  { %p4301_p11 = pnand %p4300_p10, %p4294_p7 }
  0x54   :  { %4304 = shalt.err (!%p4301_p11)
}
  0x55   :  { %s4390_s0 = smov 192   ;;  %s4391_s26 = smov 12  }
  0x56   :  { %59 = dma.hbm_to_vmem [thread:$0]  %s6029_s3, 3072, %s54_s18, [#allocation8], %s4390_s0, %s4390_s0, %s4391_s26  }
  0x57   :  { %s4392_s29 = smov [#allocation12]   ;;  %s4393_s10 = smov [#allocation15]  }
  0x58   :  { %s81_s15 = sshll.u32 %s4392_s29, 4  ;;  %s111_s24 = sshll.u32 %s4393_s10, 4  ;;  %s82_s15 = int_to_ptr.vmem [resolvable:$true] %s81_s15  ;;  %s112_s24 = int_to_ptr.vmem [resolvable:$true] %s111_s24 }
  0x59   :  { %s4305_s5 = scalar_lea.hbm %s6033_s7, 1024 }
  0x5a   :  { %p4306_p12 = scmp.ne.s32.totalorder %s6033_s7, %s4305_s5  ;;  %p4309_p13 = scmp.lt.u32.totalorder %s4305_s5, %s6033_s7 }
  0x5c   :  { %p4311_p0 = pnand %p4309_p13, %p4306_p12 }
  0x5e   :  { %4314 = shalt.err (!%p4311_p0)
}
  0x5f   :  { %s4315_s3 = scalar_lea.vmem %s82_s15, 1024  ;;  %p4320_p2 = scmp.lt.s32.totalorder %s82_s15, %s82_s15 }
  0x60   :  { %p4316_p1 = scmp.ne.s32.totalorder %s82_s15, %s4315_s3  ;;  %p4321_p3 = scmp.lt.s32.totalorder %s4315_s3, %s4315_s3 }
  0x62   :  { %p4322_p4 = por %p4321_p3, %p4320_p2 }
  0x64   :  { %p4323_p5 = pnand %p4322_p4, %p4316_p1 }
  0x66   :  { %4326 = shalt.err (!%p4323_p5)
}
  0x67   :  { %87 = dma.hbm_to_vmem [thread:$0]  %s6033_s7, 1024, %s82_s15, [#allocation11], %s4387_s16, %s4387_s16, %s4388_s20  }
  0x68   :  { %s4327_s26 = scalar_lea.hbm %s6038_s12, 1024 }
  0x69   :  { %p4328_p6 = scmp.ne.s32.totalorder %s6038_s12, %s4327_s26  ;;  %p4331_p7 = scmp.lt.u32.totalorder %s4327_s26, %s6038_s12 }
  0x6b   :  { %p4333_p8 = pnand %p4331_p7, %p4328_p6 }
  0x6d   :  { %4336 = shalt.err (!%p4333_p8)
}
  0x6e   :  { %s4337_s17 = scalar_lea.vmem %s112_s24, 1024  ;;  %p4342_p10 = scmp.lt.s32.totalorder %s112_s24, %s112_s24 }
  0x6f   :  { %p4338_p9 = scmp.ne.s32.totalorder %s112_s24, %s4337_s17  ;;  %p4343_p11 = scmp.lt.s32.totalorder %s4337_s17, %s4337_s17 }
  0x71   :  { %p4344_p12 = por %p4343_p11, %p4342_p10 }
  0x73   :  { %p4345_p13 = pnand %p4344_p12, %p4338_p9 }
  0x75   :  { %4348 = shalt.err (!%p4345_p13)
}
  0x76   :  { %117 = dma.hbm_to_vmem [thread:$0]  %s6038_s12, 1024, %s112_s24, [#allocation14], %s4387_s16, %s4387_s16, %s4388_s20  }
  0x77   :  { %4371 = dma.done.wait [#allocation5], 512  }
  0x78   :  { %4372 = vsyncadd [#allocation5], 4294966784 }
  0x79   :  { %4373 = dma.done.wait [#allocation8], 3264  }
  0x7a   :  { %4374 = vsyncadd [#allocation8], 4294964032 }
  0x7b   :  { %4375 = dma.done.wait [#allocation11], 9216  }
  0x7c   :  { %4376 = vsyncadd [#allocation11], 4294958080 }
  0x7d   :  { %4377 = dma.done.wait [#allocation14], 2048  }
  0x7e   :  { %4378 = vsyncadd [#allocation14], 4294965248  ;;  %v6041_v0 = vmov 0   ;;  %v275_v1 = vld [vmem:[#allocation7] sm:$0xff]  ;;  %vm335_vm0 = vcmask 1043456   ;;  %vm322_vm1 = vcmask 64512  }
  0x7f   :  { %377 = vmatprep.mubr.bf16.mxu0 %v6041_v0  ;;  %v3146_v2 = vcombine.high %v275_v1, %v275_v1  ;;  %v3145_v3 = vcombine.low %v275_v1, %v275_v1  ;;  %v3666_v4 = vld [vmem:[#allocation4] sm:$0xff]   ;;  %v4584_v5 = vld [vmem:[#allocation9 + $0x4] ss:$12 sps:$4 sm:$0xff]   ;;  %v4589_v7 = vld [vmem:[#allocation9] ss:$12 sps:$4 sm:$0xff]   ;;  %v6043_v16 = vmov 0.0  }
  0x80   :  { %3414 = vmatprep.mubr.msk.bf16.mxu1 %vm322_vm1, %v3666_v4  ;;  %v4592_v8 = vld [vmem:[#allocation9 + $0x1c] ss:$12 sps:$4 sm:$0xff]   ;;  %v4596_v9 = vld [vmem:[#allocation9 + $0x18] ss:$12 sps:$4 sm:$0xff]   ;;  %v4600_v10 = vld [vmem:[#allocation9 + $0x34] ss:$12 sps:$4 sm:$0xff]  }
  0x81   :  { %3148 = vmatprep.subr.msk.bf16.mxu0 %vm335_vm0, %v3146_v2  ;;  %v337_v6 = vsel %vm335_vm0, %v3145_v3, 0  ;;  %v3684_v11 = vld [vmem:[#allocation7 + $0x8] ss:$0 sps:$4 sm:$0xff]   ;;  %v4608_v15 = vld [vmem:[#allocation9 + $0x4c] ss:$12 sps:$4 sm:$0xff]   ;;  %v3680_v19 = vld [vmem:[#allocation4 + $0x10] sm:$0xff]  }
  0x82   :  { %346 = vmatpush1.bf16.msra.mxu0 %v337_v6  ;;  %v3673_v12 = vld [vmem:[#allocation4 + $0x8] sm:$0xff]   ;;  %3646 = vmatprep.subr.msk.bf16.mxu1 %vm335_vm0, %v3684_v11  ;;  %v343_v14 = vsel %vm335_vm0, %v3684_v11, 0  ;;  %v4612_v17 = vld [vmem:[#allocation9 + $0x8] ss:$12 sps:$4 sm:$0xff]   ;;  %v4619_v20 = vld [vmem:[#allocation9 + $0x64] ss:$12 sps:$4 sm:$0xff]  }
  0x83   :  { %638 = vmatprep.subr.bf16.mxu0 %v4584_v5  ;;  %v4602_v13 = vld [vmem:[#allocation9 + $0x30] ss:$12 sps:$4 sm:$0xff]   ;;  %3413 = vmatpush3.bf16.msra.mxu1 %v343_v14  ;;  %v4615_v18 = vld [vmem:[#allocation9 + $0x48] ss:$12 sps:$4 sm:$0xff]   ;;  %v4623_v21 = vld [vmem:[#allocation9 + $0x20] ss:$12 sps:$4 sm:$0xff]  }
  0x84   :  { %3422 = vmatprep.subr.bf16.mxu1 %v6043_v16  ;;  %v4628_v22 = vld [vmem:[#allocation9 + $0x60] ss:$12 sps:$4 sm:$0xff]   ;;  %v4631_v23 = vld [vmem:[#allocation9 + $0x7c] ss:$12 sps:$4 sm:$0xff]   ;;  %v4633_v24 = vld [vmem:[#allocation9 + $0x78] ss:$12 sps:$4 sm:$0xff]  }
  0x85   :  { %3149 = vmatmul.mubr.msk.bf16.vlgmr.msra.gmra.mrb[0].mxu0 %vm322_vm1, %v3666_v4  ;;  %v4636_v25 = vld [vmem:[#allocation9 + $0x38] ss:$12 sps:$4 sm:$0xff]   ;;  %v3688_v26 = vld [vmem:[#allocation4 + $0x18] sm:$0xff]   ;;  %v4639_v27 = vld [vmem:[#allocation9 + $0x94] ss:$12 sps:$4 sm:$0xff]   ;;  %vm4396_vm2 = vmmov 0  }
  0x86   :  { %639 = vmatpush1.bf16.msra.mxu0 %v4589_v7  ;;  %387 = vmatprep.mubr.bf16.mxu0 %v6041_v0  ;;  %v4644_v28 = vld [vmem:[#allocation9 + $0x50] ss:$12 sps:$4 sm:$0xff]   ;;  %v4653_v30 = vld [vmem:[#allocation9 + $0xac] ss:$12 sps:$4 sm:$0xff]   ;;  %v4657_v31 = vld [vmem:[#allocation9 + $0x68] ss:$12 sps:$4 sm:$0xff]  }
  0x87   :  { %640 = vmatprep.subr.bf16.mxu0 %v4592_v8  ;;  %3415 = vmatmul.mubr.msk.bf16.vlgmr.msra.gmra.mrb[0].mxu1 %vm322_vm1, %v3673_v12  ;;  %v4648_v29 = vld [vmem:[#allocation9 + $0x90] ss:$12 sps:$4 sm:$0xff]   ;;  %v4660_v32 = vld [vmem:[#allocation9 + $0xa8] ss:$12 sps:$4 sm:$0xff]   ;;  %v4667_v33 = vld [vmem:[#allocation9 + $0x80] ss:$12 sps:$4 sm:$0xff]  }
  0x88   :  { %3423 = vmatpush3.bf16.msra.mxu1 %v4612_v17  ;;  %3418 = vmatprep.mubr.msk.bf16.mxu1 %vm322_vm1, %v3680_v19  ;;  %v4673_v34 = vld [vmem:[#allocation9 + $0x98] ss:$12 sps:$4 sm:$0xff]   ;;  %v4678_v35 = vld [vmem:[#allocation9 + $0xb0] ss:$12 sps:$4 sm:$0xff]   ;;  %s4397_s25 = smov [#allocation16]  }
  0x89   :  { %3424 = vmatprep.subr.bf16.mxu1 %v6043_v16  ;;  %v4686_v36 = vld [vmem:[#allocation10 + $0x4] ss:$16 sps:$4 sm:$0xff]   ;;  %v4688_v37 = vld [vmem:[#allocation10 + $0xc] ss:$16 sps:$4 sm:$0xff]   ;;  %v4690_v38 = vld [vmem:[#allocation10] ss:$16 sps:$4 sm:$0xff]  }
  0x8a   :  { %641 = vmatpush1.bf16.msra.mxu0 %v4596_v9  ;;  %v4692_v39 = vld [vmem:[#allocation10 + $0x8] ss:$16 sps:$4 sm:$0xff]   ;;  %v4698_v40 = vld [vmem:[#allocation10 + $0x24] ss:$16 sps:$4 sm:$0xff]   ;;  %v4700_v41 = vld [vmem:[#allocation10 + $0x2c] ss:$16 sps:$4 sm:$0xff]  }
  0x8b   :  { %642 = vmatprep.subr.bf16.mxu0 %v4600_v10  ;;  %v4702_v42 = vld [vmem:[#allocation10 + $0x20] ss:$16 sps:$4 sm:$0xff]   ;;  %v4704_v43 = vld [vmem:[#allocation10 + $0x28] ss:$16 sps:$4 sm:$0xff]   ;;  %v4710_v44 = vld [vmem:[#allocation10 + $0x44] ss:$16 sps:$4 sm:$0xff]  }
  0x8c   :  { %3425 = vmatpush3.bf16.msra.mxu1 %v4623_v21  ;;  %v4712_v45 = vld [vmem:[#allocation10 + $0x4c] ss:$16 sps:$4 sm:$0xff]   ;;  %v4714_v46 = vld [vmem:[#allocation10 + $0x40] ss:$16 sps:$4 sm:$0xff]   ;;  %v4716_v47 = vld [vmem:[#allocation10 + $0x48] ss:$16 sps:$4 sm:$0xff]  }
  0x8d   :  { %3150 = vmatmul.mubr.msk.bf16.gmra.mrb[4].mxu0 %vm322_vm1, %v3673_v12  ;;  %3426 = vmatprep.subr.bf16.mxu1 %v6043_v16  ;;  %v4722_v48 = vld [vmem:[#allocation10 + $0x64] ss:$16 sps:$4 sm:$0xff]   ;;  %v4724_v49 = vld [vmem:[#allocation10 + $0x6c] ss:$16 sps:$4 sm:$0xff]   ;;  %v4726_v50 = vld [vmem:[#allocation10 + $0x60] ss:$16 sps:$4 sm:$0xff]  }
  0x8e   :  { %643 = vmatpush1.bf16.msra.mxu0 %v4602_v13  ;;  %397 = vmatprep.mubr.bf16.mxu0 %v6041_v0  ;;  %v4728_v51 = vld [vmem:[#allocation10 + $0x68] ss:$16 sps:$4 sm:$0xff]   ;;  %v4734_v52 = vld [vmem:[#allocation10 + $0x84] ss:$16 sps:$4 sm:$0xff]   ;;  %v4736_v53 = vld [vmem:[#allocation10 + $0x8c] ss:$16 sps:$4 sm:$0xff]  }
  0x8f   :  { %644 = vmatprep.subr.bf16.mxu0 %v4608_v15  ;;  %3419 = vmatmul.mubr.msk.bf16.gmra.mrb[4].mxu1 %vm322_vm1, %v3688_v26  ;;  %6287 = vst [vmem:[#allocation22_spill] sm:$0xff] %v4734_v52  ;;  %6288 = vst [vmem:[#allocation23_spill] sm:$0xff] %v4736_v53  ;;  %v4738_v54 = vld [vmem:[#allocation10 + $0x80] ss:$16 sps:$4 sm:$0xff]   ;;  %v4740_v55 = vld [vmem:[#allocation10 + $0x88] ss:$16 sps:$4 sm:$0xff]  }
  0x90   :  { %3427 = vmatpush3.bf16.msra.mxu1 %v4636_v25  ;;  %3438 = vmatprep.mubr.msk.bf16.mxu1 %vm4396_vm2, %v6043_v16  ;;  %6289 = vst [vmem:[#allocation24_spill] sm:$0xff] %v4738_v54  ;;  %6290 = vst [vmem:[#allocation25_spill] sm:$0xff] %v4740_v55  ;;  %v4746_v56 = vld [vmem:[#allocation10 + $0xa4] ss:$16 sps:$4 sm:$0xff]   ;;  %v4748_v57 = vld [vmem:[#allocation10 + $0xac] ss:$16 sps:$4 sm:$0xff]  }
  0x91   :  { %3428 = vmatprep.subr.bf16.mxu1 %v6043_v16  ;;  %6291 = vst [vmem:[#allocation26_spill] sm:$0xff] %v4746_v56  ;;  %6292 = vst [vmem:[#allocation27_spill] sm:$0xff] %v4748_v57  ;;  %v4750_v58 = vld [vmem:[#allocation10 + $0xa0] ss:$16 sps:$4 sm:$0xff]   ;;  %v4752_v59 = vld [vmem:[#allocation10 + $0xa8] ss:$16 sps:$4 sm:$0xff]  }
  0x92   :  { %645 = vmatpush1.bf16.msra.mxu0 %v4615_v18  ;;  %6293 = vst [vmem:[#allocation28_spill] sm:$0xff] %v4750_v58  ;;  %6294 = vst [vmem:[#allocation29_spill] sm:$0xff] %v4752_v59  ;;  %v4758_v60 = vld [vmem:[#allocation10 + $0xc4] ss:$16 sps:$4 sm:$0xff]   ;;  %v4760_v61 = vld [vmem:[#allocation10 + $0xcc] ss:$16 sps:$4 sm:$0xff]  }
  0x93   :  { %646 = vmatprep.subr.bf16.mxu0 %v4619_v20  ;;  %6295 = vst [vmem:[#allocation30_spill] sm:$0xff] %v4758_v60  ;;  %6296 = vst [vmem:[#allocation31_spill] sm:$0xff] %v4760_v61  ;;  %v4762_v62 = vld [vmem:[#allocation10 + $0xc0] ss:$16 sps:$4 sm:$0xff]   ;;  %v4764_v63 = vld [vmem:[#allocation10 + $0xc8] ss:$16 sps:$4 sm:$0xff]  }
  0x94   :  { %3429 = vmatpush3.bf16.msra.mxu1 %v4644_v28  ;;  %6297 = vst [vmem:[#allocation32_spill] sm:$0xff] %v4762_v62  ;;  %6298 = vst [vmem:[#allocation33_spill] sm:$0xff] %v4764_v63  ;;  %v4770_v1 = vld [vmem:[#allocation10 + $0xe4] ss:$16 sps:$4 sm:$0xff]   ;;  %v4772_v2 = vld [vmem:[#allocation10 + $0xec] ss:$16 sps:$4 sm:$0xff]  }
  0x95   :  { %3151 = vmatmul.mubr.msk.bf16.gmra.mrb[8].mxu0 %vm322_vm1, %v3680_v19  ;;  %3430 = vmatprep.subr.bf16.mxu1 %v6043_v16  ;;  %6299 = vst [vmem:[#allocation34_spill] sm:$0xff] %v4770_v1  ;;  %6300 = vst [vmem:[#allocation35_spill] sm:$0xff] %v4772_v2  ;;  %v4774_v3 = vld [vmem:[#allocation10 + $0xe0] ss:$16 sps:$4 sm:$0xff]   ;;  %v4776_v4 = vld [vmem:[#allocation10 + $0xe8] ss:$16 sps:$4 sm:$0xff]  }
  0x96   :  { %647 = vmatpush1.bf16.msra.mxu0 %v4628_v22  ;;  %407 = vmatprep.mubr.bf16.mxu0 %v6041_v0  ;;  %6301 = vst [vmem:[#allocation36_spill] sm:$0xff] %v4774_v3  ;;  %6302 = vst [vmem:[#allocation37_spill] sm:$0xff] %v4776_v4  ;;  %v4782_v6 = vld [vmem:[#allocation10 + $0x104] ss:$16 sps:$4 sm:$0xff]   ;;  %v4784_v11 = vld [vmem:[#allocation10 + $0x10c] ss:$16 sps:$4 sm:$0xff]  }
  0x97   :  { %648 = vmatprep.subr.bf16.mxu0 %v4631_v23  ;;  %6303 = vst [vmem:[#allocation38_spill] sm:$0xff] %v4782_v6  ;;  %6304 = vst [vmem:[#allocation39_spill] sm:$0xff] %v4784_v11  ;;  %v4786_v12 = vld [vmem:[#allocation10 + $0x100] ss:$16 sps:$4 sm:$0xff]   ;;  %v4788_v14 = vld [vmem:[#allocation10 + $0x108] ss:$16 sps:$4 sm:$0xff]  }
  0x98   :  { %3431 = vmatpush3.bf16.msra.mxu1 %v4657_v31  ;;  %6305 = vst [vmem:[#allocation40_spill] sm:$0xff] %v4786_v12  ;;  %6306 = vst [vmem:[#allocation41_spill] sm:$0xff] %v4788_v14  ;;  %v4794_v19 = vld [vmem:[#allocation10 + $0x124] ss:$16 sps:$4 sm:$0xff]   ;;  %s3128_s0 = sshll.u32 %s4397_s25, 4  ;;  %s3129_s0 = int_to_ptr.vmem [resolvable:$true] %s3128_s0 }
  0x99   :  { %3432 = vmatprep.subr.bf16.mxu1 %v6043_v16  ;;  %6307 = vst [vmem:[#allocation42_spill] sm:$0xff] %v4794_v19  ;;  %p4354_p1 = scmp.lt.s32.totalorder %s3129_s0, %s3129_s0 }
  0x9a   :  { %649 = vmatpush1.bf16.msra.mxu0 %v4633_v24 }
  0x9b   :  { %650 = vmatprep.subr.bf16.mxu0 %v4639_v27 }
  0x9c   :  { %3433 = vmatpush3.bf16.msra.mxu1 %v4667_v33 }
  0x9d   :  { %3152 = vmatmul.mubr.msk.bf16.gmra.mrb[12].mxu0 %vm322_vm1, %v3688_v26  ;;  %3434 = vmatprep.subr.bf16.mxu1 %v6043_v16  ;;  %v4796_v26 = vld [vmem:[#allocation10 + $0x12c] ss:$16 sps:$4 sm:$0xff]  }
  0x9e   :  { %651 = vmatpush1.bf16.msra.mxu0 %v4648_v29  ;;  %670 = vmatprep.mubr.bf16.mxu0 %v6041_v0  ;;  %6308 = vst [vmem:[#allocation43_spill] sm:$0xff] %v4796_v26 }
  0x9f   :  { %652 = vmatprep.subr.bf16.mxu0 %v4653_v30 }
  0xa0   :  { %3435 = vmatpush3.bf16.msra.mxu1 %v4673_v34 }
  0xa1   :  { %3436 = vmatprep.subr.bf16.mxu1 %v6043_v16  ;;  %v4800_v16 = vld [vmem:[#allocation10 + $0x128] ss:$16 sps:$4 sm:$0xff]  }
  0xa2   :  { %653 = vmatpush1.bf16.msra.mxu0 %v4660_v32  ;;  %6310 = vst [vmem:[#allocation45_spill] sm:$0xff] %v4800_v16 }
  0xa3   :  { %1062 = vmatprep.subr.bf16.mxu0 %v4686_v36 }
  0xa4   :  { %3437 = vmatpush3.bf16.msra.mxu1 %v4678_v35 }
  0xa5   :  { %671 = vmatmul.mubr.bf16.vlgmr.msra.gmra.mrb[16].mxu0 %v6041_v0  ;;  %1103 = vmatprep.subr.bf16.mxu1 %v4688_v37 }
  0xa6   :  { %1094 = vmatprep.mubr.bf16.mxu0 %v6041_v0  ;;  %1063 = vmatpush1.bf16.msra.mxu0 %v4690_v38 }
  0xa7   :  { %3439 = vmatmul.mubr.bf16.vlgmr.msra.gmra.mrb[8].mxu1 %v6041_v0  ;;  %1064 = vmatprep.subr.bf16.mxu0 %v4698_v40 }
  0xa8   :  { %1135 = vmatprep.mubr.bf16.mxu1 %v6041_v0  ;;  %1104 = vmatpush1.bf16.msra.mxu1 %v4692_v39  ;;  %v4798_v0 = vld [vmem:[#allocation10 + $0x120] ss:$16 sps:$4 sm:$0xff]  }
  0xa9   :  { %1105 = vmatprep.subr.bf16.mxu1 %v4700_v41  ;;  %6309 = vst [vmem:[#allocation44_spill] sm:$0xff] %v4798_v0 }
  0xaa   :  { %1065 = vmatpush1.bf16.msra.mxu0 %v4702_v42 }
  0xab   :  { %1066 = vmatprep.subr.bf16.mxu0 %v4710_v44 }
  0xac   :  { %1106 = vmatpush1.bf16.msra.mxu1 %v4704_v43 }
  0xad   :  { %1107 = vmatprep.subr.bf16.mxu1 %v4712_v45 }
  0xae   :  { %1067 = vmatpush1.bf16.msra.mxu0 %v4714_v46 }
  0xaf   :  { %1068 = vmatprep.subr.bf16.mxu0 %v4722_v48 }
  0xb0   :  { %1108 = vmatpush1.bf16.msra.mxu1 %v4716_v47 }
  0xb1   :  { %1109 = vmatprep.subr.bf16.mxu1 %v4724_v49 }
  0xb2   :  { %1069 = vmatpush1.bf16.msra.mxu0 %v4726_v50 }
  0xb3   :  { %1070 = vmatprep.subr.bf16.mxu0 %v4734_v52 }
  0xb4   :  { %1110 = vmatpush1.bf16.msra.mxu1 %v4728_v51 }
  0xb5   :  { %1111 = vmatprep.subr.bf16.mxu1 %v4736_v53 }
  0xb6   :  { %1071 = vmatpush1.bf16.msra.mxu0 %v4738_v54 }
  0xb7   :  { %1072 = vmatprep.subr.bf16.mxu0 %v4746_v56 }
  0xb8   :  { %1112 = vmatpush1.bf16.msra.mxu1 %v4740_v55 }
  0xb9   :  { %1113 = vmatprep.subr.bf16.mxu1 %v4748_v57 }
  0xba   :  { %1073 = vmatpush1.bf16.msra.mxu0 %v4750_v58 }
  0xbb   :  { %1074 = vmatprep.subr.bf16.mxu0 %v4758_v60 }
  0xbc   :  { %1114 = vmatpush1.bf16.msra.mxu1 %v4752_v59 }
  0xbd   :  { %1115 = vmatprep.subr.bf16.mxu1 %v4760_v61 }
  0xbe   :  { %1075 = vmatpush1.bf16.msra.mxu0 %v4762_v62 }
  0xbf   :  { %1076 = vmatprep.subr.bf16.mxu0 %v4770_v1 }
  0xc0   :  { %1116 = vmatpush1.bf16.msra.mxu1 %v4764_v63 }
  0xc1   :  { %1117 = vmatprep.subr.bf16.mxu1 %v4772_v2 }
  0xc2   :  { %1077 = vmatpush1.bf16.msra.mxu0 %v4774_v3 }
  0xc3   :  { %1078 = vmatprep.subr.bf16.mxu0 %v4782_v6  ;;  %v4812_v6 = vld [vmem:[#allocation10 + $0x148] ss:$16 sps:$4 sm:$0xff]  }
  0xc4   :  { %1118 = vmatpush1.bf16.msra.mxu1 %v4776_v4  ;;  %6314 = vst [vmem:[#allocation49_spill] sm:$0xff] %v4812_v6  ;;  %v4840_v4 = vld [vmem:[#allocation10 + $0x1a4] ss:$16 sps:$4 sm:$0xff]  }
  0xc5   :  { %1119 = vmatprep.subr.bf16.mxu1 %v4784_v11  ;;  %v4806_v11 = vld [vmem:[#allocation10 + $0x144] ss:$16 sps:$4 sm:$0xff]   ;;  %6323 = vst [vmem:[#allocation58_spill] sm:$0xff] %v4840_v4 }
  0xc6   :  { %1079 = vmatpush1.bf16.msra.mxu0 %v4786_v12  ;;  %6311 = vst [vmem:[#allocation46_spill] sm:$0xff] %v4806_v11  ;;  %v4808_v12 = vld [vmem:[#allocation10 + $0x14c] ss:$16 sps:$4 sm:$0xff]  }
  0xc7   :  { %1080 = vmatprep.subr.bf16.mxu0 %v4794_v19  ;;  %6312 = vst [vmem:[#allocation47_spill] sm:$0xff] %v4808_v12  ;;  %v4824_v19 = vld [vmem:[#allocation10 + $0x168] ss:$16 sps:$4 sm:$0xff]  }
  0xc8   :  { %1120 = vmatpush1.bf16.msra.mxu1 %v4788_v14  ;;  %v4810_v14 = vld [vmem:[#allocation10 + $0x140] ss:$16 sps:$4 sm:$0xff]   ;;  %6318 = vst [vmem:[#allocation53_spill] sm:$0xff] %v4824_v19 }
  0xc9   :  { %1121 = vmatprep.subr.bf16.mxu1 %v4796_v26  ;;  %6313 = vst [vmem:[#allocation48_spill] sm:$0xff] %v4810_v14  ;;  %v4818_v26 = vld [vmem:[#allocation10 + $0x164] ss:$16 sps:$4 sm:$0xff]  }
  0xca   :  { %1081 = vmatpush1.bf16.msra.mxu0 %v4798_v0  ;;  %6315 = vst [vmem:[#allocation50_spill] sm:$0xff] %v4818_v26  ;;  %v4820_v0 = vld [vmem:[#allocation10 + $0x16c] ss:$16 sps:$4 sm:$0xff]  }
  0xcb   :  { %1082 = vmatprep.subr.bf16.mxu0 %v4806_v11  ;;  %6316 = vst [vmem:[#allocation51_spill] sm:$0xff] %v4820_v0  ;;  %v4836_v11 = vld [vmem:[#allocation10 + $0x188] ss:$16 sps:$4 sm:$0xff]  }
  0xcc   :  { %1122 = vmatpush1.bf16.msra.mxu1 %v4800_v16  ;;  %v4822_v16 = vld [vmem:[#allocation10 + $0x160] ss:$16 sps:$4 sm:$0xff]   ;;  %6322 = vst [vmem:[#allocation57_spill] sm:$0xff] %v4836_v11 }
  0xcd   :  { %1123 = vmatprep.subr.bf16.mxu1 %v4808_v12  ;;  %6317 = vst [vmem:[#allocation52_spill] sm:$0xff] %v4822_v16  ;;  %v4830_v12 = vld [vmem:[#allocation10 + $0x184] ss:$16 sps:$4 sm:$0xff]  }
  0xce   :  { %1083 = vmatpush1.bf16.msra.mxu0 %v4810_v14  ;;  %6319 = vst [vmem:[#allocation54_spill] sm:$0xff] %v4830_v12  ;;  %v4832_v14 = vld [vmem:[#allocation10 + $0x18c] ss:$16 sps:$4 sm:$0xff]  }
  0xcf   :  { %1084 = vmatprep.subr.bf16.mxu0 %v4818_v26  ;;  %6320 = vst [vmem:[#allocation55_spill] sm:$0xff] %v4832_v14  ;;  %v4842_v26 = vld [vmem:[#allocation10 + $0x1ac] ss:$16 sps:$4 sm:$0xff]  }
  0xd0   :  { %1124 = vmatpush1.bf16.msra.mxu1 %v4812_v6  ;;  %v4834_v6 = vld [vmem:[#allocation10 + $0x180] ss:$16 sps:$4 sm:$0xff]   ;;  %6324 = vst [vmem:[#allocation59_spill] sm:$0xff] %v4842_v26 }
  0xd1   :  { %1125 = vmatprep.subr.bf16.mxu1 %v4820_v0  ;;  %6321 = vst [vmem:[#allocation56_spill] sm:$0xff] %v4834_v6  ;;  %v4852_v0 = vld [vmem:[#allocation10 + $0x1c4] ss:$16 sps:$4 sm:$0xff]  }
  0xd2   :  { %1085 = vmatpush1.bf16.msra.mxu0 %v4822_v16  ;;  %v4848_v16 = vld [vmem:[#allocation10 + $0x1a8] ss:$16 sps:$4 sm:$0xff]   ;;  %6327 = vst [vmem:[#allocation62_spill] sm:$0xff] %v4852_v0 }
  0xd3   :  { %1086 = vmatprep.subr.bf16.mxu0 %v4830_v12  ;;  %6326 = vst [vmem:[#allocation61_spill] sm:$0xff] %v4848_v16  ;;  %v4854_v12 = vld [vmem:[#allocation10 + $0x1cc] ss:$16 sps:$4 sm:$0xff]  }
  0xd4   :  { %1126 = vmatpush1.bf16.msra.mxu1 %v4824_v19  ;;  %v4846_v19 = vld [vmem:[#allocation10 + $0x1a0] ss:$16 sps:$4 sm:$0xff]   ;;  %6328 = vst [vmem:[#allocation63_spill] sm:$0xff] %v4854_v12 }
  0xd5   :  { %1127 = vmatprep.subr.bf16.mxu1 %v4832_v14  ;;  %6325 = vst [vmem:[#allocation60_spill] sm:$0xff] %v4846_v19  ;;  %v4858_v14 = vld [vmem:[#allocation10 + $0x1c0] ss:$16 sps:$4 sm:$0xff]  }
  0xd6   :  { %1087 = vmatpush1.bf16.msra.mxu0 %v4834_v6  ;;  %6329 = vst [vmem:[#allocation64_spill] sm:$0xff] %v4858_v14  ;;  %v4860_v6 = vld [vmem:[#allocation10 + $0x1c8] ss:$16 sps:$4 sm:$0xff]  }
  0xd7   :  { %1088 = vmatprep.subr.bf16.mxu0 %v4840_v4  ;;  %6330 = vst [vmem:[#allocation65_spill] sm:$0xff] %v4860_v6  ;;  %v4866_v4 = vld [vmem:[#allocation10 + $0x1ec] ss:$16 sps:$4 sm:$0xff]  }
  0xd8   :  { %1128 = vmatpush1.bf16.msra.mxu1 %v4836_v11  ;;  %v4864_v11 = vld [vmem:[#allocation10 + $0x1e4] ss:$16 sps:$4 sm:$0xff]   ;;  %6332 = vst [vmem:[#allocation67_spill] sm:$0xff] %v4866_v4 }
  0xd9   :  { %1129 = vmatprep.subr.bf16.mxu1 %v4842_v26  ;;  %6331 = vst [vmem:[#allocation66_spill] sm:$0xff] %v4864_v11  ;;  %v4870_v26 = vld [vmem:[#allocation10 + $0x1e0] ss:$16 sps:$4 sm:$0xff]  }
  0xda   :  { %1089 = vmatpush1.bf16.msra.mxu0 %v4846_v19  ;;  %6333 = vst [vmem:[#allocation68_spill] sm:$0xff] %v4870_v26  ;;  %v4872_v19 = vld [vmem:[#allocation10 + $0x1e8] ss:$16 sps:$4 sm:$0xff]  }
  0xdb   :  { %1090 = vmatprep.subr.bf16.mxu0 %v4852_v0  ;;  %6334 = vst [vmem:[#allocation69_spill] sm:$0xff] %v4872_v19  ;;  %v247_v0 = vlaneseq }
  0xdc   :  { %1130 = vmatpush1.bf16.msra.mxu1 %v4848_v16  ;;  %v277_v16 = vld [vmem:[%s6028_s2] sm:$0x7] }
  0xdd   :  { %1131 = vmatprep.subr.bf16.mxu1 %v4854_v12  ;;  %v6335_v12 = vmov 0.0  }
  0xde   :  { %1091 = vmatpush1.bf16.msra.mxu0 %v4858_v14  ;;  %v4880_v14 = vshrl.u32 %v247_v0, 7 }
  0xdf   :  { %1092 = vmatprep.subr.bf16.mxu0 %v4864_v11 }
  0xe0   :  { %1132 = vmatpush1.bf16.msra.mxu1 %v4860_v6  ;;  %6336 = vst [vmem:[#allocation70_spill] sm:$0xff] %v4880_v14  ;;  %v6125_v6 = vsub.s32 0, %v4880_v14  ;;  %v6130_v11 = vsub.s32 1, %v4880_v14  ;;  %v6135_v1 = vsub.s32 2, %v4880_v14 }
  0xe1   :  { %1133 = vmatprep.subr.bf16.mxu1 %v4866_v4 }
  0xe2   :  { %1093 = vmatpush1.bf16.msra.mxu0 %v4870_v26  ;;  %v282_v26 = vrot.slane %v277_v16, %v6125_v6  ;;  %v4898_v62 = vrot.slane %v277_v16, %v6135_v1 }
  0xe3   :  { %1168 = vmatprep.subr.bf16.mxu0 %v4584_v5  ;;  %v286_v5 = vrot.slane %v277_v16, %v6130_v11 }
  0xe4   :  { %1134 = vmatpush1.bf16.msra.mxu1 %v4872_v19 }
  0xe5   :  { %3442 = vmatprep.subr.bf16.mxu1 %v6335_v12 }
 0x158   :  { %v379_v4 = vpop.f32.mrb[0].mxu0 }
 0x159   :  { %v381_v19 = vpop.f32.mrb[1].mxu0 }
 0x15a   :  { %v383_v3 = vpop.f32.mrb[2].mxu0  ;;  %v3416_v11 = vpop.f32.mrb[0].mxu1  ;;  %v382_v56 = vadd.f32 %v381_v19, %v286_v5 }
 0x15b   :  { %v4891_v2 = vadd.f32 %v383_v3, %v282_v26  ;;  %v385_v0 = vpop.f32.mrb[3].mxu0 }
 0x15c   :  { %v4894_v63 = vadd.f32 %v385_v0, %v286_v5  ;;  %v452_v0 = vpop.f32.mrb[1].mxu1 }
 0x15d   :  { %6337 = vst [vmem:[#allocation71_spill] sm:$0xff] %v4891_v2  ;;  %v4907_v2 = vadd.f32 %v3416_v11, %v4898_v62  ;;  %v3417_v14 = vpop.f32.mrb[2].mxu1 }
 0x15e   :  { %6338 = vst [vmem:[#allocation72_spill] sm:$0xff] %v4894_v63  ;;  %v4912_v16 = vadd.f32 %v3417_v14, %v4898_v62 }
 0x15f   :  { %6342 = vst [vmem:[#allocation76_spill] sm:$0xff] %v4907_v2 }
 0x160   :  { %v389_v61 = vpop.f32.mrb[4].mxu0  ;;  %6344 = vst [vmem:[#allocation78_spill] sm:$0xff] %v4912_v16 }
 0x161   :  { %v4900_v60 = vadd.f32 %v389_v61, %v282_v26  ;;  %v391_v6 = vpop.f32.mrb[5].mxu0  ;;  %v455_v61 = vpop.f32.mrb[3].mxu1 }
 0x162   :  { %v4902_v59 = vadd.f32 %v391_v6, %v286_v5  ;;  %v393_v58 = vpop.f32.mrb[6].mxu0  ;;  %v4915_v1 = vadd.f32 %v455_v61, %v4898_v62  ;;  %v3420_v11 = vpop.f32.mrb[4].mxu1 }
 0x163   :  { %6339 = vst [vmem:[#allocation73_spill] sm:$0xff] %v4900_v60  ;;  %v4904_v57 = vadd.f32 %v393_v58, %v282_v26  ;;  %v395_v3 = vpop.f32.mrb[7].mxu0  ;;  %v468_v14 = vpop.f32.mrb[5].mxu1 }
 0x164   :  { %6340 = vst [vmem:[#allocation74_spill] sm:$0xff] %v4902_v59  ;;  %v4909_v63 = vadd.f32 %v395_v3, %v286_v5  ;;  %6345 = vst [vmem:[#allocation79_spill] sm:$0xff] %v4915_v1  ;;  %v4929_v61 = vadd.f32 %v468_v14, %v4898_v62  ;;  %v3421_v1 = vpop.f32.mrb[6].mxu1 }
 0x165   :  { %6341 = vst [vmem:[#allocation75_spill] sm:$0xff] %v4904_v57 }
 0x166   :  { %6343 = vst [vmem:[#allocation77_spill] sm:$0xff] %v4909_v63  ;;  %v4924_v63 = vadd.f32 %v3420_v11, %v4898_v62  ;;  %6351 = vst [vmem:[#allocation85_spill] sm:$0xff] %v4929_v61  ;;  %v380_v61 = vadd.f32 %v379_v4, %v282_v26  ;;  %v4948_v4 = vld [vmem:[%s6030_s4] ss:$0 sm:$0xff] }
 0x168   :  { %v399_v6 = vpop.f32.mrb[8].mxu0  ;;  %6349 = vst [vmem:[#allocation83_spill] sm:$0xff] %v4924_v63 }
 0x169   :  { %v4917_v59 = vadd.f32 %v399_v6, %v282_v26  ;;  %v401_v58 = vpop.f32.mrb[9].mxu0  ;;  %v4932_v6 = vadd.f32 %v3421_v1, %v4898_v62 }
 0x16a   :  { %v4919_v57 = vadd.f32 %v401_v58, %v286_v5  ;;  %v403_v60 = vpop.f32.mrb[10].mxu0  ;;  %v471_v58 = vpop.f32.mrb[7].mxu1 }
 0x16b   :  { %6346 = vst [vmem:[#allocation80_spill] sm:$0xff] %v4917_v59  ;;  %v4921_v2 = vadd.f32 %v403_v60, %v282_v26  ;;  %v405_v3 = vpop.f32.mrb[11].mxu0  ;;  %6352 = vst [vmem:[#allocation86_spill] sm:$0xff] %v4932_v6 }
 0x16c   :  { %6347 = vst [vmem:[#allocation81_spill] sm:$0xff] %v4919_v57  ;;  %v4926_v16 = vadd.f32 %v405_v3, %v286_v5  ;;  %v4935_v57 = vadd.f32 %v471_v58, %v4898_v62 }
 0x16d   :  { %6348 = vst [vmem:[#allocation82_spill] sm:$0xff] %v4921_v2 }
 0x16e   :  { %6350 = vst [vmem:[#allocation84_spill] sm:$0xff] %v4926_v16  ;;  %6353 = vst [vmem:[#allocation87_spill] sm:$0xff] %v4935_v57 }
 0x170   :  { %v409_v60 = vpop.f32.mrb[12].mxu0 }
 0x171   :  { %v4937_v2 = vadd.f32 %v409_v60, %v282_v26  ;;  %v411_v59 = vpop.f32.mrb[13].mxu0 }
 0x172   :  { %v4939_v11 = vadd.f32 %v411_v59, %v286_v5  ;;  %v413_v63 = vpop.f32.mrb[14].mxu0 }
 0x173   :  { %6354 = vst [vmem:[#allocation88_spill] sm:$0xff] %v4937_v2  ;;  %v4941_v3 = vadd.f32 %v413_v63, %v282_v26  ;;  %v415_v16 = vpop.f32.mrb[15].mxu0 }
 0x174   :  { %6355 = vst [vmem:[#allocation89_spill] sm:$0xff] %v4939_v11  ;;  %v4943_v14 = vadd.f32 %v415_v16, %v286_v5 }
 0x175   :  { %6356 = vst [vmem:[#allocation90_spill] sm:$0xff] %v4941_v3 }
 0x176   :  { %6357 = vst [vmem:[#allocation91_spill] sm:$0xff] %v4943_v14  ;;  %v6401_v14 = vld [vmem:[#allocation64_spill] sm:$0xff] }
 0x178   :  { %v672_v1 = vpop.f32.mrb[16].mxu0 }
 0x179   :  { %v719_v6 = vadd.f32 %v672_v1, %v380_v61  ;;  %v674_v55 = vpop.f32.mrb[17].mxu0  ;;  %v6383_v1 = vld [vmem:[#allocation46_spill] sm:$0xff] }
 0x17a   :  { %v720_v54 = vadd.f32 %v674_v55, %v382_v56  ;;  %v676_v58 = vpop.f32.mrb[18].mxu0  ;;  %v713_v2 = vpop.f32.mrb[8].mxu1 }
 0x17b   :  { %v3181_v57 = vmul.f32 -1.442695, %v719_v6  ;;  %v677_v53 = vpop.f32.mrb[19].mxu0  ;;  %v3440_v59 = vpop.f32.mrb[9].mxu1  ;;  %v733_v56 = vadd.f32 %v4948_v4, %v713_v2  ;;  %v6381_v2 = vld [vmem:[#allocation44_spill] sm:$0xff]  ;;  %v6384_v58 = vld [vmem:[#allocation47_spill] sm:$0xff] }
 0x17c   :  { %v3182_v60 = vmul.f32 -1.442695, %v720_v54  ;;  %v716_v11 = vpop.f32.mrb[10].mxu1  ;;  %v453_v54 = vadd.f32 %v452_v0, %v4898_v62  ;;  %v6358_v62 = vmov 0   ;;  %v6382_v0 = vld [vmem:[#allocation45_spill] sm:$0xff] }
 0x17d   :  { %3823 = vpow2.f32 %v3181_v57  ;;  %v3441_v63 = vpop.f32.mrb[11].mxu1  ;;  %v6386_v59 = vld [vmem:[#allocation49_spill] sm:$0xff] }
 0x17e   :  { %3825 = vpow2.f32 %v3182_v60  ;;  %v6385_v60 = vld [vmem:[#allocation48_spill] sm:$0xff]  ;;  %v6387_v63 = vld [vmem:[#allocation50_spill] sm:$0xff] }
 0x187   :  { %v3824_v3 = vpop.eup %3823 }
 0x188   :  { %v727_v52 = vadd.f32 1.0, %v3824_v3  ;;  %v3826_v16 = vpop.eup %3825 }
 0x189   :  { %v728_v55 = vadd.f32 1.0, %v3826_v16  ;;  %v6388_v16 = vld [vmem:[#allocation51_spill] sm:$0xff] }
 0x18a   :  { %3827 = vrcp.f32 %v727_v52 }
 0x18b   :  { %3829 = vrcp.f32 %v728_v55  ;;  %v6389_v55 = vld [vmem:[#allocation52_spill] sm:$0xff] }
 0x194   :  { %v3828_v53 = vpop.eup %3827 }
 0x195   :  { %v734_v57 = vmul.f32 %v3828_v53, %v733_v56  ;;  %v3830_v26 = vpop.eup %3829  ;;  %v6390_v56 = vld [vmem:[#allocation53_spill] sm:$0xff]  ;;  %v6391_v53 = vld [vmem:[#allocation54_spill] sm:$0xff] }
 0x196   :  { %v737_v5 = vsub.f32 1.0, %v3830_v26  ;;  %v739_v6 = vmul.f32 0.0, %v3830_v26  ;;  %v6395_v26 = vld [vmem:[#allocation58_spill] sm:$0xff] }
 0x197   :  { %v735_v19 = vadd.f32 %v734_v57, %v453_v54  ;;  %v6392_v54 = vld [vmem:[#allocation55_spill] sm:$0xff]  ;;  %v6393_v57 = vld [vmem:[#allocation56_spill] sm:$0xff] }
 0x199   :  { %3831 = vtanh.f32 %v735_v19  ;;  %v6394_v19 = vld [vmem:[#allocation57_spill] sm:$0xff] }
 0x1a3   :  { %v3832_v61 = vpop.eup %3831 }
 0x1a4   :  { %v738_v52 = vmul.f32 %v3832_v61, %v737_v5  ;;  %v6396_v5 = vld [vmem:[#allocation59_spill] sm:$0xff]  ;;  %v6397_v61 = vld [vmem:[#allocation60_spill] sm:$0xff] }
 0x1a6   :  { %v4952_v11 = vadd.f32 %v739_v6, %v738_v52  ;;  %v6398_v52 = vld [vmem:[#allocation61_spill] sm:$0xff]  ;;  %v6399_v6 = vld [vmem:[#allocation62_spill] sm:$0xff] }
 0x1a8   :  { %v741_v3 = vpack.c.bf16 %v4952_v11, %v4952_v11 }
 0x1aa   :  { %1095 = vmatmul.mubr.bf16.vlgmr.msra.gmra.mrb[20].mxu0 %v741_v3  ;;  %1136 = vmatmul.mubr.bf16.vlgmr.msra.gmra.mrb[12].mxu1 %v741_v3 }
 0x1ab   :  { %1169 = vmatpush1.bf16.msra.mxu0 %v4589_v7  ;;  %3443 = vmatpush3.bf16.msra.mxu1 %v4612_v17  ;;  %v6359_v7 = vld [vmem:[#allocation22_spill] sm:$0xff]  ;;  %v6365_v17 = vld [vmem:[#allocation28_spill] sm:$0xff] }
 0x1ac   :  { %1170 = vmatprep.subr.bf16.mxu0 %v4592_v8  ;;  %3444 = vmatprep.subr.bf16.mxu1 %v6335_v12  ;;  %v6360_v8 = vld [vmem:[#allocation23_spill] sm:$0xff] }
 0x1ad   :  { %1200 = vmatprep.mubr.bf16.mxu0 %v6358_v62  ;;  %3458 = vmatprep.mubr.msk.bf16.mxu1 %vm4396_vm2, %v6335_v12 }
 0x1af   :  { %1171 = vmatpush1.bf16.msra.mxu0 %v4596_v9  ;;  %3445 = vmatpush3.bf16.msra.mxu1 %v4623_v21  ;;  %v6361_v9 = vld [vmem:[#allocation24_spill] sm:$0xff]  ;;  %v6368_v21 = vld [vmem:[#allocation31_spill] sm:$0xff] }
 0x1b0   :  { %1172 = vmatprep.subr.bf16.mxu0 %v4600_v10  ;;  %3446 = vmatprep.subr.bf16.mxu1 %v6335_v12  ;;  %v6362_v10 = vld [vmem:[#allocation25_spill] sm:$0xff] }
 0x1b3   :  { %1173 = vmatpush1.bf16.msra.mxu0 %v4602_v13  ;;  %3447 = vmatpush3.bf16.msra.mxu1 %v4636_v25  ;;  %v6363_v13 = vld [vmem:[#allocation26_spill] sm:$0xff]  ;;  %v6372_v25 = vld [vmem:[#allocation35_spill] sm:$0xff] }
 0x1b4   :  { %1174 = vmatprep.subr.bf16.mxu0 %v4608_v15  ;;  %3448 = vmatprep.subr.bf16.mxu1 %v6335_v12  ;;  %v6364_v15 = vld [vmem:[#allocation27_spill] sm:$0xff] }
 0x1b7   :  { %1175 = vmatpush1.bf16.msra.mxu0 %v4615_v18  ;;  %3449 = vmatpush3.bf16.msra.mxu1 %v4644_v28  ;;  %v6366_v18 = vld [vmem:[#allocation29_spill] sm:$0xff] }
 0x1b8   :  { %1176 = vmatprep.subr.bf16.mxu0 %v4619_v20  ;;  %3450 = vmatprep.subr.bf16.mxu1 %v6335_v12  ;;  %v6367_v20 = vld [vmem:[#allocation30_spill] sm:$0xff]  ;;  %v6374_v28 = vld [vmem:[#allocation37_spill] sm:$0xff] }
 0x1bb   :  { %1177 = vmatpush1.bf16.msra.mxu0 %v4628_v22  ;;  %3451 = vmatpush3.bf16.msra.mxu1 %v4657_v31  ;;  %v6369_v22 = vld [vmem:[#allocation32_spill] sm:$0xff] }
 0x1bc   :  { %1178 = vmatprep.subr.bf16.mxu0 %v4631_v23  ;;  %3452 = vmatprep.subr.bf16.mxu1 %v6335_v12  ;;  %v6370_v23 = vld [vmem:[#allocation33_spill] sm:$0xff]  ;;  %v6377_v31 = vld [vmem:[#allocation40_spill] sm:$0xff] }
 0x1bf   :  { %1179 = vmatpush1.bf16.msra.mxu0 %v4633_v24  ;;  %3453 = vmatpush3.bf16.msra.mxu1 %v4667_v33  ;;  %v6371_v24 = vld [vmem:[#allocation34_spill] sm:$0xff] }
 0x1c0   :  { %1180 = vmatprep.subr.bf16.mxu0 %v4639_v27  ;;  %3454 = vmatprep.subr.bf16.mxu1 %v6335_v12  ;;  %v6373_v27 = vld [vmem:[#allocation36_spill] sm:$0xff]  ;;  %v6379_v33 = vld [vmem:[#allocation42_spill] sm:$0xff] }
 0x1c3   :  { %1181 = vmatpush1.bf16.msra.mxu0 %v4648_v29  ;;  %3455 = vmatpush3.bf16.msra.mxu1 %v4673_v34  ;;  %v6375_v29 = vld [vmem:[#allocation38_spill] sm:$0xff]  ;;  %v6380_v34 = vld [vmem:[#allocation43_spill] sm:$0xff] }
 0x1c4   :  { %1182 = vmatprep.subr.bf16.mxu0 %v4653_v30  ;;  %3456 = vmatprep.subr.bf16.mxu1 %v6335_v12  ;;  %v6376_v30 = vld [vmem:[#allocation39_spill] sm:$0xff] }
 0x1c7   :  { %1183 = vmatpush1.bf16.msra.mxu0 %v4660_v32  ;;  %3457 = vmatpush3.bf16.msra.mxu1 %v4678_v35  ;;  %v6378_v32 = vld [vmem:[#allocation41_spill] sm:$0xff] }
 0x1c8   :  { %1272 = vmatprep.subr.bf16.mxu0 %v4686_v36  ;;  %1313 = vmatprep.subr.bf16.mxu1 %v4688_v37 }
 0x1ca   :  { %1201 = vmatmul.mubr.bf16.vlgmr.msra.gmra.mrb[24].mxu0 %v741_v3  ;;  %3459 = vmatmul.mubr.bf16.vlgmr.msra.gmra.mrb[16].mxu1 %v741_v3  ;;  %v6400_v3 = vld [vmem:[#allocation63_spill] sm:$0xff] }
 0x1cb   :  { %1273 = vmatpush1.bf16.msra.mxu0 %v4690_v38  ;;  %1314 = vmatpush1.bf16.msra.mxu1 %v4692_v39 }
 0x1cc   :  { %1274 = vmatprep.subr.bf16.mxu0 %v4698_v40  ;;  %1315 = vmatprep.subr.bf16.mxu1 %v4700_v41 }
 0x1cf   :  { %1275 = vmatpush1.bf16.msra.mxu0 %v4702_v42  ;;  %1316 = vmatpush1.bf16.msra.mxu1 %v4704_v43 }
 0x1d0   :  { %1276 = vmatprep.subr.bf16.mxu0 %v4710_v44  ;;  %1317 = vmatprep.subr.bf16.mxu1 %v4712_v45 }
 0x1d3   :  { %1277 = vmatpush1.bf16.msra.mxu0 %v4714_v46  ;;  %1318 = vmatpush1.bf16.msra.mxu1 %v4716_v47 }
 0x1d4   :  { %1278 = vmatprep.subr.bf16.mxu0 %v4722_v48  ;;  %1319 = vmatprep.subr.bf16.mxu1 %v4724_v49 }
 0x1d7   :  { %1279 = vmatpush1.bf16.msra.mxu0 %v4726_v50  ;;  %1320 = vmatpush1.bf16.msra.mxu1 %v4728_v51 }
 0x1d8   :  { %1280 = vmatprep.subr.bf16.mxu0 %v6359_v7  ;;  %1321 = vmatprep.subr.bf16.mxu1 %v6360_v8 }
 0x1db   :  { %1281 = vmatpush1.bf16.msra.mxu0 %v6361_v9  ;;  %1322 = vmatpush1.bf16.msra.mxu1 %v6362_v10 }
 0x1dc   :  { %1282 = vmatprep.subr.bf16.mxu0 %v6363_v13  ;;  %1323 = vmatprep.subr.bf16.mxu1 %v6364_v15 }
 0x1df   :  { %1283 = vmatpush1.bf16.msra.mxu0 %v6365_v17  ;;  %1324 = vmatpush1.bf16.msra.mxu1 %v6366_v18 }
 0x1e0   :  { %1284 = vmatprep.subr.bf16.mxu0 %v6367_v20  ;;  %1325 = vmatprep.subr.bf16.mxu1 %v6368_v21 }
 0x1e3   :  { %1285 = vmatpush1.bf16.msra.mxu0 %v6369_v22  ;;  %1326 = vmatpush1.bf16.msra.mxu1 %v6370_v23 }
 0x1e4   :  { %1286 = vmatprep.subr.bf16.mxu0 %v6371_v24  ;;  %1327 = vmatprep.subr.bf16.mxu1 %v6372_v25 }
 0x1e7   :  { %1287 = vmatpush1.bf16.msra.mxu0 %v6373_v27  ;;  %1328 = vmatpush1.bf16.msra.mxu1 %v6374_v28 }
 0x1e8   :  { %1288 = vmatprep.subr.bf16.mxu0 %v6375_v29  ;;  %1329 = vmatprep.subr.bf16.mxu1 %v6376_v30 }
 0x1eb   :  { %1289 = vmatpush1.bf16.msra.mxu0 %v6377_v31  ;;  %1330 = vmatpush1.bf16.msra.mxu1 %v6378_v32 }
 0x1ec   :  { %1290 = vmatprep.subr.bf16.mxu0 %v6379_v33  ;;  %1331 = vmatprep.subr.bf16.mxu1 %v6380_v34 }
 0x1ef   :  { %1291 = vmatpush1.bf16.msra.mxu0 %v6381_v2  ;;  %1332 = vmatpush1.bf16.msra.mxu1 %v6382_v0 }
 0x1f0   :  { %1292 = vmatprep.subr.bf16.mxu0 %v6383_v1  ;;  %1333 = vmatprep.subr.bf16.mxu1 %v6384_v58 }
 0x1f3   :  { %1293 = vmatpush1.bf16.msra.mxu0 %v6385_v60  ;;  %1334 = vmatpush1.bf16.msra.mxu1 %v6386_v59 }
 0x1f4   :  { %1294 = vmatprep.subr.bf16.mxu0 %v6387_v63  ;;  %1335 = vmatprep.subr.bf16.mxu1 %v6388_v16 }
 0x1f7   :  { %1295 = vmatpush1.bf16.msra.mxu0 %v6389_v55  ;;  %1336 = vmatpush1.bf16.msra.mxu1 %v6390_v56 }
 0x1f8   :  { %1296 = vmatprep.subr.bf16.mxu0 %v6391_v53  ;;  %1337 = vmatprep.subr.bf16.mxu1 %v6392_v54  ;;  %v6402_v53 = vld [vmem:[#allocation65_spill] sm:$0xff]  ;;  %v6403_v54 = vld [vmem:[#allocation66_spill] sm:$0xff] }
 0x1fb   :  { %1297 = vmatpush1.bf16.msra.mxu0 %v6393_v57  ;;  %1338 = vmatpush1.bf16.msra.mxu1 %v6394_v19  ;;  %v6404_v57 = vld [vmem:[#allocation67_spill] sm:$0xff]  ;;  %v6405_v19 = vld [vmem:[#allocation68_spill] sm:$0xff] }
 0x1fc   :  { %1298 = vmatprep.subr.bf16.mxu0 %v6395_v26  ;;  %1339 = vmatprep.subr.bf16.mxu1 %v6396_v5  ;;  %v6406_v26 = vld [vmem:[#allocation69_spill] sm:$0xff] }
 0x1fd   :  { %v5053_v5 = vld [vmem:[#allocation9 + $0x4] ss:$12 sps:$4 sm:$0xff]  }
 0x1fe   :  { %6407 = vst [vmem:[#allocation22_spill] sm:$0xff] %v5053_v5 }
 0x1ff   :  { %1299 = vmatpush1.bf16.msra.mxu0 %v6397_v61  ;;  %1340 = vmatpush1.bf16.msra.mxu1 %v6398_v52 }
 0x200   :  { %1300 = vmatprep.subr.bf16.mxu0 %v6399_v6  ;;  %1341 = vmatprep.subr.bf16.mxu1 %v6400_v3  ;;  %v6408_v3 = vld [vmem:[#allocation70_spill] sm:$0xff] }
 0x203   :  { %1301 = vmatpush1.bf16.msra.mxu0 %v6401_v14  ;;  %1342 = vmatpush1.bf16.msra.mxu1 %v6402_v53  ;;  %v245_v14 = vld [vmem:[%s6032_s6] sm:$0xf]  ;;  %v6409_v53 = vsub.s32 0, %v6408_v3 }
 0x204   :  { %1302 = vmatprep.subr.bf16.mxu0 %v6403_v54  ;;  %1343 = vmatprep.subr.bf16.mxu1 %v6404_v57 }
 0x205   :  { %v5062_v6 = vrot.slane %v245_v14, %v6409_v53 }
 0x207   :  { %1303 = vmatpush1.bf16.msra.mxu0 %v6405_v19  ;;  %1344 = vmatpush1.bf16.msra.mxu1 %v6406_v26  ;;  %6410 = vst [vmem:[#allocation23_spill] sm:$0xff] %v5062_v6  ;;  %v6411_v19 = vsub.s32 1, %v6408_v3 }
 0x208   :  { %1381 = vmatprep.subr.bf16.mxu0 %v5053_v5  ;;  %3462 = vmatprep.subr.bf16.mxu1 %v6335_v12 }
 0x209   :  { %v5066_v52 = vrot.slane %v245_v14, %v6411_v19  ;;  %v261_v19 = vsub.s32 3, %v6408_v3 }
 0x20b   :  { %6412 = vst [vmem:[#allocation24_spill] sm:$0xff] %v5066_v52  ;;  %v5071_v2 = vrot.slane %v245_v14, %v261_v19 }
 0x20d   :  { %6413 = vst [vmem:[#allocation25_spill] sm:$0xff] %v5071_v2 }
 0x27d   :  { %v1096_v54 = vpop.f32.mrb[20].mxu0  ;;  %v1137_v57 = vpop.f32.mrb[12].mxu1 }
 0x27e   :  { %v1097_v26 = vadd.f32 %v1096_v54, %v5062_v6  ;;  %v1098_v61 = vpop.f32.mrb[21].mxu0  ;;  %v1139_v5 = vpop.f32.mrb[13].mxu1  ;;  %v6414_v54 = vsub.s32 2, %v6408_v3  ;;  %v6416_v6 = vld [vmem:[#allocation72_spill] sm:$0xff] }
 0x27f   :  { %v1100_v56 = vpop.f32.mrb[22].mxu0  ;;  %v1141_v55 = vpop.f32.mrb[14].mxu1  ;;  %v1099_v60 = vadd.f32 %v1098_v61, %v5066_v52  ;;  %v6415_v61 = vld [vmem:[#allocation71_spill] sm:$0xff] }
 0x280   :  { %v3247_v16 = vmul.f32 -1.442695, %v1097_v26  ;;  %v1101_v63 = vpop.f32.mrb[23].mxu0  ;;  %v1142_v59 = vpop.f32.mrb[15].mxu1  ;;  %v5075_v56 = vrot.slane %v245_v14, %v6414_v54 }
 0x281   :  { %v3248_v53 = vmul.f32 -1.442695, %v1099_v60  ;;  %v1140_v59 = vadd.f32 %v1139_v5, %v5071_v2 }
 0x282   :  { %3833 = vpow2.f32 %v3247_v16  ;;  %v1138_v16 = vadd.f32 %v1137_v57, %v5075_v56 }
 0x283   :  { %3835 = vpow2.f32 %v3248_v53 }
 0x28c   :  { %v3834_v58 = vpop.eup %3833 }
 0x28d   :  { %v1150_v1 = vadd.f32 1.0, %v3834_v58  ;;  %v3836_v0 = vpop.eup %3835 }
 0x28e   :  { %v1151_v55 = vadd.f32 1.0, %v3836_v0 }
 0x28f   :  { %3837 = vrcp.f32 %v1150_v1 }
 0x290   :  { %3839 = vrcp.f32 %v1151_v55 }
 0x299   :  { %v3838_v63 = vpop.eup %3837 }
 0x29a   :  { %v1156_v60 = vmul.f32 %v3838_v63, %v1140_v59  ;;  %v3840_v2 = vpop.eup %3839 }
 0x29b   :  { %v1159_v55 = vsub.f32 1.0, %v3840_v2 }
 0x29c   :  { %v1157_v26 = vadd.f32 %v1156_v60, %v1138_v16  ;;  %v1161_v16 = vmul.f32 0.0, %v3840_v2 }
 0x29d   :  { %v1202_v58 = vpop.f32.mrb[24].mxu0  ;;  %v1243_v1 = vpop.f32.mrb[16].mxu1 }
 0x29e   :  { %3841 = vtanh.f32 %v1157_v26  ;;  %v1249_v53 = vadd.f32 %v1202_v58, %v6415_v61  ;;  %v1204_v19 = vpop.f32.mrb[25].mxu0  ;;  %v3460_v52 = vpop.f32.mrb[17].mxu1  ;;  %v1263_v61 = vadd.f32 %v4948_v4, %v1243_v1  ;;  %v5092_v1 = vld [vmem:[#allocation9] ss:$12 sps:$4 sm:$0xff]  }
 0x29f   :  { %v1250_v3 = vadd.f32 %v1204_v19, %v6416_v6  ;;  %v1206_v14 = vpop.f32.mrb[26].mxu0  ;;  %v1246_v54 = vpop.f32.mrb[18].mxu1 }
 0x2a0   :  { %v3249_v0 = vmul.f32 -1.442695, %v1249_v53  ;;  %v1207_v34 = vpop.f32.mrb[27].mxu0  ;;  %v3461_v5 = vpop.f32.mrb[19].mxu1 }
 0x2a1   :  { %v3250_v57 = vmul.f32 -1.442695, %v1250_v3  ;;  %v6417_v3 = vld [vmem:[#allocation79_spill] sm:$0xff] }
 0x2a2   :  { %3843 = vpow2.f32 %v3249_v0 }
 0x2a3   :  { %3845 = vpow2.f32 %v3250_v57 }
 0x2a8   :  { %v3842_v59 = vpop.eup %3841 }
 0x2a9   :  { %v1160_v63 = vmul.f32 %v3842_v59, %v1159_v55 }
 0x2ab   :  { %v5081_v60 = vadd.f32 %v1161_v16, %v1160_v63  ;;  %v5095_v63 = vld [vmem:[#allocation9 + $0x8] ss:$12 sps:$4 sm:$0xff]  }
 0x2ac   :  { %v3844_v26 = vpop.eup %3843  ;;  %v5098_v16 = vld [vmem:[#allocation9 + $0x1c] ss:$12 sps:$4 sm:$0xff]  }
 0x2ad   :  { %v1257_v58 = vadd.f32 1.0, %v3844_v26  ;;  %v1163_v52 = vpack.c.bf16 %v5081_v60, %v5081_v60  ;;  %v3846_v34 = vpop.eup %3845  ;;  %v5108_v26 = vld [vmem:[#allocation9 + $0x20] ss:$12 sps:$4 sm:$0xff]  }
 0x2ae   :  { %v1258_v6 = vadd.f32 1.0, %v3846_v34  ;;  %v5118_v34 = vld [vmem:[#allocation9 + $0x38] ss:$12 sps:$4 sm:$0xff]  }
 0x2af   :  { %3847 = vrcp.f32 %v1257_v58  ;;  %1164 = vst [vmem:[#allocation3] sm:$0xf] %v1163_v52  ;;  %1304 = vmatprep.mubr.bf16.mxu0 %v1163_v52  ;;  %1345 = vmatprep.mubr.bf16.mxu1 %v1163_v52  ;;  %v5111_v58 = vld [vmem:[#allocation9 + $0x34] ss:$12 sps:$4 sm:$0xff]   ;;  %v5115_v52 = vld [vmem:[#allocation9 + $0x30] ss:$12 sps:$4 sm:$0xff]  }
 0x2b0   :  { %3849 = vrcp.f32 %v1258_v6  ;;  %v5121_v6 = vld [vmem:[#allocation9 + $0x4c] ss:$12 sps:$4 sm:$0xff]  }
 0x2b9   :  { %v3848_v53 = vpop.eup %3847 }
 0x2ba   :  { %v1264_v19 = vmul.f32 %v3848_v53, %v1263_v61  ;;  %v3850_v14 = vpop.eup %3849  ;;  %v5125_v61 = vld [vmem:[#allocation9 + $0x48] ss:$12 sps:$4 sm:$0xff]   ;;  %v5128_v53 = vld [vmem:[#allocation9 + $0x50] ss:$12 sps:$4 sm:$0xff]  }
 0x2bb   :  { %v1267_v54 = vsub.f32 1.0, %v3850_v14  ;;  %v1269_v57 = vmul.f32 %v3850_v14, %v4952_v11  ;;  %v5105_v11 = vld [vmem:[#allocation9 + $0x18] ss:$12 sps:$4 sm:$0xff]   ;;  %v5141_v14 = vld [vmem:[#allocation9 + $0x7c] ss:$12 sps:$4 sm:$0xff]  }
 0x2bc   :  { %v1265_v2 = vadd.f32 %v1264_v19, %v6417_v3  ;;  %v5131_v19 = vld [vmem:[#allocation9 + $0x64] ss:$12 sps:$4 sm:$0xff]   ;;  %v5135_v3 = vld [vmem:[#allocation9 + $0x60] ss:$12 sps:$4 sm:$0xff]   ;;  %6419 = vst [vmem:[#allocation27_spill] sm:$0xff] %v5141_v14 }
 0x2be   :  { %3851 = vtanh.f32 %v1265_v2  ;;  %v5138_v2 = vld [vmem:[#allocation9 + $0x68] ss:$12 sps:$4 sm:$0xff]  }
 0x2bf   :  { %6418 = vst [vmem:[#allocation26_spill] sm:$0xff] %v5138_v2 }
 0x2c8   :  { %v3852_v0 = vpop.eup %3851 }
 0x2c9   :  { %v1268_v5 = vmul.f32 %v3852_v0, %v1267_v54  ;;  %v5145_v54 = vld [vmem:[#allocation9 + $0x78] ss:$12 sps:$4 sm:$0xff]   ;;  %v5148_v0 = vld [vmem:[#allocation9 + $0x80] ss:$12 sps:$4 sm:$0xff]  }
 0x2ca   :  { %6420 = vst [vmem:[#allocation28_spill] sm:$0xff] %v5148_v0 }
 0x2cb   :  { %v5088_v55 = vadd.f32 %v1269_v57, %v1268_v5  ;;  %v5151_v5 = vld [vmem:[#allocation9 + $0x94] ss:$12 sps:$4 sm:$0xff]   ;;  %v5155_v57 = vld [vmem:[#allocation9 + $0x90] ss:$12 sps:$4 sm:$0xff]  }
 0x2cd   :  { %v1271_v59 = vpack.c.bf16 %v5088_v55, %v5088_v55 }
 0x2cf   :  { %1305 = vmatmul.mubr.bf16.vlgmr.msra.gmra.mrb[28].mxu0 %v1271_v59  ;;  %1346 = vmatmul.mubr.bf16.vlgmr.msra.gmra.mrb[20].mxu1 %v1271_v59 }
 0x2d0   :  { %1382 = vmatpush1.bf16.msra.mxu0 %v5092_v1  ;;  %3463 = vmatpush3.bf16.msra.mxu1 %v5095_v63 }
 0x2d1   :  { %1383 = vmatprep.subr.bf16.mxu0 %v5098_v16  ;;  %3464 = vmatprep.subr.bf16.mxu1 %v6335_v12 }
 0x2d2   :  { %1413 = vmatprep.mubr.bf16.mxu0 %v6358_v62  ;;  %3478 = vmatprep.mubr.msk.bf16.mxu1 %vm4396_vm2, %v6335_v12 }
 0x2d4   :  { %1384 = vmatpush1.bf16.msra.mxu0 %v5105_v11  ;;  %3465 = vmatpush3.bf16.msra.mxu1 %v5108_v26 }
 0x2d5   :  { %1385 = vmatprep.subr.bf16.mxu0 %v5111_v58  ;;  %3466 = vmatprep.subr.bf16.mxu1 %v6335_v12 }
 0x2d8   :  { %1386 = vmatpush1.bf16.msra.mxu0 %v5115_v52  ;;  %3467 = vmatpush3.bf16.msra.mxu1 %v5118_v34 }
 0x2d9   :  { %1387 = vmatprep.subr.bf16.mxu0 %v5121_v6  ;;  %3468 = vmatprep.subr.bf16.mxu1 %v6335_v12 }
 0x2dc   :  { %1388 = vmatpush1.bf16.msra.mxu0 %v5125_v61  ;;  %3469 = vmatpush3.bf16.msra.mxu1 %v5128_v53 }
 0x2dd   :  { %1389 = vmatprep.subr.bf16.mxu0 %v5131_v19  ;;  %3470 = vmatprep.subr.bf16.mxu1 %v6335_v12 }
 0x2e0   :  { %1390 = vmatpush1.bf16.msra.mxu0 %v5135_v3  ;;  %3471 = vmatpush3.bf16.msra.mxu1 %v5138_v2  ;;  %v5161_v2 = vld [vmem:[#allocation9 + $0xac] ss:$12 sps:$4 sm:$0xff]  }
 0x2e1   :  { %1391 = vmatprep.subr.bf16.mxu0 %v5141_v14  ;;  %3472 = vmatprep.subr.bf16.mxu1 %v6335_v12  ;;  %v5158_v14 = vld [vmem:[#allocation9 + $0x98] ss:$12 sps:$4 sm:$0xff]  }
 0x2e4   :  { %1392 = vmatpush1.bf16.msra.mxu0 %v5145_v54  ;;  %3473 = vmatpush3.bf16.msra.mxu1 %v5148_v0  ;;  %v5165_v0 = vld [vmem:[#allocation9 + $0xa8] ss:$12 sps:$4 sm:$0xff]  }
 0x2e5   :  { %1393 = vmatprep.subr.bf16.mxu0 %v5151_v5  ;;  %3474 = vmatprep.subr.bf16.mxu1 %v6335_v12 }
 0x2e8   :  { %1394 = vmatpush1.bf16.msra.mxu0 %v5155_v57  ;;  %3475 = vmatpush3.bf16.msra.mxu1 %v5158_v14 }
 0x2e9   :  { %1395 = vmatprep.subr.bf16.mxu0 %v5161_v2  ;;  %3476 = vmatprep.subr.bf16.mxu1 %v6335_v12 }
 0x2ec   :  { %1396 = vmatpush1.bf16.msra.mxu0 %v5165_v0  ;;  %3477 = vmatpush3.bf16.msra.mxu1 %v4678_v35  ;;  %v6421_v35 = vld [vmem:[#allocation43_spill] sm:$0xff] }
 0x2ed   :  { %1485 = vmatprep.subr.bf16.mxu0 %v4686_v36  ;;  %1526 = vmatprep.subr.bf16.mxu1 %v4688_v37  ;;  %v6422_v36 = vld [vmem:[#allocation44_spill] sm:$0xff]  ;;  %v6423_v37 = vld [vmem:[#allocation45_spill] sm:$0xff] }
 0x2ef   :  { %1414 = vmatmul.mubr.bf16.vlgmr.msra.gmra.mrb[32].mxu0 %v1271_v59  ;;  %3479 = vmatmul.mubr.bf16.vlgmr.msra.gmra.mrb[24].mxu1 %v1271_v59 }
 0x2f0   :  { %1486 = vmatpush1.bf16.msra.mxu0 %v4690_v38  ;;  %1527 = vmatpush1.bf16.msra.mxu1 %v4692_v39  ;;  %v6424_v38 = vld [vmem:[#allocation46_spill] sm:$0xff]  ;;  %v6425_v39 = vld [vmem:[#allocation47_spill] sm:$0xff] }
 0x2f1   :  { %1487 = vmatprep.subr.bf16.mxu0 %v4698_v40  ;;  %1528 = vmatprep.subr.bf16.mxu1 %v4700_v41  ;;  %v6426_v40 = vld [vmem:[#allocation48_spill] sm:$0xff]  ;;  %v6427_v41 = vld [vmem:[#allocation49_spill] sm:$0xff] }
 0x2f4   :  { %1488 = vmatpush1.bf16.msra.mxu0 %v4702_v42  ;;  %1529 = vmatpush1.bf16.msra.mxu1 %v4704_v43  ;;  %v6428_v42 = vld [vmem:[#allocation50_spill] sm:$0xff]  ;;  %v6429_v43 = vld [vmem:[#allocation51_spill] sm:$0xff] }
 0x2f5   :  { %1489 = vmatprep.subr.bf16.mxu0 %v4710_v44  ;;  %1530 = vmatprep.subr.bf16.mxu1 %v4712_v45  ;;  %v6430_v44 = vld [vmem:[#allocation52_spill] sm:$0xff]  ;;  %v6431_v45 = vld [vmem:[#allocation53_spill] sm:$0xff] }
 0x2f8   :  { %1490 = vmatpush1.bf16.msra.mxu0 %v4714_v46  ;;  %1531 = vmatpush1.bf16.msra.mxu1 %v4716_v47  ;;  %v6432_v46 = vld [vmem:[#allocation54_spill] sm:$0xff]  ;;  %v6433_v47 = vld [vmem:[#allocation55_spill] sm:$0xff] }
 0x2f9   :  { %1491 = vmatprep.subr.bf16.mxu0 %v4722_v48  ;;  %1532 = vmatprep.subr.bf16.mxu1 %v4724_v49  ;;  %v6434_v48 = vld [vmem:[#allocation56_spill] sm:$0xff]  ;;  %v6435_v49 = vld [vmem:[#allocation57_spill] sm:$0xff] }
 0x2fc   :  { %1492 = vmatpush1.bf16.msra.mxu0 %v4726_v50  ;;  %1533 = vmatpush1.bf16.msra.mxu1 %v4728_v51  ;;  %v6436_v50 = vld [vmem:[#allocation58_spill] sm:$0xff]  ;;  %v6437_v51 = vld [vmem:[#allocation59_spill] sm:$0xff] }
 0x2fd   :  { %1493 = vmatprep.subr.bf16.mxu0 %v6359_v7  ;;  %1534 = vmatprep.subr.bf16.mxu1 %v6360_v8  ;;  %v6438_v7 = vld [vmem:[#allocation60_spill] sm:$0xff]  ;;  %v6439_v8 = vld [vmem:[#allocation61_spill] sm:$0xff] }
 0x300   :  { %1494 = vmatpush1.bf16.msra.mxu0 %v6361_v9  ;;  %1535 = vmatpush1.bf16.msra.mxu1 %v6362_v10  ;;  %v6440_v9 = vld [vmem:[#allocation62_spill] sm:$0xff]  ;;  %v6441_v10 = vld [vmem:[#allocation63_spill] sm:$0xff] }
 0x301   :  { %1495 = vmatprep.subr.bf16.mxu0 %v6363_v13  ;;  %1536 = vmatprep.subr.bf16.mxu1 %v6364_v15  ;;  %v6442_v13 = vld [vmem:[#allocation64_spill] sm:$0xff]  ;;  %v6443_v15 = vld [vmem:[#allocation65_spill] sm:$0xff] }
 0x304   :  { %1496 = vmatpush1.bf16.msra.mxu0 %v6365_v17  ;;  %1537 = vmatpush1.bf16.msra.mxu1 %v6366_v18  ;;  %v6444_v17 = vld [vmem:[#allocation66_spill] sm:$0xff]  ;;  %v6445_v18 = vld [vmem:[#allocation67_spill] sm:$0xff] }
 0x305   :  { %1497 = vmatprep.subr.bf16.mxu0 %v6367_v20  ;;  %1538 = vmatprep.subr.bf16.mxu1 %v6368_v21  ;;  %v6446_v20 = vld [vmem:[#allocation68_spill] sm:$0xff]  ;;  %v6447_v21 = vld [vmem:[#allocation69_spill] sm:$0xff] }
 0x308   :  { %1498 = vmatpush1.bf16.msra.mxu0 %v6369_v22  ;;  %1539 = vmatpush1.bf16.msra.mxu1 %v6370_v23  ;;  %v6448_v22 = vld [vmem:[#allocation22_spill] sm:$0xff] }
 0x309   :  { %1499 = vmatprep.subr.bf16.mxu0 %v6371_v24  ;;  %1540 = vmatprep.subr.bf16.mxu1 %v6372_v25  ;;  %v6449_v25 = vld [vmem:[#allocation23_spill] sm:$0xff] }
 0x30c   :  { %1500 = vmatpush1.bf16.msra.mxu0 %v6373_v27  ;;  %1541 = vmatpush1.bf16.msra.mxu1 %v6374_v28 }
 0x30d   :  { %1501 = vmatprep.subr.bf16.mxu0 %v6375_v29  ;;  %1542 = vmatprep.subr.bf16.mxu1 %v6376_v30 }
 0x310   :  { %1502 = vmatpush1.bf16.msra.mxu0 %v6377_v31  ;;  %1543 = vmatpush1.bf16.msra.mxu1 %v6378_v32 }
 0x311   :  { %1503 = vmatprep.subr.bf16.mxu0 %v6379_v33  ;;  %1544 = vmatprep.subr.bf16.mxu1 %v6421_v35  ;;  %v6450_v35 = vld [vmem:[#allocation24_spill] sm:$0xff] }
 0x314   :  { %1504 = vmatpush1.bf16.msra.mxu0 %v6422_v36  ;;  %1545 = vmatpush1.bf16.msra.mxu1 %v6423_v37 }
 0x315   :  { %1505 = vmatprep.subr.bf16.mxu0 %v6424_v38  ;;  %1546 = vmatprep.subr.bf16.mxu1 %v6425_v39 }
 0x318   :  { %1506 = vmatpush1.bf16.msra.mxu0 %v6426_v40  ;;  %1547 = vmatpush1.bf16.msra.mxu1 %v6427_v41 }
 0x319   :  { %1507 = vmatprep.subr.bf16.mxu0 %v6428_v42  ;;  %1548 = vmatprep.subr.bf16.mxu1 %v6429_v43  ;;  %v6451_v42 = vld [vmem:[#allocation25_spill] sm:$0xff] }
 0x31c   :  { %1508 = vmatpush1.bf16.msra.mxu0 %v6430_v44  ;;  %1549 = vmatpush1.bf16.msra.mxu1 %v6431_v45 }
 0x31d   :  { %1509 = vmatprep.subr.bf16.mxu0 %v6432_v46  ;;  %1550 = vmatprep.subr.bf16.mxu1 %v6433_v47 }
 0x320   :  { %1510 = vmatpush1.bf16.msra.mxu0 %v6434_v48  ;;  %1551 = vmatpush1.bf16.msra.mxu1 %v6435_v49 }
 0x321   :  { %1511 = vmatprep.subr.bf16.mxu0 %v6436_v50  ;;  %1552 = vmatprep.subr.bf16.mxu1 %v6437_v51  ;;  %v6452_v50 = vld [vmem:[#allocation73_spill] sm:$0xff] }
 0x324   :  { %1512 = vmatpush1.bf16.msra.mxu0 %v6438_v7  ;;  %1553 = vmatpush1.bf16.msra.mxu1 %v6439_v8 }
 0x325   :  { %1513 = vmatprep.subr.bf16.mxu0 %v6440_v9  ;;  %1554 = vmatprep.subr.bf16.mxu1 %v6441_v10  ;;  %v6453_v9 = vld [vmem:[#allocation74_spill] sm:$0xff] }
 0x328   :  { %1514 = vmatpush1.bf16.msra.mxu0 %v6442_v13  ;;  %1555 = vmatpush1.bf16.msra.mxu1 %v6443_v15 }
 0x329   :  { %1515 = vmatprep.subr.bf16.mxu0 %v6444_v17  ;;  %1556 = vmatprep.subr.bf16.mxu1 %v6445_v18 }
 0x32c   :  { %1516 = vmatpush1.bf16.msra.mxu0 %v6446_v20  ;;  %1557 = vmatpush1.bf16.msra.mxu1 %v6447_v21 }
 0x32d   :  { %1591 = vmatprep.subr.bf16.mxu0 %v6448_v22  ;;  %3482 = vmatprep.subr.bf16.mxu1 %v6335_v12 }
 0x3a2   :  { %v1306_v23 = vpop.f32.mrb[28].mxu0  ;;  %v1347_v24 = vpop.f32.mrb[20].mxu1 }
 0x3a3   :  { %v1307_v27 = vadd.f32 %v1306_v23, %v6449_v25  ;;  %v1308_v28 = vpop.f32.mrb[29].mxu0  ;;  %v1349_v29 = vpop.f32.mrb[21].mxu1  ;;  %v1348_v45 = vadd.f32 %v1347_v24, %v5075_v56 }
 0x3a4   :  { %v1310_v30 = vpop.f32.mrb[30].mxu0  ;;  %v1351_v31 = vpop.f32.mrb[22].mxu1  ;;  %v1309_v36 = vadd.f32 %v1308_v28, %v6450_v35  ;;  %v1350_v43 = vadd.f32 %v1349_v29, %v6451_v42 }
 0x3a5   :  { %v3251_v32 = vmul.f32 -1.442695, %v1307_v27  ;;  %v1311_v33 = vpop.f32.mrb[31].mxu0  ;;  %v1352_v59 = vpop.f32.mrb[23].mxu1 }
 0x3a6   :  { %v3252_v37 = vmul.f32 -1.442695, %v1309_v36 }
 0x3a7   :  { %3853 = vpow2.f32 %v3251_v32 }
 0x3a8   :  { %3855 = vpow2.f32 %v3252_v37 }
 0x3b1   :  { %v3854_v38 = vpop.eup %3853 }
 0x3b2   :  { %v1360_v39 = vadd.f32 1.0, %v3854_v38  ;;  %v3856_v40 = vpop.eup %3855 }
 0x3b3   :  { %v1361_v41 = vadd.f32 1.0, %v3856_v40 }
 0x3b4   :  { %3857 = vrcp.f32 %v1360_v39 }
 0x3b5   :  { %3859 = vrcp.f32 %v1361_v41 }
 0x3be   :  { %v3858_v44 = vpop.eup %3857 }
 0x3bf   :  { %v1366_v46 = vmul.f32 %v3858_v44, %v1350_v43  ;;  %v3860_v21 = vpop.eup %3859 }
 0x3c0   :  { %v1369_v24 = vsub.f32 1.0, %v3860_v21  ;;  %v1371_v29 = vmul.f32 %v3860_v21, %v5081_v60  ;;  %v6454_v60 = vld [vmem:[#allocation76_spill] sm:$0xff] }
 0x3c1   :  { %v1367_v47 = vadd.f32 %v1366_v46, %v1348_v45  ;;  %v5315_v21 = vld [vmem:[#allocation10 + $0x4c] ss:$16 sps:$4 sm:$0xff]  }
 0x3c2   :  { %v1415_v48 = vpop.f32.mrb[32].mxu0  ;;  %v1456_v49 = vpop.f32.mrb[24].mxu1 }
 0x3c3   :  { %3861 = vtanh.f32 %v1367_v47  ;;  %v1462_v51 = vadd.f32 %v1415_v48, %v6452_v50  ;;  %v1417_v7 = vpop.f32.mrb[33].mxu0  ;;  %v3480_v8 = vpop.f32.mrb[25].mxu1  ;;  %v1476_v38 = vadd.f32 %v4948_v4, %v1456_v49  ;;  %v6455_v4 = vld [vmem:[#allocation26_spill] sm:$0xff]  ;;  %v6457_v49 = vld [vmem:[#allocation28_spill] sm:$0xff] }
 0x3c4   :  { %v1463_v10 = vadd.f32 %v1417_v7, %v6453_v9  ;;  %v1419_v13 = vpop.f32.mrb[34].mxu0  ;;  %v1459_v15 = vpop.f32.mrb[26].mxu1  ;;  %v5288_v7 = vld [vmem:[#allocation10 + $0x4] ss:$16 sps:$4 sm:$0xff]   ;;  %v5291_v8 = vld [vmem:[#allocation10 + $0xc] ss:$16 sps:$4 sm:$0xff]  }
 0x3c5   :  { %v3253_v17 = vmul.f32 -1.442695, %v1462_v51  ;;  %v1420_v18 = vpop.f32.mrb[35].mxu0  ;;  %v3481_v20 = vpop.f32.mrb[27].mxu1  ;;  %v5285_v51 = vld [vmem:[#allocation9 + $0xb0] ss:$12 sps:$4 sm:$0xff]  }
 0x3c6   :  { %v3254_v23 = vmul.f32 -1.442695, %v1463_v10  ;;  %v5294_v9 = vld [vmem:[#allocation10] ss:$16 sps:$4 sm:$0xff]   ;;  %v5297_v10 = vld [vmem:[#allocation10 + $0x8] ss:$16 sps:$4 sm:$0xff]  }
 0x3c7   :  { %3863 = vpow2.f32 %v3253_v17  ;;  %v5300_v13 = vld [vmem:[#allocation10 + $0x24] ss:$16 sps:$4 sm:$0xff]   ;;  %v5303_v15 = vld [vmem:[#allocation10 + $0x2c] ss:$16 sps:$4 sm:$0xff]   ;;  %v5306_v17 = vld [vmem:[#allocation10 + $0x20] ss:$16 sps:$4 sm:$0xff]  }
 0x3c8   :  { %3865 = vpow2.f32 %v3254_v23  ;;  %v5309_v18 = vld [vmem:[#allocation10 + $0x28] ss:$16 sps:$4 sm:$0xff]   ;;  %v5312_v20 = vld [vmem:[#allocation10 + $0x44] ss:$16 sps:$4 sm:$0xff]   ;;  %v5318_v23 = vld [vmem:[#allocation10 + $0x40] ss:$16 sps:$4 sm:$0xff]  }
 0x3cd   :  { %v3862_v27 = vpop.eup %3861 }
 0x3ce   :  { %v1370_v28 = vmul.f32 %v3862_v27, %v1369_v24  ;;  %v5321_v24 = vld [vmem:[#allocation10 + $0x48] ss:$16 sps:$4 sm:$0xff]   ;;  %v5324_v27 = vld [vmem:[#allocation10 + $0x64] ss:$16 sps:$4 sm:$0xff]  }
 0x3d0   :  { %v5242_v30 = vadd.f32 %v1371_v29, %v1370_v28  ;;  %v5327_v28 = vld [vmem:[#allocation10 + $0x6c] ss:$16 sps:$4 sm:$0xff]   ;;  %v5330_v29 = vld [vmem:[#allocation10 + $0x60] ss:$16 sps:$4 sm:$0xff]  }
 0x3d1   :  { %v3864_v31 = vpop.eup %3863 }
 0x3d2   :  { %v1470_v32 = vadd.f32 1.0, %v3864_v31  ;;  %v1373_v33 = vpack.c.bf16 %v5242_v30, %v5242_v30  ;;  %v3866_v36 = vpop.eup %3865  ;;  %v5333_v31 = vld [vmem:[#allocation10 + $0x68] ss:$16 sps:$4 sm:$0xff]  }
 0x3d3   :  { %v1471_v37 = vadd.f32 1.0, %v3866_v36  ;;  %6458 = vst [vmem:[#allocation29_spill] sm:$0xff] %v5333_v31  ;;  %v5345_v36 = vld [vmem:[#allocation10 + $0x88] ss:$16 sps:$4 sm:$0xff]  }
 0x3d4   :  { %3867 = vrcp.f32 %v1470_v32  ;;  %v1375_v59 = vrot.slane %v1373_v33, 4  ;;  %1517 = vmatprep.mubr.bf16.mxu0 %v1373_v33  ;;  %1558 = vmatprep.mubr.bf16.mxu1 %v1373_v33  ;;  %v5336_v32 = vld [vmem:[#allocation10 + $0x84] ss:$16 sps:$4 sm:$0xff]   ;;  %v5339_v33 = vld [vmem:[#allocation10 + $0x8c] ss:$16 sps:$4 sm:$0xff]   ;;  %6462 = vst [vmem:[#allocation33_spill] sm:$0xff] %v5345_v36 }
 0x3d5   :  { %3869 = vrcp.f32 %v1471_v37  ;;  %6459 = vst [vmem:[#allocation30_spill] sm:$0xff] %v5336_v32  ;;  %6460 = vst [vmem:[#allocation31_spill] sm:$0xff] %v5339_v33  ;;  %v5348_v37 = vld [vmem:[#allocation10 + $0xa4] ss:$16 sps:$4 sm:$0xff]  }
 0x3d6   :  { %1377 = vst [vmem:[#allocation3] sm:$0xf0] %v1375_v59  ;;  %v5342_v59 = vld [vmem:[#allocation10 + $0x80] ss:$16 sps:$4 sm:$0xff]   ;;  %6463 = vst [vmem:[#allocation34_spill] sm:$0xff] %v5348_v37 }
 0x3d7   :  { %6461 = vst [vmem:[#allocation32_spill] sm:$0xff] %v5342_v59 }
 0x3de   :  { %v3868_v39 = vpop.eup %3867 }
 0x3df   :  { %v1477_v40 = vmul.f32 %v3868_v39, %v1476_v38  ;;  %v3870_v43 = vpop.eup %3869  ;;  %v5351_v38 = vld [vmem:[#allocation10 + $0xac] ss:$16 sps:$4 sm:$0xff]   ;;  %v5354_v39 = vld [vmem:[#allocation10 + $0xa0] ss:$16 sps:$4 sm:$0xff]  }
 0x3e0   :  { %v1480_v44 = vsub.f32 1.0, %v3870_v43  ;;  %v1482_v47 = vmul.f32 %v3870_v43, %v5088_v55  ;;  %v6456_v55 = vld [vmem:[#allocation27_spill] sm:$0xff]  ;;  %6464 = vst [vmem:[#allocation35_spill] sm:$0xff] %v5351_v38  ;;  %6465 = vst [vmem:[#allocation36_spill] sm:$0xff] %v5354_v39 }
 0x3e1   :  { %v1478_v41 = vadd.f32 %v1477_v40, %v6454_v60  ;;  %v5357_v40 = vld [vmem:[#allocation10 + $0xa8] ss:$16 sps:$4 sm:$0xff]   ;;  %v5360_v60 = vld [vmem:[#allocation10 + $0xc4] ss:$16 sps:$4 sm:$0xff]   ;;  %v5366_v43 = vld [vmem:[#allocation10 + $0xc0] ss:$16 sps:$4 sm:$0xff]  }
 0x3e2   :  { %6466 = vst [vmem:[#allocation37_spill] sm:$0xff] %v5357_v40  ;;  %6467 = vst [vmem:[#allocation38_spill] sm:$0xff] %v5360_v60 }
 0x3e3   :  { %3871 = vtanh.f32 %v1478_v41  ;;  %v5363_v41 = vld [vmem:[#allocation10 + $0xcc] ss:$16 sps:$4 sm:$0xff]   ;;  %6469 = vst [vmem:[#allocation40_spill] sm:$0xff] %v5366_v43 }
 0x3e4   :  { %6468 = vst [vmem:[#allocation39_spill] sm:$0xff] %v5363_v41 }
 0x3ed   :  { %v3872_v45 = vpop.eup %3871 }
 0x3ee   :  { %v1481_v46 = vmul.f32 %v3872_v45, %v1480_v44  ;;  %v5369_v44 = vld [vmem:[#allocation10 + $0xc8] ss:$16 sps:$4 sm:$0xff]   ;;  %v5372_v45 = vld [vmem:[#allocation10 + $0xe4] ss:$16 sps:$4 sm:$0xff]  }
 0x3ef   :  { %6470 = vst [vmem:[#allocation41_spill] sm:$0xff] %v5369_v44  ;;  %6471 = vst [vmem:[#allocation42_spill] sm:$0xff] %v5372_v45 }
 0x3f0   :  { %v5249_v48 = vadd.f32 %v1482_v47, %v1481_v46  ;;  %v5375_v46 = vld [vmem:[#allocation10 + $0xec] ss:$16 sps:$4 sm:$0xff]   ;;  %v5378_v47 = vld [vmem:[#allocation10 + $0xe0] ss:$16 sps:$4 sm:$0xff]  }
 0x3f1   :  { %6472 = vst [vmem:[#allocation70_spill] sm:$0xff] %v5375_v46  ;;  %6473 = vst [vmem:[#allocation71_spill] sm:$0xff] %v5378_v47 }
 0x3f2   :  { %v1484_v50 = vpack.c.bf16 %v5249_v48, %v5249_v48 }
 0x3f4   :  { %1518 = vmatmul.mubr.bf16.vlgmr.msra.gmra.mrb[36].mxu0 %v1484_v50  ;;  %1559 = vmatmul.mubr.bf16.vlgmr.msra.gmra.mrb[28].mxu1 %v1484_v50 }
 0x3f5   :  { %1592 = vmatpush1.bf16.msra.mxu0 %v5092_v1  ;;  %3483 = vmatpush3.bf16.msra.mxu1 %v5095_v63 }
 0x3f6   :  { %1593 = vmatprep.subr.bf16.mxu0 %v5098_v16  ;;  %3484 = vmatprep.subr.bf16.mxu1 %v6335_v12 }
 0x3f7   :  { %1623 = vmatprep.mubr.bf16.mxu0 %v6358_v62  ;;  %3498 = vmatprep.mubr.msk.bf16.mxu1 %vm4396_vm2, %v6335_v12 }
 0x3f9   :  { %1594 = vmatpush1.bf16.msra.mxu0 %v5105_v11  ;;  %3485 = vmatpush3.bf16.msra.mxu1 %v5108_v26 }
 0x3fa   :  { %1595 = vmatprep.subr.bf16.mxu0 %v5111_v58  ;;  %3486 = vmatprep.subr.bf16.mxu1 %v6335_v12 }
 0x3fd   :  { %1596 = vmatpush1.bf16.msra.mxu0 %v5115_v52  ;;  %3487 = vmatpush3.bf16.msra.mxu1 %v5118_v34 }
 0x3fe   :  { %1597 = vmatprep.subr.bf16.mxu0 %v5121_v6  ;;  %3488 = vmatprep.subr.bf16.mxu1 %v6335_v12 }
 0x401   :  { %1598 = vmatpush1.bf16.msra.mxu0 %v5125_v61  ;;  %3489 = vmatpush3.bf16.msra.mxu1 %v5128_v53 }
 0x402   :  { %1599 = vmatprep.subr.bf16.mxu0 %v5131_v19  ;;  %3490 = vmatprep.subr.bf16.mxu1 %v6335_v12 }
 0x405   :  { %1600 = vmatpush1.bf16.msra.mxu0 %v5135_v3  ;;  %3491 = vmatpush3.bf16.msra.mxu1 %v6455_v4 }
 0x406   :  { %1601 = vmatprep.subr.bf16.mxu0 %v6456_v55  ;;  %3492 = vmatprep.subr.bf16.mxu1 %v6335_v12 }
 0x409   :  { %1602 = vmatpush1.bf16.msra.mxu0 %v5145_v54  ;;  %3493 = vmatpush3.bf16.msra.mxu1 %v6457_v49 }
 0x40a   :  { %1603 = vmatprep.subr.bf16.mxu0 %v5151_v5  ;;  %3494 = vmatprep.subr.bf16.mxu1 %v6335_v12 }
 0x40d   :  { %1604 = vmatpush1.bf16.msra.mxu0 %v5155_v57  ;;  %3495 = vmatpush3.bf16.msra.mxu1 %v5158_v14 }
 0x40e   :  { %1605 = vmatprep.subr.bf16.mxu0 %v5161_v2  ;;  %3496 = vmatprep.subr.bf16.mxu1 %v6335_v12 }
 0x411   :  { %1606 = vmatpush1.bf16.msra.mxu0 %v5165_v0  ;;  %3497 = vmatpush3.bf16.msra.mxu1 %v5285_v51 }
 0x412   :  { %1695 = vmatprep.subr.bf16.mxu0 %v5288_v7  ;;  %1736 = vmatprep.subr.bf16.mxu1 %v5291_v8 }
 0x414   :  { %1624 = vmatmul.mubr.bf16.vlgmr.msra.gmra.mrb[40].mxu0 %v1484_v50  ;;  %3499 = vmatmul.mubr.bf16.vlgmr.msra.gmra.mrb[32].mxu1 %v1484_v50  ;;  %v5381_v50 = vld [vmem:[#allocation10 + $0xe8] ss:$16 sps:$4 sm:$0xff]  }
 0x415   :  { %1696 = vmatpush1.bf16.msra.mxu0 %v5294_v9  ;;  %1737 = vmatpush1.bf16.msra.mxu1 %v5297_v10  ;;  %6474 = vst [vmem:[#allocation72_spill] sm:$0xff] %v5381_v50 }
 0x416   :  { %1697 = vmatprep.subr.bf16.mxu0 %v5300_v13  ;;  %1738 = vmatprep.subr.bf16.mxu1 %v5303_v15 }
 0x419   :  { %1698 = vmatpush1.bf16.msra.mxu0 %v5306_v17  ;;  %1739 = vmatpush1.bf16.msra.mxu1 %v5309_v18 }
 0x41a   :  { %1699 = vmatprep.subr.bf16.mxu0 %v5312_v20  ;;  %1740 = vmatprep.subr.bf16.mxu1 %v5315_v21 }
 0x41d   :  { %1700 = vmatpush1.bf16.msra.mxu0 %v5318_v23  ;;  %1741 = vmatpush1.bf16.msra.mxu1 %v5321_v24 }
 0x41e   :  { %1701 = vmatprep.subr.bf16.mxu0 %v5324_v27  ;;  %1742 = vmatprep.subr.bf16.mxu1 %v5327_v28 }
 0x421   :  { %1702 = vmatpush1.bf16.msra.mxu0 %v5330_v29  ;;  %1743 = vmatpush1.bf16.msra.mxu1 %v5333_v31 }
 0x422   :  { %1703 = vmatprep.subr.bf16.mxu0 %v5336_v32  ;;  %1744 = vmatprep.subr.bf16.mxu1 %v5339_v33 }
 0x425   :  { %1704 = vmatpush1.bf16.msra.mxu0 %v5342_v59  ;;  %1745 = vmatpush1.bf16.msra.mxu1 %v5345_v36 }
 0x426   :  { %1705 = vmatprep.subr.bf16.mxu0 %v5348_v37  ;;  %1746 = vmatprep.subr.bf16.mxu1 %v5351_v38 }
 0x429   :  { %1706 = vmatpush1.bf16.msra.mxu0 %v5354_v39  ;;  %1747 = vmatpush1.bf16.msra.mxu1 %v5357_v40 }
 0x42a   :  { %1707 = vmatprep.subr.bf16.mxu0 %v5360_v60  ;;  %1748 = vmatprep.subr.bf16.mxu1 %v5363_v41 }
 0x42d   :  { %1708 = vmatpush1.bf16.msra.mxu0 %v5366_v43  ;;  %1749 = vmatpush1.bf16.msra.mxu1 %v5369_v44  ;;  %v5384_v43 = vld [vmem:[#allocation10 + $0x104] ss:$16 sps:$4 sm:$0xff]   ;;  %v5387_v44 = vld [vmem:[#allocation10 + $0x10c] ss:$16 sps:$4 sm:$0xff]  }
 0x42e   :  { %1709 = vmatprep.subr.bf16.mxu0 %v5372_v45  ;;  %1750 = vmatprep.subr.bf16.mxu1 %v5375_v46  ;;  %6475 = vst [vmem:[#allocation79_spill] sm:$0xff] %v5384_v43  ;;  %6476 = vst [vmem:[#allocation43_spill] sm:$0xff] %v5387_v44  ;;  %v5390_v45 = vld [vmem:[#allocation10 + $0x100] ss:$16 sps:$4 sm:$0xff]   ;;  %v5393_v46 = vld [vmem:[#allocation10 + $0x108] ss:$16 sps:$4 sm:$0xff]  }
 0x42f   :  { %6477 = vst [vmem:[#allocation44_spill] sm:$0xff] %v5390_v45  ;;  %6478 = vst [vmem:[#allocation45_spill] sm:$0xff] %v5393_v46 }
 0x431   :  { %1710 = vmatpush1.bf16.msra.mxu0 %v5378_v47  ;;  %1751 = vmatpush1.bf16.msra.mxu1 %v5381_v50  ;;  %v5396_v47 = vld [vmem:[#allocation10 + $0x124] ss:$16 sps:$4 sm:$0xff]   ;;  %v5399_v50 = vld [vmem:[#allocation10 + $0x12c] ss:$16 sps:$4 sm:$0xff]  }
 0x432   :  { %1711 = vmatprep.subr.bf16.mxu0 %v5384_v43  ;;  %1752 = vmatprep.subr.bf16.mxu1 %v5387_v44  ;;  %6479 = vst [vmem:[#allocation46_spill] sm:$0xff] %v5396_v47  ;;  %6480 = vst [vmem:[#allocation47_spill] sm:$0xff] %v5399_v50  ;;  %v5402_v43 = vld [vmem:[#allocation10 + $0x120] ss:$16 sps:$4 sm:$0xff]   ;;  %v5405_v44 = vld [vmem:[#allocation10 + $0x128] ss:$16 sps:$4 sm:$0xff]  }
 0x433   :  { %6481 = vst [vmem:[#allocation48_spill] sm:$0xff] %v5402_v43  ;;  %6482 = vst [vmem:[#allocation49_spill] sm:$0xff] %v5405_v44 }
 0x435   :  { %1712 = vmatpush1.bf16.msra.mxu0 %v5390_v45  ;;  %1753 = vmatpush1.bf16.msra.mxu1 %v5393_v46  ;;  %v5408_v45 = vld [vmem:[#allocation10 + $0x144] ss:$16 sps:$4 sm:$0xff]   ;;  %v5411_v46 = vld [vmem:[#allocation10 + $0x14c] ss:$16 sps:$4 sm:$0xff]  }
 0x436   :  { %1713 = vmatprep.subr.bf16.mxu0 %v5396_v47  ;;  %1754 = vmatprep.subr.bf16.mxu1 %v5399_v50  ;;  %6483 = vst [vmem:[#allocation50_spill] sm:$0xff] %v5408_v45  ;;  %6484 = vst [vmem:[#allocation51_spill] sm:$0xff] %v5411_v46  ;;  %v5414_v47 = vld [vmem:[#allocation10 + $0x140] ss:$16 sps:$4 sm:$0xff]   ;;  %v5417_v50 = vld [vmem:[#allocation10 + $0x148] ss:$16 sps:$4 sm:$0xff]  }
 0x437   :  { %6485 = vst [vmem:[#allocation52_spill] sm:$0xff] %v5414_v47  ;;  %6486 = vst [vmem:[#allocation53_spill] sm:$0xff] %v5417_v50 }
 0x439   :  { %1714 = vmatpush1.bf16.msra.mxu0 %v5402_v43  ;;  %1755 = vmatpush1.bf16.msra.mxu1 %v5405_v44  ;;  %v5420_v43 = vld [vmem:[#allocation10 + $0x164] ss:$16 sps:$4 sm:$0xff]   ;;  %v5423_v44 = vld [vmem:[#allocation10 + $0x16c] ss:$16 sps:$4 sm:$0xff]  }
 0x43a   :  { %1715 = vmatprep.subr.bf16.mxu0 %v5408_v45  ;;  %1756 = vmatprep.subr.bf16.mxu1 %v5411_v46  ;;  %6487 = vst [vmem:[#allocation54_spill] sm:$0xff] %v5420_v43  ;;  %6488 = vst [vmem:[#allocation55_spill] sm:$0xff] %v5423_v44  ;;  %v5426_v45 = vld [vmem:[#allocation10 + $0x160] ss:$16 sps:$4 sm:$0xff]   ;;  %v5429_v46 = vld [vmem:[#allocation10 + $0x168] ss:$16 sps:$4 sm:$0xff]  }
 0x43b   :  { %6489 = vst [vmem:[#allocation56_spill] sm:$0xff] %v5426_v45  ;;  %6490 = vst [vmem:[#allocation57_spill] sm:$0xff] %v5429_v46 }
 0x43d   :  { %1716 = vmatpush1.bf16.msra.mxu0 %v5414_v47  ;;  %1757 = vmatpush1.bf16.msra.mxu1 %v5417_v50  ;;  %v5432_v47 = vld [vmem:[#allocation10 + $0x184] ss:$16 sps:$4 sm:$0xff]   ;;  %v5435_v50 = vld [vmem:[#allocation10 + $0x18c] ss:$16 sps:$4 sm:$0xff]  }
 0x43e   :  { %1717 = vmatprep.subr.bf16.mxu0 %v5420_v43  ;;  %1758 = vmatprep.subr.bf16.mxu1 %v5423_v44  ;;  %6491 = vst [vmem:[#allocation58_spill] sm:$0xff] %v5432_v47  ;;  %6492 = vst [vmem:[#allocation59_spill] sm:$0xff] %v5435_v50  ;;  %v5438_v43 = vld [vmem:[#allocation10 + $0x180] ss:$16 sps:$4 sm:$0xff]   ;;  %v5441_v44 = vld [vmem:[#allocation10 + $0x188] ss:$16 sps:$4 sm:$0xff]  }
 0x43f   :  { %6493 = vst [vmem:[#allocation60_spill] sm:$0xff] %v5438_v43  ;;  %6494 = vst [vmem:[#allocation61_spill] sm:$0xff] %v5441_v44 }
 0x441   :  { %1718 = vmatpush1.bf16.msra.mxu0 %v5426_v45  ;;  %1759 = vmatpush1.bf16.msra.mxu1 %v5429_v46  ;;  %v5444_v45 = vld [vmem:[#allocation10 + $0x1a4] ss:$16 sps:$4 sm:$0xff]   ;;  %v5447_v46 = vld [vmem:[#allocation10 + $0x1ac] ss:$16 sps:$4 sm:$0xff]  }
 0x442   :  { %1719 = vmatprep.subr.bf16.mxu0 %v5432_v47  ;;  %1760 = vmatprep.subr.bf16.mxu1 %v5435_v50  ;;  %6495 = vst [vmem:[#allocation62_spill] sm:$0xff] %v5444_v45  ;;  %6496 = vst [vmem:[#allocation63_spill] sm:$0xff] %v5447_v46  ;;  %v5450_v47 = vld [vmem:[#allocation10 + $0x1a0] ss:$16 sps:$4 sm:$0xff]   ;;  %v5453_v50 = vld [vmem:[#allocation10 + $0x1a8] ss:$16 sps:$4 sm:$0xff]  }
 0x443   :  { %6497 = vst [vmem:[#allocation64_spill] sm:$0xff] %v5450_v47  ;;  %6498 = vst [vmem:[#allocation65_spill] sm:$0xff] %v5453_v50 }
 0x445   :  { %1720 = vmatpush1.bf16.msra.mxu0 %v5438_v43  ;;  %1761 = vmatpush1.bf16.msra.mxu1 %v5441_v44  ;;  %v5456_v43 = vld [vmem:[#allocation10 + $0x1c4] ss:$16 sps:$4 sm:$0xff]   ;;  %v5459_v44 = vld [vmem:[#allocation10 + $0x1cc] ss:$16 sps:$4 sm:$0xff]  }
 0x446   :  { %1721 = vmatprep.subr.bf16.mxu0 %v5444_v45  ;;  %1762 = vmatprep.subr.bf16.mxu1 %v5447_v46  ;;  %6499 = vst [vmem:[#allocation66_spill] sm:$0xff] %v5456_v43  ;;  %6500 = vst [vmem:[#allocation67_spill] sm:$0xff] %v5459_v44  ;;  %v5462_v45 = vld [vmem:[#allocation10 + $0x1c0] ss:$16 sps:$4 sm:$0xff]   ;;  %v5465_v46 = vld [vmem:[#allocation10 + $0x1c8] ss:$16 sps:$4 sm:$0xff]  }
 0x447   :  { %6501 = vst [vmem:[#allocation68_spill] sm:$0xff] %v5462_v45  ;;  %6502 = vst [vmem:[#allocation69_spill] sm:$0xff] %v5465_v46 }
 0x449   :  { %1722 = vmatpush1.bf16.msra.mxu0 %v5450_v47  ;;  %1763 = vmatpush1.bf16.msra.mxu1 %v5453_v50  ;;  %v5468_v47 = vld [vmem:[#allocation10 + $0x1e4] ss:$16 sps:$4 sm:$0xff]   ;;  %v5471_v50 = vld [vmem:[#allocation10 + $0x1ec] ss:$16 sps:$4 sm:$0xff]  }
 0x44a   :  { %1723 = vmatprep.subr.bf16.mxu0 %v5456_v43  ;;  %1764 = vmatprep.subr.bf16.mxu1 %v5459_v44  ;;  %6503 = vst [vmem:[#allocation22_spill] sm:$0xff] %v5468_v47  ;;  %6504 = vst [vmem:[#allocation73_spill] sm:$0xff] %v5471_v50  ;;  %v5474_v43 = vld [vmem:[#allocation10 + $0x1e0] ss:$16 sps:$4 sm:$0xff]   ;;  %v5477_v44 = vld [vmem:[#allocation10 + $0x1e8] ss:$16 sps:$4 sm:$0xff]  }
 0x44b   :  { %6505 = vst [vmem:[#allocation74_spill] sm:$0xff] %v5474_v43  ;;  %6506 = vst [vmem:[#allocation76_spill] sm:$0xff] %v5477_v44 }
 0x44d   :  { %1724 = vmatpush1.bf16.msra.mxu0 %v5462_v45  ;;  %1765 = vmatpush1.bf16.msra.mxu1 %v5465_v46 }
 0x44e   :  { %1725 = vmatprep.subr.bf16.mxu0 %v5468_v47  ;;  %1766 = vmatprep.subr.bf16.mxu1 %v5471_v50 }
 0x451   :  { %1726 = vmatpush1.bf16.msra.mxu0 %v5474_v43  ;;  %1767 = vmatpush1.bf16.msra.mxu1 %v5477_v44 }
 0x452   :  { %1804 = vmatprep.subr.bf16.mxu0 %v6448_v22  ;;  %3502 = vmatprep.subr.bf16.mxu1 %v6335_v12 }
 0x4c7   :  { %v1519_v46 = vpop.f32.mrb[36].mxu0  ;;  %v1560_v45 = vpop.f32.mrb[28].mxu1 }
 0x4c8   :  { %v1520_v47 = vadd.f32 %v1519_v46, %v6449_v25  ;;  %v1521_v41 = vpop.f32.mrb[37].mxu0  ;;  %v1562_v60 = vpop.f32.mrb[29].mxu1  ;;  %v1561_v25 = vadd.f32 %v1560_v45, %v5075_v56 }
 0x4c9   :  { %v1523_v40 = vpop.f32.mrb[38].mxu0  ;;  %v1564_v50 = vpop.f32.mrb[30].mxu1  ;;  %v1522_v43 = vadd.f32 %v1521_v41, %v6450_v35  ;;  %v1563_v32 = vadd.f32 %v1562_v60, %v6451_v42  ;;  %v6507_v41 = vld [vmem:[#allocation75_spill] sm:$0xff] }
 0x4ca   :  { %v3255_v39 = vmul.f32 -1.442695, %v1520_v47  ;;  %v1524_v38 = vpop.f32.mrb[39].mxu0  ;;  %v1565_v37 = vpop.f32.mrb[31].mxu1  ;;  %v6508_v50 = vld [vmem:[#allocation77_spill] sm:$0xff] }
 0x4cb   :  { %v3256_v36 = vmul.f32 -1.442695, %v1522_v43 }
 0x4cc   :  { %3873 = vpow2.f32 %v3255_v39 }
 0x4cd   :  { %3875 = vpow2.f32 %v3256_v36 }
 0x4d6   :  { %v3874_v44 = vpop.eup %3873 }
 0x4d7   :  { %v1573_v22 = vadd.f32 1.0, %v3874_v44  ;;  %v3876_v59 = vpop.eup %3875 }
 0x4d8   :  { %v1574_v33 = vadd.f32 1.0, %v3876_v59 }
 0x4d9   :  { %3877 = vrcp.f32 %v1573_v22 }
 0x4da   :  { %3879 = vrcp.f32 %v1574_v33 }
 0x4e3   :  { %v3878_v46 = vpop.eup %3877 }
 0x4e4   :  { %v1579_v40 = vmul.f32 %v3878_v46, %v1563_v32  ;;  %v3880_v42 = vpop.eup %3879 }
 0x4e5   :  { %v1582_v33 = vsub.f32 1.0, %v3880_v42  ;;  %v1584_v46 = vmul.f32 %v3880_v42, %v5242_v30 }
 0x4e6   :  { %v1580_v47 = vadd.f32 %v1579_v40, %v1561_v25 }
 0x4e7   :  { %v1625_v38 = vpop.f32.mrb[40].mxu0  ;;  %v1666_v37 = vpop.f32.mrb[32].mxu1 }
 0x4e8   :  { %3881 = vtanh.f32 %v1580_v47  ;;  %v1672_v39 = vadd.f32 %v1625_v38, %v6507_v41  ;;  %v1627_v43 = vpop.f32.mrb[41].mxu0  ;;  %v3500_v36 = vpop.f32.mrb[33].mxu1 }
 0x4e9   :  { %v1673_v44 = vadd.f32 %v1627_v43, %v6508_v50  ;;  %v1629_v22 = vpop.f32.mrb[42].mxu0  ;;  %v1669_v35 = vpop.f32.mrb[34].mxu1  ;;  %v6509_v36 = vld [vmem:[#allocation78_spill] sm:$0xff] }
 0x4ea   :  { %v3257_v59 = vmul.f32 -1.442695, %v1672_v39  ;;  %v1630_v31 = vpop.f32.mrb[43].mxu0  ;;  %v3501_v60 = vpop.f32.mrb[35].mxu1  ;;  %v5496_v39 = vld [vmem:[%s6030_s4] ss:$0 sm:$0xff] }
 0x4eb   :  { %v3258_v45 = vmul.f32 -1.442695, %v1673_v44  ;;  %v1686_v42 = vadd.f32 %v5496_v39, %v1666_v37  ;;  %v6533_v37 = vld [vmem:[#allocation48_spill] sm:$0xff] }
 0x4ec   :  { %3883 = vpow2.f32 %v3257_v59 }
 0x4ed   :  { %3885 = vpow2.f32 %v3258_v45 }
 0x4f2   :  { %v3882_v32 = vpop.eup %3881 }
 0x4f3   :  { %v1583_v25 = vmul.f32 %v3882_v32, %v1582_v33 }
 0x4f5   :  { %v5489_v40 = vadd.f32 %v1584_v46, %v1583_v25  ;;  %v6534_v25 = vld [vmem:[#allocation49_spill] sm:$0xff]  ;;  %v6535_v46 = vld [vmem:[#allocation50_spill] sm:$0xff] }
 0x4f6   :  { %v3884_v47 = vpop.eup %3883 }
 0x4f7   :  { %v1680_v38 = vadd.f32 1.0, %v3884_v47  ;;  %v1586_v41 = vpack.c.bf16 %v5489_v40, %v5489_v40  ;;  %v3886_v35 = vpop.eup %3885  ;;  %v6536_v47 = vld [vmem:[#allocation51_spill] sm:$0xff] }
 0x4f8   :  { %v1681_v31 = vadd.f32 1.0, %v3886_v35  ;;  %v6539_v35 = vld [vmem:[#allocation54_spill] sm:$0xff] }
 0x4f9   :  { %3887 = vrcp.f32 %v1680_v38  ;;  %1587 = vst [vmem:[#allocation3 + $0x8] sm:$0xf] %v1586_v41  ;;  %1727 = vmatprep.mubr.bf16.mxu0 %v1586_v41  ;;  %1768 = vmatprep.mubr.bf16.mxu1 %v1586_v41  ;;  %v6537_v38 = vld [vmem:[#allocation52_spill] sm:$0xff]  ;;  %v6538_v41 = vld [vmem:[#allocation53_spill] sm:$0xff] }
 0x4fa   :  { %3889 = vrcp.f32 %v1681_v31  ;;  %v6540_v31 = vld [vmem:[#allocation55_spill] sm:$0xff] }
 0x503   :  { %v3888_v30 = vpop.eup %3887 }
 0x504   :  { %v1687_v43 = vmul.f32 %v3888_v30, %v1686_v42  ;;  %v3890_v44 = vpop.eup %3889  ;;  %v6541_v42 = vld [vmem:[#allocation56_spill] sm:$0xff]  ;;  %v6542_v30 = vld [vmem:[#allocation57_spill] sm:$0xff] }
 0x505   :  { %v1690_v22 = vsub.f32 1.0, %v3890_v44  ;;  %v1692_v45 = vmul.f32 %v3890_v44, %v5249_v48  ;;  %v6529_v48 = vld [vmem:[#allocation44_spill] sm:$0xff]  ;;  %v6546_v44 = vld [vmem:[#allocation61_spill] sm:$0xff] }
 0x506   :  { %v1688_v50 = vadd.f32 %v1687_v43, %v6509_v36  ;;  %v6543_v43 = vld [vmem:[#allocation58_spill] sm:$0xff]  ;;  %v6544_v36 = vld [vmem:[#allocation59_spill] sm:$0xff] }
 0x508   :  { %3891 = vtanh.f32 %v1688_v50  ;;  %v6545_v50 = vld [vmem:[#allocation60_spill] sm:$0xff] }
 0x512   :  { %v3892_v59 = vpop.eup %3891 }
 0x513   :  { %v1691_v60 = vmul.f32 %v3892_v59, %v1690_v22  ;;  %v6547_v22 = vld [vmem:[#allocation62_spill] sm:$0xff]  ;;  %v6548_v59 = vld [vmem:[#allocation63_spill] sm:$0xff] }
 0x515   :  { %v5501_v33 = vadd.f32 %v1692_v45, %v1691_v60  ;;  %v6549_v60 = vld [vmem:[#allocation64_spill] sm:$0xff]  ;;  %v6550_v45 = vld [vmem:[#allocation65_spill] sm:$0xff] }
 0x517   :  { %v1694_v32 = vpack.c.bf16 %v5501_v33, %v5501_v33 }
 0x519   :  { %1728 = vmatmul.mubr.bf16.vlgmr.msra.gmra.mrb[44].mxu0 %v1694_v32  ;;  %1769 = vmatmul.mubr.bf16.vlgmr.msra.gmra.mrb[36].mxu1 %v1694_v32 }
 0x51a   :  { %1805 = vmatpush1.bf16.msra.mxu0 %v5092_v1  ;;  %3503 = vmatpush3.bf16.msra.mxu1 %v5095_v63  ;;  %v6510_v1 = vld [vmem:[#allocation29_spill] sm:$0xff]  ;;  %v6511_v63 = vld [vmem:[#allocation30_spill] sm:$0xff] }
 0x51b   :  { %1806 = vmatprep.subr.bf16.mxu0 %v5098_v16  ;;  %3504 = vmatprep.subr.bf16.mxu1 %v6335_v12  ;;  %v6512_v16 = vld [vmem:[#allocation31_spill] sm:$0xff] }
 0x51c   :  { %1836 = vmatprep.mubr.bf16.mxu0 %v6358_v62  ;;  %3518 = vmatprep.mubr.msk.bf16.mxu1 %vm4396_vm2, %v6335_v12 }
 0x51e   :  { %1807 = vmatpush1.bf16.msra.mxu0 %v5105_v11  ;;  %3505 = vmatpush3.bf16.msra.mxu1 %v5108_v26  ;;  %v6513_v11 = vld [vmem:[#allocation32_spill] sm:$0xff]  ;;  %v6514_v26 = vld [vmem:[#allocation33_spill] sm:$0xff] }
 0x51f   :  { %1808 = vmatprep.subr.bf16.mxu0 %v5111_v58  ;;  %3506 = vmatprep.subr.bf16.mxu1 %v6335_v12  ;;  %v6515_v58 = vld [vmem:[#allocation34_spill] sm:$0xff] }
 0x522   :  { %1809 = vmatpush1.bf16.msra.mxu0 %v5115_v52  ;;  %3507 = vmatpush3.bf16.msra.mxu1 %v5118_v34  ;;  %v6516_v52 = vld [vmem:[#allocation35_spill] sm:$0xff]  ;;  %v6517_v34 = vld [vmem:[#allocation36_spill] sm:$0xff] }
 0x523   :  { %1810 = vmatprep.subr.bf16.mxu0 %v5121_v6  ;;  %3508 = vmatprep.subr.bf16.mxu1 %v6335_v12  ;;  %v6518_v6 = vld [vmem:[#allocation37_spill] sm:$0xff] }
 0x526   :  { %1811 = vmatpush1.bf16.msra.mxu0 %v5125_v61  ;;  %3509 = vmatpush3.bf16.msra.mxu1 %v5128_v53  ;;  %v6519_v61 = vld [vmem:[#allocation38_spill] sm:$0xff]  ;;  %v6520_v53 = vld [vmem:[#allocation39_spill] sm:$0xff] }
 0x527   :  { %1812 = vmatprep.subr.bf16.mxu0 %v5131_v19  ;;  %3510 = vmatprep.subr.bf16.mxu1 %v6335_v12  ;;  %v6521_v19 = vld [vmem:[#allocation40_spill] sm:$0xff] }
 0x52a   :  { %1813 = vmatpush1.bf16.msra.mxu0 %v5135_v3  ;;  %3511 = vmatpush3.bf16.msra.mxu1 %v6455_v4  ;;  %v6522_v3 = vld [vmem:[#allocation41_spill] sm:$0xff] }
 0x52b   :  { %1814 = vmatprep.subr.bf16.mxu0 %v6456_v55  ;;  %3512 = vmatprep.subr.bf16.mxu1 %v6335_v12  ;;  %v6530_v4 = vld [vmem:[#allocation45_spill] sm:$0xff]  ;;  %v6531_v55 = vld [vmem:[#allocation46_spill] sm:$0xff] }
 0x52e   :  { %1815 = vmatpush1.bf16.msra.mxu0 %v5145_v54  ;;  %3513 = vmatpush3.bf16.msra.mxu1 %v6457_v49  ;;  %v6525_v54 = vld [vmem:[#allocation71_spill] sm:$0xff] }
 0x52f   :  { %1816 = vmatprep.subr.bf16.mxu0 %v5151_v5  ;;  %3514 = vmatprep.subr.bf16.mxu1 %v6335_v12  ;;  %v6527_v5 = vld [vmem:[#allocation79_spill] sm:$0xff] }
 0x530   :  { %v6532_v49 = vld [vmem:[#allocation47_spill] sm:$0xff] }
 0x532   :  { %1817 = vmatpush1.bf16.msra.mxu0 %v5155_v57  ;;  %3515 = vmatpush3.bf16.msra.mxu1 %v5158_v14  ;;  %v6524_v14 = vld [vmem:[#allocation70_spill] sm:$0xff]  ;;  %v6528_v57 = vld [vmem:[#allocation43_spill] sm:$0xff] }
 0x533   :  { %1818 = vmatprep.subr.bf16.mxu0 %v5161_v2  ;;  %3516 = vmatprep.subr.bf16.mxu1 %v6335_v12  ;;  %v6523_v2 = vld [vmem:[#allocation42_spill] sm:$0xff] }
 0x536   :  { %1819 = vmatpush1.bf16.msra.mxu0 %v5165_v0  ;;  %3517 = vmatpush3.bf16.msra.mxu1 %v5285_v51  ;;  %v6526_v0 = vld [vmem:[#allocation72_spill] sm:$0xff] }
 0x537   :  { %1908 = vmatprep.subr.bf16.mxu0 %v5288_v7  ;;  %1949 = vmatprep.subr.bf16.mxu1 %v5291_v8 }
 0x539   :  { %1837 = vmatmul.mubr.bf16.vlgmr.msra.gmra.mrb[48].mxu0 %v1694_v32  ;;  %3519 = vmatmul.mubr.bf16.vlgmr.msra.gmra.mrb[40].mxu1 %v1694_v32  ;;  %v6551_v32 = vld [vmem:[#allocation66_spill] sm:$0xff] }
 0x53a   :  { %1909 = vmatpush1.bf16.msra.mxu0 %v5294_v9  ;;  %1950 = vmatpush1.bf16.msra.mxu1 %v5297_v10 }
 0x53b   :  { %1910 = vmatprep.subr.bf16.mxu0 %v5300_v13  ;;  %1951 = vmatprep.subr.bf16.mxu1 %v5303_v15 }
 0x53e   :  { %1911 = vmatpush1.bf16.msra.mxu0 %v5306_v17  ;;  %1952 = vmatpush1.bf16.msra.mxu1 %v5309_v18 }
 0x53f   :  { %1912 = vmatprep.subr.bf16.mxu0 %v5312_v20  ;;  %1953 = vmatprep.subr.bf16.mxu1 %v5315_v21 }
 0x542   :  { %1913 = vmatpush1.bf16.msra.mxu0 %v5318_v23  ;;  %1954 = vmatpush1.bf16.msra.mxu1 %v5321_v24 }
 0x543   :  { %1914 = vmatprep.subr.bf16.mxu0 %v5324_v27  ;;  %1955 = vmatprep.subr.bf16.mxu1 %v5327_v28 }
 0x546   :  { %1915 = vmatpush1.bf16.msra.mxu0 %v5330_v29  ;;  %1956 = vmatpush1.bf16.msra.mxu1 %v6510_v1 }
 0x547   :  { %1916 = vmatprep.subr.bf16.mxu0 %v6511_v63  ;;  %1957 = vmatprep.subr.bf16.mxu1 %v6512_v16 }
 0x54a   :  { %1917 = vmatpush1.bf16.msra.mxu0 %v6513_v11  ;;  %1958 = vmatpush1.bf16.msra.mxu1 %v6514_v26 }
 0x54b   :  { %1918 = vmatprep.subr.bf16.mxu0 %v6515_v58  ;;  %1959 = vmatprep.subr.bf16.mxu1 %v6516_v52 }
 0x54e   :  { %1919 = vmatpush1.bf16.msra.mxu0 %v6517_v34  ;;  %1960 = vmatpush1.bf16.msra.mxu1 %v6518_v6 }
 0x54f   :  { %1920 = vmatprep.subr.bf16.mxu0 %v6519_v61  ;;  %1961 = vmatprep.subr.bf16.mxu1 %v6520_v53 }
 0x552   :  { %1921 = vmatpush1.bf16.msra.mxu0 %v6521_v19  ;;  %1962 = vmatpush1.bf16.msra.mxu1 %v6522_v3 }
 0x553   :  { %1922 = vmatprep.subr.bf16.mxu0 %v6523_v2  ;;  %1963 = vmatprep.subr.bf16.mxu1 %v6524_v14 }
 0x556   :  { %1923 = vmatpush1.bf16.msra.mxu0 %v6525_v54  ;;  %1964 = vmatpush1.bf16.msra.mxu1 %v6526_v0 }
 0x557   :  { %1924 = vmatprep.subr.bf16.mxu0 %v6527_v5  ;;  %1965 = vmatprep.subr.bf16.mxu1 %v6528_v57 }
 0x55a   :  { %1925 = vmatpush1.bf16.msra.mxu0 %v6529_v48  ;;  %1966 = vmatpush1.bf16.msra.mxu1 %v6530_v4 }
 0x55b   :  { %1926 = vmatprep.subr.bf16.mxu0 %v6531_v55  ;;  %1967 = vmatprep.subr.bf16.mxu1 %v6532_v49 }
 0x55e   :  { %1927 = vmatpush1.bf16.msra.mxu0 %v6533_v37  ;;  %1968 = vmatpush1.bf16.msra.mxu1 %v6534_v25  ;;  %v6562_v37 = vld [vmem:[#allocation25_spill] sm:$0xff] }
 0x55f   :  { %1928 = vmatprep.subr.bf16.mxu0 %v6535_v46  ;;  %1969 = vmatprep.subr.bf16.mxu1 %v6536_v47 }
 0x562   :  { %1929 = vmatpush1.bf16.msra.mxu0 %v6537_v38  ;;  %1970 = vmatpush1.bf16.msra.mxu1 %v6538_v41 }
 0x563   :  { %1930 = vmatprep.subr.bf16.mxu0 %v6539_v35  ;;  %1971 = vmatprep.subr.bf16.mxu1 %v6540_v31 }
 0x566   :  { %1931 = vmatpush1.bf16.msra.mxu0 %v6541_v42  ;;  %1972 = vmatpush1.bf16.msra.mxu1 %v6542_v30  ;;  %v6552_v42 = vld [vmem:[#allocation67_spill] sm:$0xff]  ;;  %v6553_v30 = vld [vmem:[#allocation68_spill] sm:$0xff] }
 0x567   :  { %1932 = vmatprep.subr.bf16.mxu0 %v6543_v43  ;;  %1973 = vmatprep.subr.bf16.mxu1 %v6544_v36  ;;  %v6554_v43 = vld [vmem:[#allocation69_spill] sm:$0xff]  ;;  %v6555_v36 = vld [vmem:[#allocation22_spill] sm:$0xff] }
 0x56a   :  { %1933 = vmatpush1.bf16.msra.mxu0 %v6545_v50  ;;  %1974 = vmatpush1.bf16.msra.mxu1 %v6546_v44  ;;  %v6556_v50 = vld [vmem:[#allocation73_spill] sm:$0xff]  ;;  %v6557_v44 = vld [vmem:[#allocation74_spill] sm:$0xff] }
 0x56b   :  { %1934 = vmatprep.subr.bf16.mxu0 %v6547_v22  ;;  %1975 = vmatprep.subr.bf16.mxu1 %v6548_v59  ;;  %v6558_v22 = vld [vmem:[#allocation76_spill] sm:$0xff]  ;;  %v5602_v59 = vld [vmem:[#allocation9 + $0x4] ss:$12 sps:$4 sm:$0xff]  }
 0x56c   :  { %6559 = vst [vmem:[#allocation26_spill] sm:$0xff] %v5602_v59 }
 0x56e   :  { %1935 = vmatpush1.bf16.msra.mxu0 %v6549_v60  ;;  %1976 = vmatpush1.bf16.msra.mxu1 %v6550_v45  ;;  %v6560_v45 = vld [vmem:[#allocation23_spill] sm:$0xff] }
 0x56f   :  { %1936 = vmatprep.subr.bf16.mxu0 %v6551_v32  ;;  %1977 = vmatprep.subr.bf16.mxu1 %v6552_v42 }
 0x572   :  { %1937 = vmatpush1.bf16.msra.mxu0 %v6553_v30  ;;  %1978 = vmatpush1.bf16.msra.mxu1 %v6554_v43 }
 0x573   :  { %1938 = vmatprep.subr.bf16.mxu0 %v6555_v36  ;;  %1979 = vmatprep.subr.bf16.mxu1 %v6556_v50 }
 0x576   :  { %1939 = vmatpush1.bf16.msra.mxu0 %v6557_v44  ;;  %1980 = vmatpush1.bf16.msra.mxu1 %v6558_v22  ;;  %v6561_v44 = vld [vmem:[#allocation24_spill] sm:$0xff] }
 0x577   :  { %2014 = vmatprep.subr.bf16.mxu0 %v5602_v59  ;;  %3522 = vmatprep.subr.bf16.mxu1 %v6335_v12 }
 0x5ec   :  { %v1729_v32 = vpop.f32.mrb[44].mxu0  ;;  %v1770_v42 = vpop.f32.mrb[36].mxu1 }
 0x5ed   :  { %v1730_v30 = vadd.f32 %v1729_v32, %v6560_v45  ;;  %v1731_v60 = vpop.f32.mrb[45].mxu0  ;;  %v1772_v43 = vpop.f32.mrb[37].mxu1  ;;  %v1771_v45 = vadd.f32 %v1770_v42, %v5075_v56 }
 0x5ee   :  { %v1733_v31 = vpop.f32.mrb[46].mxu0  ;;  %v1774_v36 = vpop.f32.mrb[38].mxu1  ;;  %v1732_v38 = vadd.f32 %v1731_v60, %v6561_v44  ;;  %v1773_v49 = vadd.f32 %v1772_v43, %v6562_v37  ;;  %v6564_v60 = vld [vmem:[#allocation81_spill] sm:$0xff] }
 0x5ef   :  { %v3259_v35 = vmul.f32 -1.442695, %v1730_v30  ;;  %v1734_v50 = vpop.f32.mrb[47].mxu0  ;;  %v1775_v41 = vpop.f32.mrb[39].mxu1 }
 0x5f0   :  { %v3260_v22 = vmul.f32 -1.442695, %v1732_v38  ;;  %v6563_v50 = vld [vmem:[#allocation80_spill] sm:$0xff] }
 0x5f1   :  { %3893 = vpow2.f32 %v3259_v35 }
 0x5f2   :  { %3895 = vpow2.f32 %v3260_v22 }
 0x5fb   :  { %v3894_v47 = vpop.eup %3893 }
 0x5fc   :  { %v1783_v59 = vadd.f32 1.0, %v3894_v47  ;;  %v3896_v46 = vpop.eup %3895 }
 0x5fd   :  { %v1784_v25 = vadd.f32 1.0, %v3896_v46 }
 0x5fe   :  { %3897 = vrcp.f32 %v1783_v59 }
 0x5ff   :  { %3899 = vrcp.f32 %v1784_v25 }
 0x608   :  { %v3898_v32 = vpop.eup %3897 }
 0x609   :  { %v1789_v31 = vmul.f32 %v3898_v32, %v1773_v49  ;;  %v3900_v37 = vpop.eup %3899 }
 0x60a   :  { %v1792_v25 = vsub.f32 1.0, %v3900_v37  ;;  %v1794_v32 = vmul.f32 %v3900_v37, %v5489_v40  ;;  %v6565_v40 = vld [vmem:[#allocation85_spill] sm:$0xff] }
 0x60b   :  { %v1790_v30 = vadd.f32 %v1789_v31, %v1771_v45 }
 0x60c   :  { %v1838_v36 = vpop.f32.mrb[48].mxu0  ;;  %v1879_v41 = vpop.f32.mrb[40].mxu1 }
 0x60d   :  { %3901 = vtanh.f32 %v1790_v30  ;;  %v1885_v35 = vadd.f32 %v1838_v36, %v6563_v50  ;;  %v1840_v38 = vpop.f32.mrb[49].mxu0  ;;  %v3520_v22 = vpop.f32.mrb[41].mxu1 }
 0x60e   :  { %v1886_v47 = vadd.f32 %v1840_v38, %v6564_v60  ;;  %v1842_v59 = vpop.f32.mrb[50].mxu0  ;;  %v1882_v44 = vpop.f32.mrb[42].mxu1  ;;  %v1899_v38 = vadd.f32 %v5496_v39, %v1879_v41  ;;  %v5624_v41 = vld [vmem:[#allocation9] ss:$12 sps:$4 sm:$0xff]  }
 0x60f   :  { %v3261_v46 = vmul.f32 -1.442695, %v1885_v35  ;;  %v1843_v55 = vpop.f32.mrb[51].mxu0  ;;  %v3521_v43 = vpop.f32.mrb[43].mxu1 }
 0x610   :  { %v3262_v42 = vmul.f32 -1.442695, %v1886_v47 }
 0x611   :  { %3903 = vpow2.f32 %v3261_v46 }
 0x612   :  { %3905 = vpow2.f32 %v3262_v42 }
 0x617   :  { %v3902_v49 = vpop.eup %3901 }
 0x618   :  { %v1793_v45 = vmul.f32 %v3902_v49, %v1792_v25 }
 0x61a   :  { %v5613_v31 = vadd.f32 %v1794_v32, %v1793_v45  ;;  %v5627_v45 = vld [vmem:[#allocation9 + $0x8] ss:$12 sps:$4 sm:$0xff]  }
 0x61b   :  { %v3904_v30 = vpop.eup %3903  ;;  %v5630_v32 = vld [vmem:[#allocation9 + $0x1c] ss:$12 sps:$4 sm:$0xff]  }
 0x61c   :  { %v1893_v36 = vadd.f32 1.0, %v3904_v30  ;;  %v1796_v50 = vpack.c.bf16 %v5613_v31, %v5613_v31  ;;  %v3906_v55 = vpop.eup %3905  ;;  %v5640_v30 = vld [vmem:[#allocation9 + $0x20] ss:$12 sps:$4 sm:$0xff]  }
 0x61d   :  { %v1894_v35 = vadd.f32 1.0, %v3906_v55  ;;  %v5653_v55 = vld [vmem:[#allocation9 + $0x4c] ss:$12 sps:$4 sm:$0xff]  }
 0x61e   :  { %3907 = vrcp.f32 %v1893_v36  ;;  %v1798_v44 = vrot.slane %v1796_v50, 4  ;;  %1940 = vmatprep.mubr.bf16.mxu0 %v1796_v50  ;;  %1981 = vmatprep.mubr.bf16.mxu1 %v1796_v50  ;;  %v5643_v36 = vld [vmem:[#allocation9 + $0x34] ss:$12 sps:$4 sm:$0xff]   ;;  %v5647_v50 = vld [vmem:[#allocation9 + $0x30] ss:$12 sps:$4 sm:$0xff]  }
 0x61f   :  { %3909 = vrcp.f32 %v1894_v35  ;;  %v5657_v35 = vld [vmem:[#allocation9 + $0x48] ss:$12 sps:$4 sm:$0xff]  }
 0x620   :  { %1800 = vst [vmem:[#allocation3 + $0x8] sm:$0xf0] %v1798_v44  ;;  %v5650_v44 = vld [vmem:[#allocation9 + $0x38] ss:$12 sps:$4 sm:$0xff]  }
 0x628   :  { %v3908_v22 = vpop.eup %3907 }
 0x629   :  { %v1900_v60 = vmul.f32 %v3908_v22, %v1899_v38  ;;  %v3910_v47 = vpop.eup %3909  ;;  %v5660_v38 = vld [vmem:[#allocation9 + $0x50] ss:$12 sps:$4 sm:$0xff]  }
 0x62a   :  { %v1903_v59 = vsub.f32 1.0, %v3910_v47  ;;  %v1905_v42 = vmul.f32 %v3910_v47, %v5501_v33  ;;  %v5637_v33 = vld [vmem:[#allocation9 + $0x18] ss:$12 sps:$4 sm:$0xff]  }
 0x62b   :  { %v1901_v37 = vadd.f32 %v1900_v60, %v6565_v40  ;;  %v5663_v22 = vld [vmem:[#allocation9 + $0x64] ss:$12 sps:$4 sm:$0xff]   ;;  %v5667_v60 = vld [vmem:[#allocation9 + $0x60] ss:$12 sps:$4 sm:$0xff]   ;;  %v5670_v40 = vld [vmem:[#allocation9 + $0x68] ss:$12 sps:$4 sm:$0xff]  }
 0x62c   :  { %v5677_v47 = vld [vmem:[#allocation9 + $0x78] ss:$12 sps:$4 sm:$0xff]  }
 0x62d   :  { %3911 = vtanh.f32 %v1901_v37  ;;  %v5673_v37 = vld [vmem:[#allocation9 + $0x7c] ss:$12 sps:$4 sm:$0xff]  }
 0x62e   :  { %6566 = vst [vmem:[#allocation27_spill] sm:$0xff] %v5673_v37 }
 0x637   :  { %v3912_v46 = vpop.eup %3911 }
 0x638   :  { %v1904_v43 = vmul.f32 %v3912_v46, %v1903_v59  ;;  %v5680_v59 = vld [vmem:[#allocation9 + $0x80] ss:$12 sps:$4 sm:$0xff]  }
 0x639   :  { %6567 = vst [vmem:[#allocation28_spill] sm:$0xff] %v5680_v59  ;;  %v5683_v46 = vld [vmem:[#allocation9 + $0x94] ss:$12 sps:$4 sm:$0xff]  }
 0x63a   :  { %v5620_v25 = vadd.f32 %v1905_v42, %v1904_v43  ;;  %v5687_v43 = vld [vmem:[#allocation9 + $0x90] ss:$12 sps:$4 sm:$0xff]   ;;  %v5690_v42 = vld [vmem:[#allocation9 + $0x98] ss:$12 sps:$4 sm:$0xff]  }
 0x63c   :  { %v1907_v49 = vpack.c.bf16 %v5620_v25, %v5620_v25 }
 0x63e   :  { %1941 = vmatmul.mubr.bf16.vlgmr.msra.gmra.mrb[52].mxu0 %v1907_v49  ;;  %1982 = vmatmul.mubr.bf16.vlgmr.msra.gmra.mrb[44].mxu1 %v1907_v49 }
 0x63f   :  { %2015 = vmatpush1.bf16.msra.mxu0 %v5624_v41  ;;  %3523 = vmatpush3.bf16.msra.mxu1 %v5627_v45 }
 0x640   :  { %2016 = vmatprep.subr.bf16.mxu0 %v5630_v32  ;;  %3524 = vmatprep.subr.bf16.mxu1 %v6335_v12 }
 0x641   :  { %2046 = vmatprep.mubr.bf16.mxu0 %v6358_v62  ;;  %3538 = vmatprep.mubr.msk.bf16.mxu1 %vm4396_vm2, %v6335_v12 }
 0x643   :  { %2017 = vmatpush1.bf16.msra.mxu0 %v5637_v33  ;;  %3525 = vmatpush3.bf16.msra.mxu1 %v5640_v30 }
 0x644   :  { %2018 = vmatprep.subr.bf16.mxu0 %v5643_v36  ;;  %3526 = vmatprep.subr.bf16.mxu1 %v6335_v12 }
 0x647   :  { %2019 = vmatpush1.bf16.msra.mxu0 %v5647_v50  ;;  %3527 = vmatpush3.bf16.msra.mxu1 %v5650_v44 }
 0x648   :  { %2020 = vmatprep.subr.bf16.mxu0 %v5653_v55  ;;  %3528 = vmatprep.subr.bf16.mxu1 %v6335_v12 }
 0x64b   :  { %2021 = vmatpush1.bf16.msra.mxu0 %v5657_v35  ;;  %3529 = vmatpush3.bf16.msra.mxu1 %v5660_v38 }
 0x64c   :  { %2022 = vmatprep.subr.bf16.mxu0 %v5663_v22  ;;  %3530 = vmatprep.subr.bf16.mxu1 %v6335_v12 }
 0x64f   :  { %2023 = vmatpush1.bf16.msra.mxu0 %v5667_v60  ;;  %3531 = vmatpush3.bf16.msra.mxu1 %v5670_v40 }
 0x650   :  { %2024 = vmatprep.subr.bf16.mxu0 %v5673_v37  ;;  %3532 = vmatprep.subr.bf16.mxu1 %v6335_v12  ;;  %v5693_v37 = vld [vmem:[#allocation9 + $0xac] ss:$12 sps:$4 sm:$0xff]  }
 0x653   :  { %2025 = vmatpush1.bf16.msra.mxu0 %v5677_v47  ;;  %3533 = vmatpush3.bf16.msra.mxu1 %v5680_v59  ;;  %v5697_v59 = vld [vmem:[#allocation9 + $0xa8] ss:$12 sps:$4 sm:$0xff]  }
 0x654   :  { %2026 = vmatprep.subr.bf16.mxu0 %v5683_v46  ;;  %3534 = vmatprep.subr.bf16.mxu1 %v6335_v12 }
 0x657   :  { %2027 = vmatpush1.bf16.msra.mxu0 %v5687_v43  ;;  %3535 = vmatpush3.bf16.msra.mxu1 %v5690_v42 }
 0x658   :  { %2028 = vmatprep.subr.bf16.mxu0 %v5693_v37  ;;  %3536 = vmatprep.subr.bf16.mxu1 %v6335_v12 }
 0x65b   :  { %2029 = vmatpush1.bf16.msra.mxu0 %v5697_v59  ;;  %3537 = vmatpush3.bf16.msra.mxu1 %v5285_v51 }
 0x65c   :  { %2118 = vmatprep.subr.bf16.mxu0 %v5288_v7  ;;  %2159 = vmatprep.subr.bf16.mxu1 %v5291_v8 }
 0x65e   :  { %2047 = vmatmul.mubr.bf16.vlgmr.msra.gmra.mrb[56].mxu0 %v1907_v49  ;;  %3539 = vmatmul.mubr.bf16.vlgmr.msra.gmra.mrb[48].mxu1 %v1907_v49  ;;  %v6568_v49 = vld [vmem:[#allocation46_spill] sm:$0xff] }
 0x65f   :  { %2119 = vmatpush1.bf16.msra.mxu0 %v5294_v9  ;;  %2160 = vmatpush1.bf16.msra.mxu1 %v5297_v10 }
 0x660   :  { %2120 = vmatprep.subr.bf16.mxu0 %v5300_v13  ;;  %2161 = vmatprep.subr.bf16.mxu1 %v5303_v15 }
 0x663   :  { %2121 = vmatpush1.bf16.msra.mxu0 %v5306_v17  ;;  %2162 = vmatpush1.bf16.msra.mxu1 %v5309_v18 }
 0x664   :  { %2122 = vmatprep.subr.bf16.mxu0 %v5312_v20  ;;  %2163 = vmatprep.subr.bf16.mxu1 %v5315_v21 }
 0x667   :  { %2123 = vmatpush1.bf16.msra.mxu0 %v5318_v23  ;;  %2164 = vmatpush1.bf16.msra.mxu1 %v5321_v24 }
 0x668   :  { %2124 = vmatprep.subr.bf16.mxu0 %v5324_v27  ;;  %2165 = vmatprep.subr.bf16.mxu1 %v5327_v28 }
 0x66b   :  { %2125 = vmatpush1.bf16.msra.mxu0 %v5330_v29  ;;  %2166 = vmatpush1.bf16.msra.mxu1 %v6510_v1 }
 0x66c   :  { %2126 = vmatprep.subr.bf16.mxu0 %v6511_v63  ;;  %2167 = vmatprep.subr.bf16.mxu1 %v6512_v16 }
 0x66f   :  { %2127 = vmatpush1.bf16.msra.mxu0 %v6513_v11  ;;  %2168 = vmatpush1.bf16.msra.mxu1 %v6514_v26  ;;  %v6599_v11 = vld [vmem:[#allocation25_spill] sm:$0xff] }
 0x670   :  { %2128 = vmatprep.subr.bf16.mxu0 %v6515_v58  ;;  %2169 = vmatprep.subr.bf16.mxu1 %v6516_v52 }
 0x673   :  { %2129 = vmatpush1.bf16.msra.mxu0 %v6517_v34  ;;  %2170 = vmatpush1.bf16.msra.mxu1 %v6518_v6 }
 0x674   :  { %2130 = vmatprep.subr.bf16.mxu0 %v6519_v61  ;;  %2171 = vmatprep.subr.bf16.mxu1 %v6520_v53 }
 0x677   :  { %2131 = vmatpush1.bf16.msra.mxu0 %v6521_v19  ;;  %2172 = vmatpush1.bf16.msra.mxu1 %v6522_v3  ;;  %v6569_v19 = vld [vmem:[#allocation47_spill] sm:$0xff]  ;;  %v6570_v3 = vld [vmem:[#allocation48_spill] sm:$0xff] }
 0x678   :  { %2132 = vmatprep.subr.bf16.mxu0 %v6523_v2  ;;  %2173 = vmatprep.subr.bf16.mxu1 %v6524_v14  ;;  %v6571_v2 = vld [vmem:[#allocation49_spill] sm:$0xff]  ;;  %v6572_v14 = vld [vmem:[#allocation50_spill] sm:$0xff] }
 0x67b   :  { %2133 = vmatpush1.bf16.msra.mxu0 %v6525_v54  ;;  %2174 = vmatpush1.bf16.msra.mxu1 %v6526_v0  ;;  %v6573_v54 = vld [vmem:[#allocation51_spill] sm:$0xff]  ;;  %v6574_v0 = vld [vmem:[#allocation52_spill] sm:$0xff] }
 0x67c   :  { %2134 = vmatprep.subr.bf16.mxu0 %v6527_v5  ;;  %2175 = vmatprep.subr.bf16.mxu1 %v6528_v57  ;;  %v6575_v5 = vld [vmem:[#allocation53_spill] sm:$0xff]  ;;  %v6576_v57 = vld [vmem:[#allocation54_spill] sm:$0xff] }
 0x67f   :  { %2135 = vmatpush1.bf16.msra.mxu0 %v6529_v48  ;;  %2176 = vmatpush1.bf16.msra.mxu1 %v6530_v4  ;;  %v6577_v48 = vld [vmem:[#allocation55_spill] sm:$0xff]  ;;  %v6578_v4 = vld [vmem:[#allocation56_spill] sm:$0xff] }
 0x680   :  { %2136 = vmatprep.subr.bf16.mxu0 %v6568_v49  ;;  %2177 = vmatprep.subr.bf16.mxu1 %v6569_v19  ;;  %v6579_v49 = vld [vmem:[#allocation57_spill] sm:$0xff]  ;;  %v6580_v19 = vld [vmem:[#allocation58_spill] sm:$0xff] }
 0x683   :  { %2137 = vmatpush1.bf16.msra.mxu0 %v6570_v3  ;;  %2178 = vmatpush1.bf16.msra.mxu1 %v6571_v2  ;;  %v6581_v3 = vld [vmem:[#allocation59_spill] sm:$0xff]  ;;  %v6582_v2 = vld [vmem:[#allocation60_spill] sm:$0xff] }
 0x684   :  { %2138 = vmatprep.subr.bf16.mxu0 %v6572_v14  ;;  %2179 = vmatprep.subr.bf16.mxu1 %v6573_v54  ;;  %v6583_v14 = vld [vmem:[#allocation61_spill] sm:$0xff]  ;;  %v6584_v54 = vld [vmem:[#allocation62_spill] sm:$0xff] }
 0x687   :  { %2139 = vmatpush1.bf16.msra.mxu0 %v6574_v0  ;;  %2180 = vmatpush1.bf16.msra.mxu1 %v6575_v5  ;;  %v6585_v0 = vld [vmem:[#allocation63_spill] sm:$0xff]  ;;  %v6586_v5 = vld [vmem:[#allocation64_spill] sm:$0xff] }
 0x688   :  { %2140 = vmatprep.subr.bf16.mxu0 %v6576_v57  ;;  %2181 = vmatprep.subr.bf16.mxu1 %v6577_v48  ;;  %v6587_v57 = vld [vmem:[#allocation65_spill] sm:$0xff]  ;;  %v6588_v48 = vld [vmem:[#allocation66_spill] sm:$0xff] }
 0x68b   :  { %2141 = vmatpush1.bf16.msra.mxu0 %v6578_v4  ;;  %2182 = vmatpush1.bf16.msra.mxu1 %v6579_v49  ;;  %v6589_v4 = vld [vmem:[#allocation67_spill] sm:$0xff]  ;;  %v6590_v49 = vld [vmem:[#allocation68_spill] sm:$0xff] }
 0x68c   :  { %2142 = vmatprep.subr.bf16.mxu0 %v6580_v19  ;;  %2183 = vmatprep.subr.bf16.mxu1 %v6581_v3  ;;  %v6591_v19 = vld [vmem:[#allocation69_spill] sm:$0xff]  ;;  %v6592_v3 = vld [vmem:[#allocation22_spill] sm:$0xff] }
 0x68f   :  { %2143 = vmatpush1.bf16.msra.mxu0 %v6582_v2  ;;  %2184 = vmatpush1.bf16.msra.mxu1 %v6583_v14  ;;  %v6593_v2 = vld [vmem:[#allocation73_spill] sm:$0xff]  ;;  %v6594_v14 = vld [vmem:[#allocation74_spill] sm:$0xff] }
 0x690   :  { %2144 = vmatprep.subr.bf16.mxu0 %v6584_v54  ;;  %2185 = vmatprep.subr.bf16.mxu1 %v6585_v0  ;;  %v6595_v54 = vld [vmem:[#allocation76_spill] sm:$0xff]  ;;  %v6596_v0 = vld [vmem:[#allocation26_spill] sm:$0xff] }
 0x693   :  { %2145 = vmatpush1.bf16.msra.mxu0 %v6586_v5  ;;  %2186 = vmatpush1.bf16.msra.mxu1 %v6587_v57  ;;  %v6597_v5 = vld [vmem:[#allocation23_spill] sm:$0xff] }
 0x694   :  { %2146 = vmatprep.subr.bf16.mxu0 %v6588_v48  ;;  %2187 = vmatprep.subr.bf16.mxu1 %v6589_v4 }
 0x697   :  { %2147 = vmatpush1.bf16.msra.mxu0 %v6590_v49  ;;  %2188 = vmatpush1.bf16.msra.mxu1 %v6591_v19 }
 0x698   :  { %2148 = vmatprep.subr.bf16.mxu0 %v6592_v3  ;;  %2189 = vmatprep.subr.bf16.mxu1 %v6593_v2  ;;  %v6598_v2 = vld [vmem:[#allocation24_spill] sm:$0xff] }
 0x69b   :  { %2149 = vmatpush1.bf16.msra.mxu0 %v6594_v14  ;;  %2190 = vmatpush1.bf16.msra.mxu1 %v6595_v54 }
 0x69c   :  { %2227 = vmatprep.subr.bf16.mxu0 %v6596_v0  ;;  %3542 = vmatprep.subr.bf16.mxu1 %v6335_v12 }
 0x711   :  { %v1942_v57 = vpop.f32.mrb[52].mxu0  ;;  %v1983_v48 = vpop.f32.mrb[44].mxu1 }
 0x712   :  { %v1943_v4 = vadd.f32 %v1942_v57, %v6597_v5  ;;  %v1944_v53 = vpop.f32.mrb[53].mxu0  ;;  %v1985_v49 = vpop.f32.mrb[45].mxu1  ;;  %v1984_v5 = vadd.f32 %v1983_v48, %v5075_v56 }
 0x713   :  { %v1946_v61 = vpop.f32.mrb[54].mxu0  ;;  %v1987_v19 = vpop.f32.mrb[46].mxu1  ;;  %v1945_v52 = vadd.f32 %v1944_v53, %v6598_v2  ;;  %v1986_v16 = vadd.f32 %v1985_v49, %v6599_v11  ;;  %v6600_v53 = vld [vmem:[#allocation82_spill] sm:$0xff] }
 0x714   :  { %v3263_v6 = vmul.f32 -1.442695, %v1943_v4  ;;  %v1947_v3 = vpop.f32.mrb[55].mxu0  ;;  %v1988_v34 = vpop.f32.mrb[47].mxu1  ;;  %v6601_v4 = vld [vmem:[#allocation84_spill] sm:$0xff] }
 0x715   :  { %v3264_v14 = vmul.f32 -1.442695, %v1945_v52 }
 0x716   :  { %3913 = vpow2.f32 %v3263_v6 }
 0x717   :  { %3915 = vpow2.f32 %v3264_v14 }
 0x720   :  { %v3914_v54 = vpop.eup %3913 }
 0x721   :  { %v1996_v0 = vadd.f32 1.0, %v3914_v54  ;;  %v3916_v58 = vpop.eup %3915 }
 0x722   :  { %v1997_v26 = vadd.f32 1.0, %v3916_v58 }
 0x723   :  { %3917 = vrcp.f32 %v1996_v0 }
 0x724   :  { %3919 = vrcp.f32 %v1997_v26 }
 0x72d   :  { %v3918_v57 = vpop.eup %3917 }
 0x72e   :  { %v2002_v61 = vmul.f32 %v3918_v57, %v1986_v16  ;;  %v3920_v11 = vpop.eup %3919 }
 0x72f   :  { %v2005_v26 = vsub.f32 1.0, %v3920_v11  ;;  %v2007_v57 = vmul.f32 %v3920_v11, %v5613_v31 }
 0x730   :  { %v2003_v19 = vadd.f32 %v2002_v61, %v1984_v5 }
 0x731   :  { %v2048_v3 = vpop.f32.mrb[56].mxu0  ;;  %v2089_v34 = vpop.f32.mrb[48].mxu1 }
 0x732   :  { %3921 = vtanh.f32 %v2003_v19  ;;  %v2095_v6 = vadd.f32 %v2048_v3, %v6600_v53  ;;  %v2050_v52 = vpop.f32.mrb[57].mxu0  ;;  %v3540_v14 = vpop.f32.mrb[49].mxu1 }
 0x733   :  { %v2096_v54 = vadd.f32 %v2050_v52, %v6601_v4  ;;  %v2052_v0 = vpop.f32.mrb[58].mxu0  ;;  %v2092_v2 = vpop.f32.mrb[50].mxu1  ;;  %v6602_v4 = vld [vmem:[#allocation87_spill] sm:$0xff] }
 0x734   :  { %v3265_v58 = vmul.f32 -1.442695, %v2095_v6  ;;  %v2053_v63 = vpop.f32.mrb[59].mxu0  ;;  %v3541_v49 = vpop.f32.mrb[51].mxu1  ;;  %v2109_v6 = vadd.f32 %v5496_v39, %v2089_v34  ;;  %v6603_v39 = vld [vmem:[#allocation27_spill] sm:$0xff] }
 0x735   :  { %v3266_v48 = vmul.f32 -1.442695, %v2096_v54  ;;  %v6622_v34 = vld [vmem:[#allocation43_spill] sm:$0xff] }
 0x736   :  { %3923 = vpow2.f32 %v3265_v58 }
 0x737   :  { %3925 = vpow2.f32 %v3266_v48 }
 0x73c   :  { %v3922_v16 = vpop.eup %3921 }
 0x73d   :  { %v2006_v5 = vmul.f32 %v3922_v16, %v2005_v26  ;;  %v6623_v16 = vld [vmem:[#allocation44_spill] sm:$0xff] }
 0x73f   :  { %v5774_v61 = vadd.f32 %v2007_v57, %v2006_v5  ;;  %v6624_v5 = vld [vmem:[#allocation45_spill] sm:$0xff]  ;;  %v6625_v57 = vld [vmem:[#allocation46_spill] sm:$0xff] }
 0x740   :  { %v3924_v19 = vpop.eup %3923 }
 0x741   :  { %v2103_v3 = vadd.f32 1.0, %v3924_v19  ;;  %v2009_v53 = vpack.c.bf16 %v5774_v61, %v5774_v61  ;;  %v3926_v63 = vpop.eup %3925  ;;  %v6626_v19 = vld [vmem:[#allocation47_spill] sm:$0xff] }
 0x742   :  { %v2104_v2 = vadd.f32 1.0, %v3926_v63  ;;  %v6629_v63 = vld [vmem:[#allocation50_spill] sm:$0xff] }
 0x743   :  { %3927 = vrcp.f32 %v2103_v3  ;;  %2010 = vst [vmem:[#allocation3 + $0x10] sm:$0xf] %v2009_v53  ;;  %2150 = vmatprep.mubr.bf16.mxu0 %v2009_v53  ;;  %2191 = vmatprep.mubr.bf16.mxu1 %v2009_v53  ;;  %v6627_v3 = vld [vmem:[#allocation48_spill] sm:$0xff]  ;;  %v6628_v53 = vld [vmem:[#allocation49_spill] sm:$0xff] }
 0x744   :  { %3929 = vrcp.f32 %v2104_v2  ;;  %v6630_v2 = vld [vmem:[#allocation51_spill] sm:$0xff] }
 0x74d   :  { %v3928_v52 = vpop.eup %3927 }
 0x74e   :  { %v2110_v14 = vmul.f32 %v3928_v52, %v2109_v6  ;;  %v3930_v31 = vpop.eup %3929  ;;  %v6631_v6 = vld [vmem:[#allocation52_spill] sm:$0xff]  ;;  %v6632_v52 = vld [vmem:[#allocation53_spill] sm:$0xff] }
 0x74f   :  { %v2113_v54 = vsub.f32 1.0, %v3930_v31  ;;  %v2115_v49 = vmul.f32 %v3930_v31, %v5620_v25  ;;  %v6604_v25 = vld [vmem:[#allocation28_spill] sm:$0xff]  ;;  %v6636_v31 = vld [vmem:[#allocation57_spill] sm:$0xff] }
 0x750   :  { %v2111_v11 = vadd.f32 %v2110_v14, %v6602_v4  ;;  %v6633_v14 = vld [vmem:[#allocation54_spill] sm:$0xff]  ;;  %v6634_v4 = vld [vmem:[#allocation55_spill] sm:$0xff] }
 0x752   :  { %3931 = vtanh.f32 %v2111_v11  ;;  %v6635_v11 = vld [vmem:[#allocation56_spill] sm:$0xff] }
 0x75c   :  { %v3932_v0 = vpop.eup %3931 }
 0x75d   :  { %v2114_v58 = vmul.f32 %v3932_v0, %v2113_v54  ;;  %v6637_v54 = vld [vmem:[#allocation58_spill] sm:$0xff]  ;;  %v6638_v0 = vld [vmem:[#allocation59_spill] sm:$0xff] }
 0x75f   :  { %v5781_v48 = vadd.f32 %v2115_v49, %v2114_v58  ;;  %v6639_v58 = vld [vmem:[#allocation60_spill] sm:$0xff]  ;;  %v6640_v49 = vld [vmem:[#allocation61_spill] sm:$0xff] }
 0x761   :  { %v2117_v26 = vpack.c.bf16 %v5781_v48, %v5781_v48 }
 0x763   :  { %2151 = vmatmul.mubr.bf16.vlgmr.msra.gmra.mrb[60].mxu0 %v2117_v26  ;;  %2192 = vmatmul.mubr.bf16.vlgmr.msra.gmra.mrb[52].mxu1 %v2117_v26 }
 0x764   :  { %2228 = vmatpush1.bf16.msra.mxu0 %v5624_v41  ;;  %3543 = vmatpush3.bf16.msra.mxu1 %v5627_v45 }
 0x765   :  { %2229 = vmatprep.subr.bf16.mxu0 %v5630_v32  ;;  %3544 = vmatprep.subr.bf16.mxu1 %v6335_v12 }
 0x766   :  { %2259 = vmatprep.mubr.bf16.mxu0 %v6358_v62  ;;  %3558 = vmatprep.mubr.msk.bf16.mxu1 %vm4396_vm2, %v6335_v12 }
 0x768   :  { %2230 = vmatpush1.bf16.msra.mxu0 %v5637_v33  ;;  %3545 = vmatpush3.bf16.msra.mxu1 %v5640_v30 }
 0x769   :  { %2231 = vmatprep.subr.bf16.mxu0 %v5643_v36  ;;  %3546 = vmatprep.subr.bf16.mxu1 %v6335_v12 }
 0x76c   :  { %2232 = vmatpush1.bf16.msra.mxu0 %v5647_v50  ;;  %3547 = vmatpush3.bf16.msra.mxu1 %v5650_v44 }
 0x76d   :  { %2233 = vmatprep.subr.bf16.mxu0 %v5653_v55  ;;  %3548 = vmatprep.subr.bf16.mxu1 %v6335_v12 }
 0x770   :  { %2234 = vmatpush1.bf16.msra.mxu0 %v5657_v35  ;;  %3549 = vmatpush3.bf16.msra.mxu1 %v5660_v38 }
 0x771   :  { %2235 = vmatprep.subr.bf16.mxu0 %v5663_v22  ;;  %3550 = vmatprep.subr.bf16.mxu1 %v6335_v12 }
 0x774   :  { %2236 = vmatpush1.bf16.msra.mxu0 %v5667_v60  ;;  %3551 = vmatpush3.bf16.msra.mxu1 %v5670_v40 }
 0x775   :  { %2237 = vmatprep.subr.bf16.mxu0 %v6603_v39  ;;  %3552 = vmatprep.subr.bf16.mxu1 %v6335_v12 }
 0x778   :  { %2238 = vmatpush1.bf16.msra.mxu0 %v5677_v47  ;;  %3553 = vmatpush3.bf16.msra.mxu1 %v6604_v25 }
 0x779   :  { %2239 = vmatprep.subr.bf16.mxu0 %v5683_v46  ;;  %3554 = vmatprep.subr.bf16.mxu1 %v6335_v12 }
 0x77c   :  { %2240 = vmatpush1.bf16.msra.mxu0 %v5687_v43  ;;  %3555 = vmatpush3.bf16.msra.mxu1 %v5690_v42 }
 0x77d   :  { %2241 = vmatprep.subr.bf16.mxu0 %v5693_v37  ;;  %3556 = vmatprep.subr.bf16.mxu1 %v6335_v12 }
 0x780   :  { %2242 = vmatpush1.bf16.msra.mxu0 %v5697_v59  ;;  %3557 = vmatpush3.bf16.msra.mxu1 %v5285_v51  ;;  %v6605_v51 = vld [vmem:[#allocation30_spill] sm:$0xff] }
 0x781   :  { %2331 = vmatprep.subr.bf16.mxu0 %v5288_v7  ;;  %2372 = vmatprep.subr.bf16.mxu1 %v5291_v8  ;;  %v6606_v7 = vld [vmem:[#allocation31_spill] sm:$0xff]  ;;  %v6607_v8 = vld [vmem:[#allocation32_spill] sm:$0xff] }
 0x783   :  { %2260 = vmatmul.mubr.bf16.vlgmr.msra.gmra.mrb[64].mxu0 %v2117_v26  ;;  %3559 = vmatmul.mubr.bf16.vlgmr.msra.gmra.mrb[56].mxu1 %v2117_v26  ;;  %v6641_v26 = vld [vmem:[#allocation62_spill] sm:$0xff] }
 0x784   :  { %2332 = vmatpush1.bf16.msra.mxu0 %v5294_v9  ;;  %2373 = vmatpush1.bf16.msra.mxu1 %v5297_v10  ;;  %v6608_v9 = vld [vmem:[#allocation33_spill] sm:$0xff]  ;;  %v6609_v10 = vld [vmem:[#allocation34_spill] sm:$0xff] }
 0x785   :  { %2333 = vmatprep.subr.bf16.mxu0 %v5300_v13  ;;  %2374 = vmatprep.subr.bf16.mxu1 %v5303_v15  ;;  %v6610_v13 = vld [vmem:[#allocation35_spill] sm:$0xff]  ;;  %v6611_v15 = vld [vmem:[#allocation36_spill] sm:$0xff] }
 0x788   :  { %2334 = vmatpush1.bf16.msra.mxu0 %v5306_v17  ;;  %2375 = vmatpush1.bf16.msra.mxu1 %v5309_v18  ;;  %v6612_v17 = vld [vmem:[#allocation37_spill] sm:$0xff]  ;;  %v6613_v18 = vld [vmem:[#allocation38_spill] sm:$0xff] }
 0x789   :  { %2335 = vmatprep.subr.bf16.mxu0 %v5312_v20  ;;  %2376 = vmatprep.subr.bf16.mxu1 %v5315_v21  ;;  %v6614_v20 = vld [vmem:[#allocation39_spill] sm:$0xff]  ;;  %v6615_v21 = vld [vmem:[#allocation40_spill] sm:$0xff] }
 0x78c   :  { %2336 = vmatpush1.bf16.msra.mxu0 %v5318_v23  ;;  %2377 = vmatpush1.bf16.msra.mxu1 %v5321_v24  ;;  %v6616_v23 = vld [vmem:[#allocation41_spill] sm:$0xff]  ;;  %v6617_v24 = vld [vmem:[#allocation42_spill] sm:$0xff] }
 0x78d   :  { %2337 = vmatprep.subr.bf16.mxu0 %v5324_v27  ;;  %2378 = vmatprep.subr.bf16.mxu1 %v5327_v28  ;;  %v6618_v27 = vld [vmem:[#allocation70_spill] sm:$0xff]  ;;  %v6619_v28 = vld [vmem:[#allocation71_spill] sm:$0xff] }
 0x790   :  { %2338 = vmatpush1.bf16.msra.mxu0 %v5330_v29  ;;  %2379 = vmatpush1.bf16.msra.mxu1 %v6510_v1  ;;  %v6620_v29 = vld [vmem:[#allocation72_spill] sm:$0xff]  ;;  %v6621_v1 = vld [vmem:[#allocation79_spill] sm:$0xff] }
 0x791   :  { %2339 = vmatprep.subr.bf16.mxu0 %v6605_v51  ;;  %2380 = vmatprep.subr.bf16.mxu1 %v6606_v7  ;;  %v6642_v51 = vld [vmem:[#allocation63_spill] sm:$0xff]  ;;  %v6643_v7 = vld [vmem:[#allocation64_spill] sm:$0xff] }
 0x794   :  { %2340 = vmatpush1.bf16.msra.mxu0 %v6607_v8  ;;  %2381 = vmatpush1.bf16.msra.mxu1 %v6608_v9  ;;  %v6644_v8 = vld [vmem:[#allocation65_spill] sm:$0xff]  ;;  %v6645_v9 = vld [vmem:[#allocation66_spill] sm:$0xff] }
 0x795   :  { %2341 = vmatprep.subr.bf16.mxu0 %v6609_v10  ;;  %2382 = vmatprep.subr.bf16.mxu1 %v6610_v13  ;;  %v6646_v10 = vld [vmem:[#allocation67_spill] sm:$0xff]  ;;  %v6647_v13 = vld [vmem:[#allocation68_spill] sm:$0xff] }
 0x798   :  { %2342 = vmatpush1.bf16.msra.mxu0 %v6611_v15  ;;  %2383 = vmatpush1.bf16.msra.mxu1 %v6612_v17  ;;  %v6648_v15 = vld [vmem:[#allocation69_spill] sm:$0xff]  ;;  %v6649_v17 = vld [vmem:[#allocation22_spill] sm:$0xff] }
 0x799   :  { %2343 = vmatprep.subr.bf16.mxu0 %v6613_v18  ;;  %2384 = vmatprep.subr.bf16.mxu1 %v6614_v20  ;;  %v6650_v18 = vld [vmem:[#allocation73_spill] sm:$0xff]  ;;  %v6651_v20 = vld [vmem:[#allocation74_spill] sm:$0xff] }
 0x79c   :  { %2344 = vmatpush1.bf16.msra.mxu0 %v6615_v21  ;;  %2385 = vmatpush1.bf16.msra.mxu1 %v6616_v23  ;;  %v6652_v21 = vld [vmem:[#allocation76_spill] sm:$0xff]  ;;  %v6653_v23 = vld [vmem:[#allocation26_spill] sm:$0xff] }
 0x79d   :  { %2345 = vmatprep.subr.bf16.mxu0 %v6617_v24  ;;  %2386 = vmatprep.subr.bf16.mxu1 %v6618_v27 }
 0x7a0   :  { %2346 = vmatpush1.bf16.msra.mxu0 %v6619_v28  ;;  %2387 = vmatpush1.bf16.msra.mxu1 %v6620_v29  ;;  %v6654_v28 = vld [vmem:[#allocation23_spill] sm:$0xff] }
 0x7a1   :  { %2347 = vmatprep.subr.bf16.mxu0 %v6621_v1  ;;  %2388 = vmatprep.subr.bf16.mxu1 %v6622_v34 }
 0x7a4   :  { %2348 = vmatpush1.bf16.msra.mxu0 %v6623_v16  ;;  %2389 = vmatpush1.bf16.msra.mxu1 %v6624_v5 }
 0x7a5   :  { %2349 = vmatprep.subr.bf16.mxu0 %v6625_v57  ;;  %2390 = vmatprep.subr.bf16.mxu1 %v6626_v19 }
 0x7a8   :  { %2350 = vmatpush1.bf16.msra.mxu0 %v6627_v3  ;;  %2391 = vmatpush1.bf16.msra.mxu1 %v6628_v53  ;;  %v6655_v53 = vld [vmem:[#allocation24_spill] sm:$0xff] }
 0x7a9   :  { %2351 = vmatprep.subr.bf16.mxu0 %v6629_v63  ;;  %2392 = vmatprep.subr.bf16.mxu1 %v6630_v2 }
 0x7ac   :  { %2352 = vmatpush1.bf16.msra.mxu0 %v6631_v6  ;;  %2393 = vmatpush1.bf16.msra.mxu1 %v6632_v52 }
 0x7ad   :  { %2353 = vmatprep.subr.bf16.mxu0 %v6633_v14  ;;  %2394 = vmatprep.subr.bf16.mxu1 %v6634_v4 }
 0x7b0   :  { %2354 = vmatpush1.bf16.msra.mxu0 %v6635_v11  ;;  %2395 = vmatpush1.bf16.msra.mxu1 %v6636_v31  ;;  %v6656_v11 = vld [vmem:[#allocation25_spill] sm:$0xff] }
 0x7b1   :  { %2355 = vmatprep.subr.bf16.mxu0 %v6637_v54  ;;  %2396 = vmatprep.subr.bf16.mxu1 %v6638_v0 }
 0x7b4   :  { %2356 = vmatpush1.bf16.msra.mxu0 %v6639_v58  ;;  %2397 = vmatpush1.bf16.msra.mxu1 %v6640_v49 }
 0x7b5   :  { %2357 = vmatprep.subr.bf16.mxu0 %v6641_v26  ;;  %2398 = vmatprep.subr.bf16.mxu1 %v6642_v51 }
 0x7b8   :  { %2358 = vmatpush1.bf16.msra.mxu0 %v6643_v7  ;;  %2399 = vmatpush1.bf16.msra.mxu1 %v6644_v8  ;;  %v6657_v7 = vld [vmem:[#allocation88_spill] sm:$0xff] }
 0x7b9   :  { %2359 = vmatprep.subr.bf16.mxu0 %v6645_v9  ;;  %2400 = vmatprep.subr.bf16.mxu1 %v6646_v10 }
 0x7bc   :  { %2360 = vmatpush1.bf16.msra.mxu0 %v6647_v13  ;;  %2401 = vmatpush1.bf16.msra.mxu1 %v6648_v15  ;;  %v6658_v13 = vld [vmem:[#allocation89_spill] sm:$0xff] }
 0x7bd   :  { %2361 = vmatprep.subr.bf16.mxu0 %v6649_v17  ;;  %2402 = vmatprep.subr.bf16.mxu1 %v6650_v18 }
 0x7c0   :  { %2362 = vmatpush1.bf16.msra.mxu0 %v6651_v20  ;;  %2403 = vmatpush1.bf16.msra.mxu1 %v6652_v21 }
 0x7c1   :  { %2437 = vmatprep.subr.bf16.mxu0 %v6653_v23  ;;  %3562 = vmatprep.subr.bf16.mxu1 %v6335_v12 }
 0x836   :  { %v2152_v24 = vpop.f32.mrb[60].mxu0  ;;  %v2193_v27 = vpop.f32.mrb[52].mxu1 }
 0x837   :  { %v2153_v29 = vadd.f32 %v2152_v24, %v6654_v28  ;;  %v2154_v1 = vpop.f32.mrb[61].mxu0  ;;  %v2195_v34 = vpop.f32.mrb[53].mxu1  ;;  %v2194_v0 = vadd.f32 %v2193_v27, %v5075_v56 }
 0x838   :  { %v2156_v16 = vpop.f32.mrb[62].mxu0  ;;  %v2197_v5 = vpop.f32.mrb[54].mxu1  ;;  %v2155_v63 = vadd.f32 %v2154_v1, %v6655_v53  ;;  %v2196_v31 = vadd.f32 %v2195_v34, %v6656_v11 }
 0x839   :  { %v3267_v57 = vmul.f32 -1.442695, %v2153_v29  ;;  %v2157_v19 = vpop.f32.mrb[63].mxu0  ;;  %v2198_v3 = vpop.f32.mrb[55].mxu1 }
 0x83a   :  { %v3268_v2 = vmul.f32 -1.442695, %v2155_v63 }
 0x83b   :  { %3933 = vpow2.f32 %v3267_v57 }
 0x83c   :  { %3935 = vpow2.f32 %v3268_v2 }
 0x845   :  { %v3934_v6 = vpop.eup %3933 }
 0x846   :  { %v2206_v52 = vadd.f32 1.0, %v3934_v6  ;;  %v3936_v14 = vpop.eup %3935 }
 0x847   :  { %v2207_v4 = vadd.f32 1.0, %v3936_v14 }
 0x848   :  { %3937 = vrcp.f32 %v2206_v52  ;;  %v5898_v52 = vld [vmem:[%s6030_s4] ss:$0 sm:$0xff] }
 0x849   :  { %3939 = vrcp.f32 %v2207_v4 }
 0x852   :  { %v3938_v54 = vpop.eup %3937 }
 0x853   :  { %v2212_v58 = vmul.f32 %v3938_v54, %v2196_v31  ;;  %v3940_v24 = vpop.eup %3939  ;;  %v6659_v31 = vld [vmem:[#allocation83_spill] sm:$0xff] }
 0x854   :  { %v2215_v29 = vsub.f32 1.0, %v3940_v24  ;;  %v2217_v16 = vmul.f32 %v3940_v24, %v5774_v61  ;;  %v4163_v24 = vld [vmem:[#allocation10 + $0x104] ss:$16 sps:$4 sm:$0xff]  }
 0x855   :  { %v2213_v49 = vadd.f32 %v2212_v58, %v2194_v0 }
 0x856   :  { %v2261_v26 = vpop.f32.mrb[64].mxu0  ;;  %v2302_v51 = vpop.f32.mrb[56].mxu1 }
 0x857   :  { %3941 = vtanh.f32 %v2213_v49  ;;  %v2308_v8 = vadd.f32 %v2261_v26, %v6657_v7  ;;  %v2263_v9 = vpop.f32.mrb[65].mxu0  ;;  %v3560_v10 = vpop.f32.mrb[57].mxu1  ;;  %v2322_v61 = vadd.f32 %v5898_v52, %v2302_v51  ;;  %v4154_v51 = vld [vmem:[#allocation10 + $0xa8] ss:$16 sps:$4 sm:$0xff]  }
 0x858   :  { %v2309_v15 = vadd.f32 %v2263_v9, %v6658_v13  ;;  %v2265_v17 = vpop.f32.mrb[66].mxu0  ;;  %v2305_v18 = vpop.f32.mrb[58].mxu1  ;;  %v4155_v10 = vld [vmem:[#allocation10 + $0xc4] ss:$16 sps:$4 sm:$0xff]   ;;  %v4156_v13 = vld [vmem:[#allocation10 + $0xcc] ss:$16 sps:$4 sm:$0xff]  }
 0x859   :  { %v3269_v20 = vmul.f32 -1.442695, %v2308_v8  ;;  %v2266_v21 = vpop.f32.mrb[67].mxu0  ;;  %v3561_v23 = vpop.f32.mrb[59].mxu1  ;;  %v4158_v17 = vld [vmem:[#allocation10 + $0xc8] ss:$16 sps:$4 sm:$0xff]  }
 0x85a   :  { %v3270_v27 = vmul.f32 -1.442695, %v2309_v15  ;;  %v4157_v15 = vld [vmem:[#allocation10 + $0xc0] ss:$16 sps:$4 sm:$0xff]   ;;  %v4159_v18 = vld [vmem:[#allocation10 + $0xe4] ss:$16 sps:$4 sm:$0xff]  }
 0x85b   :  { %3943 = vpow2.f32 %v3269_v20  ;;  %v4160_v20 = vld [vmem:[#allocation10 + $0xec] ss:$16 sps:$4 sm:$0xff]   ;;  %v4161_v21 = vld [vmem:[#allocation10 + $0xe0] ss:$16 sps:$4 sm:$0xff]   ;;  %v4162_v23 = vld [vmem:[#allocation10 + $0xe8] ss:$16 sps:$4 sm:$0xff]  }
 0x85c   :  { %3945 = vpow2.f32 %v3270_v27  ;;  %v4164_v27 = vld [vmem:[#allocation10 + $0x10c] ss:$16 sps:$4 sm:$0xff]  }
 0x861   :  { %v3942_v1 = vpop.eup %3941 }
 0x862   :  { %v2216_v34 = vmul.f32 %v3942_v1, %v2215_v29  ;;  %v4165_v29 = vld [vmem:[#allocation10 + $0x100] ss:$16 sps:$4 sm:$0xff]   ;;  %v4166_v1 = vld [vmem:[#allocation10 + $0x108] ss:$16 sps:$4 sm:$0xff]  }
 0x864   :  { %v5891_v5 = vadd.f32 %v2217_v16, %v2216_v34  ;;  %v4167_v34 = vld [vmem:[#allocation10 + $0x124] ss:$16 sps:$4 sm:$0xff]   ;;  %v4168_v16 = vld [vmem:[#allocation10 + $0x12c] ss:$16 sps:$4 sm:$0xff]  }
 0x865   :  { %v3944_v57 = vpop.eup %3943 }
 0x866   :  { %v2316_v19 = vadd.f32 1.0, %v3944_v57  ;;  %v2219_v3 = vpack.c.bf16 %v5891_v5, %v5891_v5  ;;  %v3946_v2 = vpop.eup %3945  ;;  %v4169_v57 = vld [vmem:[#allocation10 + $0x120] ss:$16 sps:$4 sm:$0xff]  }
 0x867   :  { %v2317_v6 = vadd.f32 1.0, %v3946_v2  ;;  %v4173_v2 = vld [vmem:[#allocation10 + $0x140] ss:$16 sps:$4 sm:$0xff]  }
 0x868   :  { %3947 = vrcp.f32 %v2316_v19  ;;  %v2221_v63 = vrot.slane %v2219_v3, 4  ;;  %2363 = vmatprep.mubr.bf16.mxu0 %v2219_v3  ;;  %2404 = vmatprep.mubr.bf16.mxu1 %v2219_v3  ;;  %v4170_v19 = vld [vmem:[#allocation10 + $0x128] ss:$16 sps:$4 sm:$0xff]   ;;  %v4171_v3 = vld [vmem:[#allocation10 + $0x144] ss:$16 sps:$4 sm:$0xff]  }
 0x869   :  { %3949 = vrcp.f32 %v2317_v6  ;;  %v4174_v6 = vld [vmem:[#allocation10 + $0x148] ss:$16 sps:$4 sm:$0xff]  }
 0x86a   :  { %2223 = vst [vmem:[#allocation3 + $0x10] sm:$0xf0] %v2221_v63  ;;  %v4172_v63 = vld [vmem:[#allocation10 + $0x14c] ss:$16 sps:$4 sm:$0xff]  }
 0x872   :  { %v3948_v14 = vpop.eup %3947 }
 0x873   :  { %v2323_v4 = vmul.f32 %v3948_v14, %v2322_v61  ;;  %v3950_v0 = vpop.eup %3949  ;;  %v4175_v61 = vld [vmem:[#allocation10 + $0x164] ss:$16 sps:$4 sm:$0xff]   ;;  %v4176_v14 = vld [vmem:[#allocation10 + $0x16c] ss:$16 sps:$4 sm:$0xff]  }
 0x874   :  { %v2326_v58 = vsub.f32 1.0, %v3950_v0  ;;  %v2328_v7 = vmul.f32 %v3950_v0, %v5781_v48  ;;  %v4151_v48 = vld [vmem:[#allocation10 + $0xa4] ss:$16 sps:$4 sm:$0xff]   ;;  %v4180_v0 = vld [vmem:[#allocation10 + $0x18c] ss:$16 sps:$4 sm:$0xff]  }
 0x875   :  { %v2324_v54 = vadd.f32 %v2323_v4, %v6659_v31  ;;  %v4177_v4 = vld [vmem:[#allocation10 + $0x160] ss:$16 sps:$4 sm:$0xff]   ;;  %v4178_v31 = vld [vmem:[#allocation10 + $0x168] ss:$16 sps:$4 sm:$0xff]  }
 0x877   :  { %3951 = vtanh.f32 %v2324_v54  ;;  %v4179_v54 = vld [vmem:[#allocation10 + $0x184] ss:$16 sps:$4 sm:$0xff]  }
 0x881   :  { %v3952_v49 = vpop.eup %3951 }
 0x882   :  { %v2327_v26 = vmul.f32 %v3952_v49, %v2326_v58  ;;  %v4181_v58 = vld [vmem:[#allocation10 + $0x180] ss:$16 sps:$4 sm:$0xff]   ;;  %v4182_v49 = vld [vmem:[#allocation10 + $0x188] ss:$16 sps:$4 sm:$0xff]  }
 0x884   :  { %v5903_v8 = vadd.f32 %v2328_v7, %v2327_v26  ;;  %v4183_v26 = vld [vmem:[#allocation10 + $0x1a4] ss:$16 sps:$4 sm:$0xff]   ;;  %v4184_v7 = vld [vmem:[#allocation10 + $0x1ac] ss:$16 sps:$4 sm:$0xff]  }
 0x886   :  { %v2330_v9 = vpack.c.bf16 %v5903_v8, %v5903_v8 }
 0x888   :  { %2364 = vmatmul.mubr.bf16.vlgmr.msra.gmra.mrb[68].mxu0 %v2330_v9  ;;  %2405 = vmatmul.mubr.bf16.vlgmr.msra.gmra.mrb[60].mxu1 %v2330_v9 }
 0x889   :  { %2438 = vmatpush1.bf16.msra.mxu0 %v5624_v41  ;;  %3563 = vmatpush3.bf16.msra.mxu1 %v5627_v45  ;;  %v4131_v41 = vld [vmem:[#allocation10 + $0x4] ss:$16 sps:$4 sm:$0xff]   ;;  %v4132_v45 = vld [vmem:[#allocation10 + $0xc] ss:$16 sps:$4 sm:$0xff]  }
 0x88a   :  { %2439 = vmatprep.subr.bf16.mxu0 %v5630_v32  ;;  %3564 = vmatprep.subr.bf16.mxu1 %v6335_v12  ;;  %v4133_v32 = vld [vmem:[#allocation10] ss:$16 sps:$4 sm:$0xff]  }
 0x88b   :  { %2469 = vmatprep.mubr.bf16.mxu0 %v6358_v62  ;;  %3578 = vmatprep.mubr.msk.bf16.mxu1 %vm4396_vm2, %v6335_v12  ;;  %v4130_v62 = vld [vmem:[#allocation9 + $0xb0] ss:$12 sps:$4 sm:$0xff]  }
 0x88d   :  { %2440 = vmatpush1.bf16.msra.mxu0 %v5637_v33  ;;  %3565 = vmatpush3.bf16.msra.mxu1 %v5640_v30  ;;  %v4134_v33 = vld [vmem:[#allocation10 + $0x8] ss:$16 sps:$4 sm:$0xff]   ;;  %v4135_v30 = vld [vmem:[#allocation10 + $0x24] ss:$16 sps:$4 sm:$0xff]  }
 0x88e   :  { %2441 = vmatprep.subr.bf16.mxu0 %v5643_v36  ;;  %3566 = vmatprep.subr.bf16.mxu1 %v6335_v12  ;;  %v4136_v36 = vld [vmem:[#allocation10 + $0x2c] ss:$16 sps:$4 sm:$0xff]  }
 0x891   :  { %2442 = vmatpush1.bf16.msra.mxu0 %v5647_v50  ;;  %3567 = vmatpush3.bf16.msra.mxu1 %v5650_v44  ;;  %v4137_v50 = vld [vmem:[#allocation10 + $0x20] ss:$16 sps:$4 sm:$0xff]   ;;  %v4138_v44 = vld [vmem:[#allocation10 + $0x28] ss:$16 sps:$4 sm:$0xff]  }
 0x892   :  { %2443 = vmatprep.subr.bf16.mxu0 %v5653_v55  ;;  %3568 = vmatprep.subr.bf16.mxu1 %v6335_v12  ;;  %v4139_v55 = vld [vmem:[#allocation10 + $0x44] ss:$16 sps:$4 sm:$0xff]  }
 0x895   :  { %2444 = vmatpush1.bf16.msra.mxu0 %v5657_v35  ;;  %3569 = vmatpush3.bf16.msra.mxu1 %v5660_v38  ;;  %v4140_v35 = vld [vmem:[#allocation10 + $0x4c] ss:$16 sps:$4 sm:$0xff]   ;;  %v4141_v38 = vld [vmem:[#allocation10 + $0x40] ss:$16 sps:$4 sm:$0xff]  }
 0x896   :  { %2445 = vmatprep.subr.bf16.mxu0 %v5663_v22  ;;  %3570 = vmatprep.subr.bf16.mxu1 %v6335_v12  ;;  %v4142_v22 = vld [vmem:[#allocation10 + $0x48] ss:$16 sps:$4 sm:$0xff]  }
 0x899   :  { %2446 = vmatpush1.bf16.msra.mxu0 %v5667_v60  ;;  %3571 = vmatpush3.bf16.msra.mxu1 %v5670_v40  ;;  %v4143_v60 = vld [vmem:[#allocation10 + $0x64] ss:$16 sps:$4 sm:$0xff]   ;;  %v4144_v40 = vld [vmem:[#allocation10 + $0x6c] ss:$16 sps:$4 sm:$0xff]  }
 0x89a   :  { %2447 = vmatprep.subr.bf16.mxu0 %v6603_v39  ;;  %3572 = vmatprep.subr.bf16.mxu1 %v6335_v12  ;;  %v4152_v39 = vld [vmem:[#allocation10 + $0xac] ss:$16 sps:$4 sm:$0xff]  }
 0x89d   :  { %2448 = vmatpush1.bf16.msra.mxu0 %v5677_v47  ;;  %3573 = vmatpush3.bf16.msra.mxu1 %v6604_v25  ;;  %v4146_v47 = vld [vmem:[#allocation10 + $0x68] ss:$16 sps:$4 sm:$0xff]   ;;  %v4153_v25 = vld [vmem:[#allocation10 + $0xa0] ss:$16 sps:$4 sm:$0xff]  }
 0x89e   :  { %2449 = vmatprep.subr.bf16.mxu0 %v5683_v46  ;;  %3574 = vmatprep.subr.bf16.mxu1 %v6335_v12  ;;  %v4148_v46 = vld [vmem:[#allocation10 + $0x8c] ss:$16 sps:$4 sm:$0xff]  }
 0x8a1   :  { %2450 = vmatpush1.bf16.msra.mxu0 %v5687_v43  ;;  %3575 = vmatpush3.bf16.msra.mxu1 %v5690_v42  ;;  %v4149_v43 = vld [vmem:[#allocation10 + $0x80] ss:$16 sps:$4 sm:$0xff]   ;;  %v4150_v42 = vld [vmem:[#allocation10 + $0x88] ss:$16 sps:$4 sm:$0xff]  }
 0x8a2   :  { %2451 = vmatprep.subr.bf16.mxu0 %v5693_v37  ;;  %3576 = vmatprep.subr.bf16.mxu1 %v6335_v12  ;;  %v4145_v37 = vld [vmem:[#allocation10 + $0x60] ss:$16 sps:$4 sm:$0xff]  }
 0x8a5   :  { %2452 = vmatpush1.bf16.msra.mxu0 %v5697_v59  ;;  %3577 = vmatpush3.bf16.msra.mxu1 %v4130_v62  ;;  %v4147_v59 = vld [vmem:[#allocation10 + $0x84] ss:$16 sps:$4 sm:$0xff]   ;;  %v4186_v62 = vld [vmem:[#allocation10 + $0x1a8] ss:$16 sps:$4 sm:$0xff]  }
 0x8a6   :  { %2541 = vmatprep.subr.bf16.mxu0 %v4131_v41  ;;  %2582 = vmatprep.subr.bf16.mxu1 %v4132_v45  ;;  %v4187_v41 = vld [vmem:[#allocation10 + $0x1c4] ss:$16 sps:$4 sm:$0xff]   ;;  %v4188_v45 = vld [vmem:[#allocation10 + $0x1cc] ss:$16 sps:$4 sm:$0xff]  }
 0x8a8   :  { %2470 = vmatmul.mubr.bf16.vlgmr.msra.gmra.mrb[72].mxu0 %v2330_v9  ;;  %3579 = vmatmul.mubr.bf16.vlgmr.msra.gmra.mrb[64].mxu1 %v2330_v9  ;;  %v4185_v9 = vld [vmem:[#allocation10 + $0x1a0] ss:$16 sps:$4 sm:$0xff]  }
 0x8a9   :  { %2542 = vmatpush1.bf16.msra.mxu0 %v4133_v32  ;;  %2583 = vmatpush1.bf16.msra.mxu1 %v4134_v33  ;;  %v4189_v32 = vld [vmem:[#allocation10 + $0x1c0] ss:$16 sps:$4 sm:$0xff]   ;;  %v4190_v33 = vld [vmem:[#allocation10 + $0x1c8] ss:$16 sps:$4 sm:$0xff]  }
 0x8aa   :  { %2543 = vmatprep.subr.bf16.mxu0 %v4135_v30  ;;  %2584 = vmatprep.subr.bf16.mxu1 %v4136_v36  ;;  %v4191_v30 = vld [vmem:[#allocation10 + $0x1e4] ss:$16 sps:$4 sm:$0xff]   ;;  %v4192_v36 = vld [vmem:[#allocation10 + $0x1ec] ss:$16 sps:$4 sm:$0xff]  }
 0x8ad   :  { %2544 = vmatpush1.bf16.msra.mxu0 %v4137_v50  ;;  %2585 = vmatpush1.bf16.msra.mxu1 %v4138_v44  ;;  %v4193_v50 = vld [vmem:[#allocation10 + $0x1e0] ss:$16 sps:$4 sm:$0xff]   ;;  %v4194_v44 = vld [vmem:[#allocation10 + $0x1e8] ss:$16 sps:$4 sm:$0xff]  }
 0x8ae   :  { %2545 = vmatprep.subr.bf16.mxu0 %v4139_v55  ;;  %2586 = vmatprep.subr.bf16.mxu1 %v4140_v35  ;;  %v5940_v55 = vld [vmem:[#allocation12] sm:$0xff]  }
 0x8b1   :  { %2546 = vmatpush1.bf16.msra.mxu0 %v4141_v38  ;;  %2587 = vmatpush1.bf16.msra.mxu1 %v4142_v22 }
 0x8b2   :  { %2547 = vmatprep.subr.bf16.mxu0 %v4143_v60  ;;  %2588 = vmatprep.subr.bf16.mxu1 %v4144_v40 }
 0x8b5   :  { %2548 = vmatpush1.bf16.msra.mxu0 %v4145_v37  ;;  %2589 = vmatpush1.bf16.msra.mxu1 %v4146_v47 }
 0x8b6   :  { %2549 = vmatprep.subr.bf16.mxu0 %v4147_v59  ;;  %2590 = vmatprep.subr.bf16.mxu1 %v4148_v46 }
 0x8b9   :  { %2550 = vmatpush1.bf16.msra.mxu0 %v4149_v43  ;;  %2591 = vmatpush1.bf16.msra.mxu1 %v4150_v42 }
 0x8ba   :  { %2551 = vmatprep.subr.bf16.mxu0 %v4151_v48  ;;  %2592 = vmatprep.subr.bf16.mxu1 %v4152_v39 }
 0x8bd   :  { %2552 = vmatpush1.bf16.msra.mxu0 %v4153_v25  ;;  %2593 = vmatpush1.bf16.msra.mxu1 %v4154_v51 }
 0x8be   :  { %2553 = vmatprep.subr.bf16.mxu0 %v4155_v10  ;;  %2594 = vmatprep.subr.bf16.mxu1 %v4156_v13 }
 0x8c1   :  { %2554 = vmatpush1.bf16.msra.mxu0 %v4157_v15  ;;  %2595 = vmatpush1.bf16.msra.mxu1 %v4158_v17 }
 0x8c2   :  { %2555 = vmatprep.subr.bf16.mxu0 %v4159_v18  ;;  %2596 = vmatprep.subr.bf16.mxu1 %v4160_v20 }
 0x8c5   :  { %2556 = vmatpush1.bf16.msra.mxu0 %v4161_v21  ;;  %2597 = vmatpush1.bf16.msra.mxu1 %v4162_v23 }
 0x8c6   :  { %2557 = vmatprep.subr.bf16.mxu0 %v4163_v24  ;;  %2598 = vmatprep.subr.bf16.mxu1 %v4164_v27  ;;  %v6660_v24 = vld [vmem:[#allocation90_spill] sm:$0xff] }
 0x8c9   :  { %2558 = vmatpush1.bf16.msra.mxu0 %v4165_v29  ;;  %2599 = vmatpush1.bf16.msra.mxu1 %v4166_v1 }
 0x8ca   :  { %2559 = vmatprep.subr.bf16.mxu0 %v4167_v34  ;;  %2600 = vmatprep.subr.bf16.mxu1 %v4168_v16  ;;  %v6661_v34 = vld [vmem:[#allocation91_spill] sm:$0xff] }
 0x8cd   :  { %2560 = vmatpush1.bf16.msra.mxu0 %v4169_v57  ;;  %2601 = vmatpush1.bf16.msra.mxu1 %v4170_v19 }
 0x8ce   :  { %2561 = vmatprep.subr.bf16.mxu0 %v4171_v3  ;;  %2602 = vmatprep.subr.bf16.mxu1 %v4172_v63 }
 0x8d1   :  { %2562 = vmatpush1.bf16.msra.mxu0 %v4173_v2  ;;  %2603 = vmatpush1.bf16.msra.mxu1 %v4174_v6 }
 0x8d2   :  { %2563 = vmatprep.subr.bf16.mxu0 %v4175_v61  ;;  %2604 = vmatprep.subr.bf16.mxu1 %v4176_v14 }
 0x8d5   :  { %2564 = vmatpush1.bf16.msra.mxu0 %v4177_v4  ;;  %2605 = vmatpush1.bf16.msra.mxu1 %v4178_v31 }
 0x8d6   :  { %2565 = vmatprep.subr.bf16.mxu0 %v4179_v54  ;;  %2606 = vmatprep.subr.bf16.mxu1 %v4180_v0 }
 0x8d9   :  { %2566 = vmatpush1.bf16.msra.mxu0 %v4181_v58  ;;  %2607 = vmatpush1.bf16.msra.mxu1 %v4182_v49 }
 0x8da   :  { %2567 = vmatprep.subr.bf16.mxu0 %v4183_v26  ;;  %2608 = vmatprep.subr.bf16.mxu1 %v4184_v7 }
 0x8dd   :  { %2568 = vmatpush1.bf16.msra.mxu0 %v4185_v9  ;;  %2609 = vmatpush1.bf16.msra.mxu1 %v4186_v62 }
 0x8de   :  { %2569 = vmatprep.subr.bf16.mxu0 %v4187_v41  ;;  %2610 = vmatprep.subr.bf16.mxu1 %v4188_v45 }
 0x8e1   :  { %2570 = vmatpush1.bf16.msra.mxu0 %v4189_v32  ;;  %2611 = vmatpush1.bf16.msra.mxu1 %v4190_v33  ;;  %v6662_v32 = vld [vmem:[#allocation86_spill] sm:$0xff] }
 0x8e2   :  { %2571 = vmatprep.subr.bf16.mxu0 %v4191_v30  ;;  %2612 = vmatprep.subr.bf16.mxu1 %v4192_v36 }
 0x8e5   :  { %2572 = vmatpush1.bf16.msra.mxu0 %v4193_v50  ;;  %2613 = vmatpush1.bf16.msra.mxu1 %v4194_v44 }
 0x8e6   :  { %3606 = vmatprep.subr.bf16.mxu1 %v6335_v12  ;;  %3582 = vmatprep.subr.bf16.mxu0 %v5940_v55 }
 0x95b   :  { %v2365_v35 = vpop.f32.mrb[68].mxu0  ;;  %v2406_v38 = vpop.f32.mrb[60].mxu1 }
 0x95c   :  { %v2366_v22 = vadd.f32 %v2365_v35, %v6654_v28  ;;  %v2367_v60 = vpop.f32.mrb[69].mxu0  ;;  %v2408_v40 = vpop.f32.mrb[61].mxu1  ;;  %v2407_v17 = vadd.f32 %v2406_v38, %v5075_v56 }
 0x95d   :  { %v2369_v37 = vpop.f32.mrb[70].mxu0  ;;  %v2410_v47 = vpop.f32.mrb[62].mxu1  ;;  %v2368_v42 = vadd.f32 %v2367_v60, %v6655_v53  ;;  %v2409_v13 = vadd.f32 %v2408_v40, %v6656_v11  ;;  %v5957_v60 = vld [vmem:[#allocation3] sm:$0xff] }
 0x95e   :  { %v3271_v59 = vmul.f32 -1.442695, %v2366_v22  ;;  %v2370_v46 = vpop.f32.mrb[71].mxu0  ;;  %v2411_v43 = vpop.f32.mrb[63].mxu1  ;;  %v3800_v22 = vld [vmem:[#allocation12 + $0x8] sm:$0xff]   ;;  %v3802_v40 = vld [vmem:[#allocation12 + $0x18] sm:$0xff]  }
 0x95f   :  { %v3272_v48 = vmul.f32 -1.442695, %v2368_v42  ;;  %v3804_v37 = vld [vmem:[#allocation12 + $0x28] sm:$0xff]   ;;  %v3805_v47 = vld [vmem:[#allocation12 + $0x30] sm:$0xff]  }
 0x960   :  { %3953 = vpow2.f32 %v3271_v59  ;;  %v5964_v59 = vld [vmem:[#allocation3 + $0x8] sm:$0xff]  ;;  %v5967_v46 = vld [vmem:[#allocation3 + $0x10] sm:$0xff] }
 0x961   :  { %3955 = vpow2.f32 %v3272_v48 }
 0x96a   :  { %v3954_v39 = vpop.eup %3953 }
 0x96b   :  { %v2419_v25 = vadd.f32 1.0, %v3954_v39  ;;  %v3956_v51 = vpop.eup %3955 }
 0x96c   :  { %v2420_v10 = vadd.f32 1.0, %v3956_v51 }
 0x96d   :  { %3957 = vrcp.f32 %v2419_v25 }
 0x96e   :  { %3959 = vrcp.f32 %v2420_v10 }
 0x977   :  { %v3958_v15 = vpop.eup %3957 }
 0x978   :  { %v2425_v18 = vmul.f32 %v3958_v15, %v2409_v13  ;;  %v3960_v6 = vpop.eup %3959 }
 0x979   :  { %v2428_v14 = vsub.f32 1.0, %v3960_v6  ;;  %v2430_v54 = vmul.f32 %v3960_v6, %v5891_v5 }
 0x97a   :  { %v2426_v20 = vadd.f32 %v2425_v18, %v2407_v17 }
 0x97b   :  { %v2471_v21 = vpop.f32.mrb[72].mxu0  ;;  %v2512_v23 = vpop.f32.mrb[64].mxu1 }
 0x97c   :  { %3961 = vtanh.f32 %v2426_v20  ;;  %v2518_v27 = vadd.f32 %v2471_v21, %v6660_v24  ;;  %v2473_v29 = vpop.f32.mrb[73].mxu0  ;;  %v3580_v1 = vpop.f32.mrb[65].mxu1  ;;  %v2532_v62 = vadd.f32 %v5898_v52, %v2512_v23  ;;  %v3801_v52 = vld [vmem:[#allocation12 + $0x10] sm:$0xff]  }
 0x97d   :  { %v2519_v16 = vadd.f32 %v2473_v29, %v6661_v34  ;;  %v2475_v57 = vpop.f32.mrb[74].mxu0  ;;  %v2515_v19 = vpop.f32.mrb[66].mxu1 }
 0x97e   :  { %v3273_v3 = vmul.f32 -1.442695, %v2518_v27  ;;  %v2476_v63 = vpop.f32.mrb[75].mxu0  ;;  %v3581_v2 = vpop.f32.mrb[67].mxu1 }
 0x97f   :  { %v3274_v61 = vmul.f32 -1.442695, %v2519_v16  ;;  %v3277_v16 = vld [vmem:[%s6034_s8] ss:$0 sm:$0xff] }
 0x980   :  { %3963 = vpow2.f32 %v3273_v3 }
 0x981   :  { %3965 = vpow2.f32 %v3274_v61 }
 0x986   :  { %v3962_v4 = vpop.eup %3961 }
 0x987   :  { %v2429_v31 = vmul.f32 %v3962_v4, %v2428_v14 }
 0x989   :  { %v5950_v0 = vadd.f32 %v2430_v54, %v2429_v31  ;;  %v3286_v31 = vld [vmem:[%s6035_s9] ss:$0 sm:$0xff] }
 0x98a   :  { %v3964_v58 = vpop.eup %3963 }
 0x98b   :  { %v2526_v49 = vadd.f32 1.0, %v3964_v58  ;;  %v2432_v26 = vpack.c.bf16 %v5950_v0, %v5950_v0  ;;  %v3966_v7 = vpop.eup %3965 }
 0x98c   :  { %v2527_v9 = vadd.f32 1.0, %v3966_v7 }
 0x98d   :  { %3967 = vrcp.f32 %v2526_v49  ;;  %2433 = vst [vmem:[#allocation3 + $0x18] sm:$0xf] %v2432_v26  ;;  %2573 = vmatprep.mubr.bf16.mxu0 %v2432_v26  ;;  %2614 = vmatprep.mubr.bf16.mxu1 %v2432_v26 }
 0x98e   :  { %3969 = vrcp.f32 %v2527_v9 }
 0x997   :  { %v3968_v41 = vpop.eup %3967 }
 0x998   :  { %v2533_v45 = vmul.f32 %v3968_v41, %v2532_v62  ;;  %v3970_v33 = vpop.eup %3969 }
 0x999   :  { %v2536_v30 = vsub.f32 1.0, %v3970_v33  ;;  %v2538_v44 = vmul.f32 %v3970_v33, %v5903_v8  ;;  %v3803_v8 = vld [vmem:[#allocation12 + $0x20] sm:$0xff]  }
 0x99a   :  { %v2534_v5 = vadd.f32 %v2533_v45, %v6662_v32 }
 0x99c   :  { %3971 = vtanh.f32 %v2534_v5 }
 0x9a6   :  { %v3972_v36 = vpop.eup %3971 }
 0x9a7   :  { %v2537_v50 = vmul.f32 %v3972_v36, %v2536_v30 }
 0x9a9   :  { %v2539_v35 = vadd.f32 %v2538_v44, %v2537_v50 }
 0x9ab   :  { %v2540_v38 = vpack.c.bf16 %v2539_v35, %v2539_v35 }
 0x9ad   :  { %2574 = vmatmul.mubr.bf16.vlgmr.msra.gmra.mrb[76].mxu0 %v2540_v38  ;;  %2615 = vmatmul.mubr.bf16.vlgmr.msra.gmra.mrb[68].mxu1 %v2540_v38 }
 0x9ae   :  { %3583 = vmatpush3.bf16.msra.mxu0 %v5940_v55  ;;  %3598 = vmatprep.mubr.bf16.mxu0 %v5957_v60  ;;  %v3806_v55 = vld [vmem:[#allocation12 + $0x38] sm:$0xff]  }
 0x9af   :  { %3584 = vmatprep.subr.bf16.mxu0 %v3800_v22  ;;  %3622 = vmatprep.mubr.msk.bf16.mxu1 %vm4396_vm2, %v6335_v12 }
 0x9b2   :  { %3585 = vmatpush3.bf16.msra.mxu0 %v3800_v22 }
 0x9b3   :  { %3586 = vmatprep.subr.bf16.mxu0 %v3801_v52 }
 0x9b6   :  { %3587 = vmatpush3.bf16.msra.mxu0 %v3801_v52 }
 0x9b7   :  { %3588 = vmatprep.subr.bf16.mxu0 %v3802_v40 }
 0x9ba   :  { %3589 = vmatpush3.bf16.msra.mxu0 %v3802_v40 }
 0x9bb   :  { %3590 = vmatprep.subr.bf16.mxu0 %v3803_v8 }
 0x9be   :  { %3591 = vmatpush3.bf16.msra.mxu0 %v3803_v8 }
 0x9bf   :  { %3592 = vmatprep.subr.bf16.mxu0 %v3804_v37 }
 0x9c2   :  { %3593 = vmatpush3.bf16.msra.mxu0 %v3804_v37 }
 0x9c3   :  { %3594 = vmatprep.subr.bf16.mxu0 %v3805_v47 }
 0x9c6   :  { %3595 = vmatpush3.bf16.msra.mxu0 %v3805_v47 }
 0x9c7   :  { %3596 = vmatprep.subr.bf16.mxu0 %v3806_v55 }
 0x9ca   :  { %3597 = vmatpush3.bf16.msra.mxu0 %v3806_v55 }
 0x9cb   :  { %3626 = vmatprep.subr.bf16.mxu0 %v6335_v12 }
 0x9cd   :  { %3599 = vmatmul.mubr.bf16.vlgmr.msra.gmra.mrb[80].mxu0 %v5964_v59 }
 0x9ce   :  { %3602 = vmatprep.mubr.bf16.mxu0 %v5967_v46 }
 0xa80   :  { %v2575_v43 = vpop.f32.mrb[76].mxu0  ;;  %v2616_v42 = vpop.f32.mrb[68].mxu1 }
 0xa81   :  { %v2576_v48 = vadd.f32 %v2575_v43, %v6654_v28  ;;  %v2577_v39 = vpop.f32.mrb[77].mxu0  ;;  %v2618_v25 = vpop.f32.mrb[69].mxu1  ;;  %v2617_v1 = vadd.f32 %v2616_v42, %v5075_v56 }
 0xa82   :  { %v2579_v51 = vpop.f32.mrb[78].mxu0  ;;  %v2620_v10 = vpop.f32.mrb[70].mxu1  ;;  %v2578_v18 = vadd.f32 %v2577_v39, %v6655_v53  ;;  %v2619_v29 = vadd.f32 %v2618_v25, %v6656_v11  ;;  %v3807_v25 = vld [vmem:[#allocation13] sm:$0xff]  }
 0xa83   :  { %v3275_v13 = vmul.f32 -1.442695, %v2576_v48  ;;  %v2580_v15 = vpop.f32.mrb[79].mxu0  ;;  %v2621_v17 = vpop.f32.mrb[71].mxu1  ;;  %3607 = vmatpush3.bf16.msra.mxu1 %v3807_v25  ;;  %v3808_v51 = vld [vmem:[#allocation13 + $0x8] sm:$0xff]   ;;  %v3809_v10 = vld [vmem:[#allocation13 + $0x10] sm:$0xff]  }
 0xa84   :  { %v3276_v20 = vmul.f32 -1.442695, %v2578_v18  ;;  %3608 = vmatprep.subr.bf16.mxu1 %v6335_v12  ;;  %v3811_v15 = vld [vmem:[#allocation13 + $0x20] sm:$0xff]   ;;  %v3812_v17 = vld [vmem:[#allocation13 + $0x28] sm:$0xff]   ;;  %v3813_v18 = vld [vmem:[#allocation13 + $0x30] sm:$0xff]  }
 0xa85   :  { %3973 = vpow2.f32 %v3275_v13  ;;  %v3810_v13 = vld [vmem:[#allocation13 + $0x18] sm:$0xff]  }
 0xa86   :  { %3975 = vpow2.f32 %v3276_v20  ;;  %v3814_v20 = vld [vmem:[#allocation13 + $0x38] sm:$0xff]  }
 0xa87   :  { %3609 = vmatpush3.bf16.msra.mxu1 %v3808_v51 }
 0xa88   :  { %3610 = vmatprep.subr.bf16.mxu1 %v6335_v12 }
 0xa8b   :  { %3611 = vmatpush3.bf16.msra.mxu1 %v3809_v10  ;;  %v2873_v10 = vunpack.c.l.bf16 %v5957_v60 }
 0xa8c   :  { %3612 = vmatprep.subr.bf16.mxu1 %v6335_v12 }
 0xa8f   :  { %v3974_v21 = vpop.eup %3973  ;;  %3613 = vmatpush3.bf16.msra.mxu1 %v3810_v13  ;;  %v2874_v13 = vunpack.c.h.bf16 %v5957_v60  ;;  %v2878_v60 = vunpack.c.h.bf16 %v5967_v46 }
 0xa90   :  { %v2629_v23 = vadd.f32 1.0, %v3974_v21  ;;  %v3976_v24 = vpop.eup %3975  ;;  %3614 = vmatprep.subr.bf16.mxu1 %v6335_v12  ;;  %v3815_v21 = vld [vmem:[#allocation15] sm:$0xff]  }
 0xa91   :  { %v2630_v27 = vadd.f32 1.0, %v3976_v24  ;;  %3627 = vmatpush3.bf16.msra.mxu0 %v3815_v21  ;;  %v3817_v24 = vld [vmem:[#allocation15 + $0x10] sm:$0xff]  }
 0xa92   :  { %3977 = vrcp.f32 %v2629_v23  ;;  %v3816_v23 = vld [vmem:[#allocation15 + $0x8] sm:$0xff]   ;;  %3628 = vmatprep.subr.bf16.mxu0 %v6335_v12 }
 0xa93   :  { %3979 = vrcp.f32 %v2630_v27  ;;  %3615 = vmatpush3.bf16.msra.mxu1 %v3811_v15  ;;  %v3818_v27 = vld [vmem:[#allocation15 + $0x18] sm:$0xff]  }
 0xa94   :  { %3616 = vmatprep.subr.bf16.mxu1 %v6335_v12 }
 0xa95   :  { %3629 = vmatpush3.bf16.msra.mxu0 %v3816_v23 }
 0xa96   :  { %3630 = vmatprep.subr.bf16.mxu0 %v6335_v12 }
 0xa97   :  { %3617 = vmatpush3.bf16.msra.mxu1 %v3812_v17 }
 0xa98   :  { %3618 = vmatprep.subr.bf16.mxu1 %v6335_v12 }
 0xa99   :  { %3631 = vmatpush3.bf16.msra.mxu0 %v3817_v24 }
 0xa9a   :  { %3632 = vmatprep.subr.bf16.mxu0 %v6335_v12 }
 0xa9b   :  { %3619 = vmatpush3.bf16.msra.mxu1 %v3813_v18 }
 0xa9c   :  { %v3978_v28 = vpop.eup %3977  ;;  %3620 = vmatprep.subr.bf16.mxu1 %v6335_v12 }
 0xa9d   :  { %v2635_v34 = vmul.f32 %v3978_v28, %v2619_v29  ;;  %v3980_v56 = vpop.eup %3979  ;;  %3633 = vmatpush3.bf16.msra.mxu0 %v3818_v27  ;;  %v3819_v29 = vld [vmem:[#allocation15 + $0x20] sm:$0xff]   ;;  %v3820_v28 = vld [vmem:[#allocation15 + $0x28] sm:$0xff]   ;;  %v2876_v27 = vunpack.c.h.bf16 %v5964_v59 }
 0xa9e   :  { %v2638_v14 = vsub.f32 1.0, %v3980_v56  ;;  %v2640_v54 = vmul.f32 %v3980_v56, %v5950_v0  ;;  %3634 = vmatprep.subr.bf16.mxu0 %v6335_v12 }
 0xa9f   :  { %v2636_v53 = vadd.f32 %v2635_v34, %v2617_v1  ;;  %3621 = vmatpush3.bf16.msra.mxu1 %v3814_v20  ;;  %v2875_v20 = vunpack.c.l.bf16 %v5964_v59 }
 0xaa0   :  { %v3600_v57 = vpop.f32.mrb[80].mxu0 }
 0xaa1   :  { %3981 = vtanh.f32 %v2636_v53  ;;  %v2765_v19 = vadd.f32 %v3600_v57, %v3277_v16  ;;  %v2756_v3 = vpop.f32.mrb[81].mxu0  ;;  %3635 = vmatpush3.bf16.msra.mxu0 %v3819_v29 }
 0xaa2   :  { %v2757_v63 = vadd.f32 %v3277_v16, %v2756_v3  ;;  %v3601_v2 = vpop.f32.mrb[82].mxu0  ;;  %3636 = vmatprep.subr.bf16.mxu0 %v6335_v12 }
 0xaa3   :  { %3983 = vtanh.f32 %v2765_v19  ;;  %v2768_v6 = vadd.f32 %v3601_v2, %v3277_v16  ;;  %v2759_v61 = vpop.f32.mrb[83].mxu0 }
 0xaa4   :  { %3985 = vtanh.f32 %v2757_v63  ;;  %v2760_v11 = vadd.f32 %v3277_v16, %v2759_v61 }
 0xaa5   :  { %3987 = vtanh.f32 %v2768_v6  ;;  %3637 = vmatpush3.bf16.msra.mxu0 %v3820_v28 }
 0xaa6   :  { %3989 = vtanh.f32 %v2760_v11  ;;  %3638 = vmatprep.subr.bf16.mxu0 %v6335_v12 }
 0xaab   :  { %v3982_v4 = vpop.eup %3981 }
 0xaac   :  { %v2639_v58 = vmul.f32 %v3982_v4, %v2638_v14 }
 0xaad   :  { %v3984_v49 = vpop.eup %3983 }
 0xaae   :  { %v3986_v26 = vpop.eup %3985  ;;  %v2641_v7 = vadd.f32 %v2640_v54, %v2639_v58  ;;  %v2804_v9 = vmul.f32 %v3984_v49, %v3286_v31 }
 0xaaf   :  { %v3988_v62 = vpop.eup %3987  ;;  %v2802_v41 = vmul.f32 %v3986_v26, %v3286_v31 }
 0xab0   :  { %v3990_v45 = vpop.eup %3989  ;;  %v2642_v32 = vpack.c.bf16 %v2641_v7, %v2641_v7  ;;  %2814 = vadd.xlane.f32.xlu1 %v2804_v9  ;;  %v2805_v33 = vmul.f32 %v3988_v62, %v3286_v31 }
 0xab1   :  { %2810 = vadd.xlane.f32.xlu0 %v2802_v41  ;;  %v2803_v30 = vmul.f32 %v3990_v45, %v3286_v31 }
 0xab2   :  { %v2644_v5 = vrot.slane %v2642_v32, 4 }
 0xab4   :  { %2646 = vst [vmem:[#allocation3 + $0x18] sm:$0xf0] %v2644_v5  ;;  %2816 = vadd.xlane.f32.xlu1 %v2805_v33 }
 0xab5   :  { %2812 = vadd.xlane.f32.xlu0 %v2803_v30 }
 0xabb   :  { %v5981_v36 = vld [vmem:[#allocation3 + $0x18] sm:$0xff] }
 0xabc   :  { %3603 = vmatmul.mubr.bf16.gmra.mrb[84].mxu0 %v5981_v36  ;;  %v2880_v59 = vunpack.c.h.bf16 %v5981_v36 }
 0xabd   :  { %3642 = vmatprep.mubr.msk.bf16.mxu0 %vm4396_vm2, %v6335_v12 }
 0xb3d   :  { %v2815_v34 = vpop.xlane.xlu1 %2814 }
 0xb3e   :  { %v2811_v1 = vpop.xlane.xlu0 %2810 }
 0xb41   :  { %v2817_v53 = vpop.xlane.xlu1 %2816 }
 0xb8f   :  { %v3604_v0 = vpop.f32.mrb[84].mxu0 }
 0xb90   :  { %v2781_v50 = vadd.f32 %v3604_v0, %v3277_v16  ;;  %v2772_v44 = vpop.f32.mrb[85].mxu0 }
 0xb91   :  { %v2773_v35 = vadd.f32 %v3277_v16, %v2772_v44  ;;  %v3605_v38 = vpop.f32.mrb[86].mxu0 }
 0xb92   :  { %v2775_v22 = vpop.f32.mrb[87].mxu0  ;;  %v2784_v52 = vadd.f32 %v3605_v38, %v3277_v16 }
 0xb93   :  { %3991 = vtanh.f32 %v2773_v35  ;;  %v2776_v40 = vadd.f32 %v3277_v16, %v2775_v22  ;;  %v2813_v16 = vpop.xlane.xlu0 %2812 }
 0xb94   :  { %3993 = vtanh.f32 %v2781_v50 }
 0xb95   :  { %3995 = vtanh.f32 %v2776_v40 }
 0xb96   :  { %3997 = vtanh.f32 %v2784_v52 }
 0xb9d   :  { %v3992_v8 = vpop.eup %3991 }
 0xb9e   :  { %v3994_v37 = vpop.eup %3993  ;;  %v2806_v47 = vmul.f32 %v3992_v8, %v3286_v31 }
 0xb9f   :  { %v3996_v55 = vpop.eup %3995  ;;  %v2808_v48 = vmul.f32 %v3994_v37, %v3286_v31 }
 0xba0   :  { %2818 = vadd.xlane.f32.xlu0 %v2806_v47  ;;  %v2807_v43 = vmul.f32 %v3996_v55, %v3286_v31  ;;  %v3998_v42 = vpop.eup %3997 }
 0xba1   :  { %v2809_v39 = vmul.f32 %v3998_v42, %v3286_v31 }
 0xba2   :  { %2820 = vadd.xlane.f32.xlu1 %v2807_v43 }
 0xba4   :  { %2822 = vadd.xlane.f32.xlu0 %v2808_v48 }
 0xba6   :  { %2824 = vadd.xlane.f32.xlu1 %v2809_v39 }
 0xc2d   :  { %v2819_v57 = vpop.xlane.xlu0 %2818 }
 0xc2e   :  { %v2826_v6 = vmax.f32 %v2811_v1, %v2819_v57 }
 0xc2f   :  { %v2821_v19 = vpop.xlane.xlu1 %2820 }
 0xc30   :  { %v2827_v63 = vmax.f32 %v2813_v16, %v2821_v19 }
 0xc31   :  { %v2823_v3 = vpop.xlane.xlu0 %2822 }
 0xc32   :  { %v2828_v61 = vmax.f32 %v2815_v34, %v2823_v3  ;;  %v2830_v56 = vmax.f32 %v2826_v6, %v2827_v63 }
 0xc33   :  { %v2825_v2 = vpop.xlane.xlu1 %2824 }
 0xc34   :  { %v2829_v11 = vmax.f32 %v2817_v53, %v2825_v2 }
 0xc36   :  { %v2831_v14 = vmax.f32 %v2828_v61, %v2829_v11 }
 0xc38   :  { %v2832_v4 = vmax.f32 %v2830_v56, %v2831_v14 }
 0xc3a   :  { %v2833_v31 = vsub.f32 %v2811_v1, %v2832_v4  ;;  %v2834_v54 = vsub.f32 %v2813_v16, %v2832_v4  ;;  %v2835_v58 = vsub.f32 %v2815_v34, %v2832_v4  ;;  %v2836_v49 = vsub.f32 %v2817_v53, %v2832_v4 }
 0xc3b   :  { %v2837_v9 = vsub.f32 %v2819_v57, %v2832_v4  ;;  %v2838_v41 = vsub.f32 %v2821_v19, %v2832_v4  ;;  %v2839_v32 = vsub.f32 %v2823_v3, %v2832_v4  ;;  %v2840_v33 = vsub.f32 %v2825_v2, %v2832_v4 }
 0xc3c   :  { %v2841_v26 = vmul.f32 1.442695, %v2833_v31  ;;  %v2843_v7 = vmul.f32 1.442695, %v2834_v54  ;;  %v2845_v62 = vmul.f32 1.442695, %v2835_v58  ;;  %v2877_v34 = vunpack.c.l.bf16 %v5967_v46 }
 0xc3d   :  { %v2847_v45 = vmul.f32 1.442695, %v2836_v49  ;;  %v2849_v5 = vmul.f32 1.442695, %v2837_v9  ;;  %v2851_v30 = vmul.f32 1.442695, %v2838_v41  ;;  %v2879_v2 = vunpack.c.l.bf16 %v5981_v36 }
 0xc3e   :  { %3999 = vpow2.f32 %v2841_v26  ;;  %v2853_v0 = vmul.f32 1.442695, %v2839_v32  ;;  %v2855_v50 = vmul.f32 1.442695, %v2840_v33  ;;  %v3821_v49 = vld [vmem:[#allocation15 + $0x30] sm:$0xff]   ;;  %v3822_v46 = vld [vmem:[#allocation15 + $0x38] sm:$0xff]  }
 0xc3f   :  { %4001 = vpow2.f32 %v2843_v7  ;;  %3639 = vmatpush3.bf16.msra.mxu0 %v3821_v49  ;;  %v3287_v26 = vld [vmem:[%s6037_s11] ss:$0 sm:$0xff]  ;;  %s4349_s11 = scalar_lea.vmem %s3129_s0, 128 }
 0xc40   :  { %4003 = vpow2.f32 %v2845_v62  ;;  %3640 = vmatprep.subr.bf16.mxu0 %v6335_v12  ;;  %p4350_p0 = scmp.ne.s32.totalorder %s3129_s0, %s4349_s11  ;;  %p4355_p2 = scmp.lt.s32.totalorder %s4349_s11, %s4349_s11 }
 0xc41   :  { %4005 = vpow2.f32 %v2847_v45 }
 0xc42   :  { %4007 = vpow2.f32 %v2849_v5  ;;  %v3296_v5 = vld [vmem:[%s6039_s13] ss:$0 sm:$0xff]  ;;  %p4356_p3 = por %p4355_p2, %p4354_p1 }
 0xc43   :  { %4009 = vpow2.f32 %v2851_v30  ;;  %3641 = vmatpush3.bf16.msra.mxu0 %v3822_v46 }
 0xc44   :  { %4011 = vpow2.f32 %v2853_v0  ;;  %p4357_p4 = pnand %p4356_p3, %p4350_p0 }
 0xc45   :  { %4013 = vpow2.f32 %v2855_v50 }
 0xc48   :  { %v4000_v44 = vpop.eup %3999 }
 0xc49   :  { %v4002_v35 = vpop.eup %4001 }
 0xc4a   :  { %v2857_v38 = vadd.f32 %v4002_v35, %v4000_v44  ;;  %v4004_v22 = vpop.eup %4003 }
 0xc4b   :  { %v4006_v40 = vpop.eup %4005 }
 0xc4c   :  { %v2858_v52 = vadd.f32 %v4004_v22, %v2857_v38  ;;  %v4008_v37 = vpop.eup %4007 }
 0xc4d   :  { %v4010_v55 = vpop.eup %4009 }
 0xc4e   :  { %v2859_v8 = vadd.f32 %v4006_v40, %v2858_v52  ;;  %v4012_v42 = vpop.eup %4011 }
 0xc4f   :  { %v4014_v39 = vpop.eup %4013 }
 0xc50   :  { %v2860_v47 = vadd.f32 %v4008_v37, %v2859_v8 }
 0xc52   :  { %v2861_v43 = vadd.f32 %v4010_v55, %v2860_v47 }
 0xc54   :  { %v2862_v48 = vadd.f32 %v4012_v42, %v2861_v43 }
 0xc56   :  { %v2863_v25 = vadd.f32 %v4014_v39, %v2862_v48 }
 0xc58   :  { %4015 = vrcp.f32 %v2863_v25 }
 0xc62   :  { %v4016_v51 = vpop.eup %4015 }
 0xc63   :  { %v2865_v15 = vmul.f32 %v4016_v51, %v4000_v44  ;;  %v2866_v17 = vmul.f32 %v4016_v51, %v4002_v35  ;;  %v2867_v18 = vmul.f32 %v4016_v51, %v4004_v22  ;;  %v2868_v21 = vmul.f32 %v4016_v51, %v4006_v40 }
 0xc64   :  { %v2869_v29 = vmul.f32 %v4016_v51, %v4008_v37  ;;  %v2870_v16 = vmul.f32 %v4016_v51, %v4010_v55  ;;  %v2871_v19 = vmul.f32 %v4016_v51, %v4012_v42  ;;  %v2872_v6 = vmul.f32 %v4016_v51, %v4014_v39 }
 0xc65   :  { %v2881_v23 = vmul.f32 %v2873_v10, %v2865_v15  ;;  %v2882_v24 = vmul.f32 %v2874_v13, %v2866_v17  ;;  %v2883_v28 = vmul.f32 %v2875_v20, %v2867_v18  ;;  %v2884_v53 = vmul.f32 %v2876_v27, %v2868_v21 }
 0xc66   :  { %v2885_v3 = vmul.f32 %v2877_v34, %v2869_v29  ;;  %v2886_v61 = vmul.f32 %v2878_v60, %v2870_v16  ;;  %v2887_v56 = vmul.f32 %v2879_v2, %v2871_v19  ;;  %v2888_v4 = vmul.f32 %v2880_v59, %v2872_v6 }
 0xc67   :  { %v2889_v1 = vadd.f32 %v2882_v24, %v2881_v23 }
 0xc69   :  { %v2890_v57 = vadd.f32 %v2889_v1, %v2883_v28 }
 0xc6b   :  { %v2891_v63 = vadd.f32 %v2890_v57, %v2884_v53 }
 0xc6d   :  { %v2892_v11 = vadd.f32 %v2891_v63, %v2885_v3 }
 0xc6f   :  { %v2893_v14 = vadd.f32 %v2892_v11, %v2886_v61 }
 0xc71   :  { %v2894_v31 = vadd.f32 %v2893_v14, %v2887_v56 }
 0xc73   :  { %v2895_v54 = vadd.f32 %v2894_v31, %v2888_v4 }
 0xc75   :  { %v2896_v58 = vpack.c.bf16 %v2895_v54, %v2895_v54 }
 0xc77   :  { %3623 = vmatmul.mubr.bf16.vlgmr.msra.gmra.mrb[72].mxu1 %v2896_v58 }
 0xd4a   :  { %v3002_v7 = vpop.f32.mrb[72].mxu1 }
 0xd4b   :  { %v3003_v9 = vadd.f32 %v3287_v26, %v3002_v7  ;;  %v3624_v36 = vpop.f32.mrb[73].mxu1 }
 0xd4c   :  { %v3005_v62 = vpop.f32.mrb[74].mxu1 }
 0xd4d   :  { %v3008_v41 = vmax.f32 %v3003_v9, 0.0  ;;  %v3625_v45 = vpop.f32.mrb[75].mxu1 }
 0xd4f   :  { %v3009_v32 = vpack.c.bf16 %v3008_v41, %v3008_v41 }
 0xd51   :  { %3643 = vmatmul.mubr.bf16.vlgmr.msra.gmra.mrb[88].mxu0 %v3009_v32 }
 0xe24   :  { %v3115_v12 = vpop.f32.mrb[88].mxu0 }
 0xe25   :  { %v3116_v33 = vadd.f32 %v3296_v5, %v3115_v12  ;;  %v3644_v30 = vpop.f32.mrb[89].mxu0 }
 0xe26   :  { %v3118_v0 = vpop.f32.mrb[90].mxu0 }
 0xe27   :  { %3121 = vst [vmem:[#allocation16] sm:$0xff] %v3116_v33  ;;  %v3645_v50 = vpop.f32.mrb[91].mxu0 }
 0xe28   :  { %4360 = shalt.err (!%p4357_p4)
}
 0xe29   :  { %s4361_s13 = scalar_lea.hbm %s6040_s14, 128 }
 0xe2a   :  { %p4362_p5 = scmp.ne.s32.totalorder %s6040_s14, %s4361_s13  ;;  %p4365_p6 = scmp.lt.u32.totalorder %s4361_s13, %s6040_s14 }
 0xe2c   :  { %p4367_p7 = pnand %p4365_p6, %p4362_p5 }
 0xe2e   :  { %4370 = shalt.err (!%p4367_p7)
}
 0xe2f   :  { %3131 = dma.vmem_to_hbm [thread:$0]  %s3129_s0, 128, %s6040_s14, [#allocation6]  }
 0xe30   :  { %4379 = dma.done.wait [#allocation6], 128  }
 0xe31   :  { %4380 = vsyncadd [#allocation6], 4294967168 }
 0xe32   :  { %3135 = vsyncpa [#allocation5], 1 }
 0xe33   :  { %3136 = vsyncpa [#allocation8], 1 }
 0xe34   :  { %3137 = vsyncpa [#allocation11], 1 }
 0xe35   :  { %3138 = vsyncpa [#allocation14], 1 }
 0xe36   :  { %3139 = vsyncpa [#allocation6], 1 }

</bundles_post_ra>
